<compile_context>
chip_gen: v7x
topology: tpu7x:2x2x1
jax: 0.10.0
libtpu: 0.0.40
codegen_flags: <defaults>
</compile_context>

<pallas_src>
import math
import jax
import jax.numpy as jnp
from jax.experimental import pallas as pl
from jax.experimental.pallas import tpu as pltpu

# ----- reduced-size (module-consistent) constructor hyper-params -------------
EMB_SIZE = 128
NHEAD = 4
HEAD_DIM = EMB_SIZE // NHEAD
FFN_HID_DIM = 256
NUM_ENC_LAYERS = 2
NUM_DEC_LAYERS = 2
SRC_VOCAB = 96
TRG_VOCAB = 80
PAD_IDX = 1
LN_EPS = 1e-5
GEN_PAD = 128                  # generator output padded to a full 128-lane slab
POS_MAXLEN = 64
MXU_DTYPE = jnp.bfloat16       # MXU operand dtype (f32 accumulation everywhere)


# --------------------- packed-parameter column layouts -----------------------
def _layout(items):
    off, cur = {}, 0
    for name, width in items:
        off[name] = (cur, width)
        cur += width
    return off, cur


_E, _F = EMB_SIZE, FFN_HID_DIM
_we_items, _wf_items, _vec_items = [], [], []
for _l in range(NUM_ENC_LAYERS):
    _we_items += [(f'e_qkv_{_l}', 3 * _E), (f'e_out_{_l}', _E), (f'e_ff1_{_l}', _F)]
    _wf_items += [(f'e_ff2_{_l}', _E)]
    _vec_items += [(f'e_qkv_b_{_l}', 3 * _E), (f'e_out_b_{_l}', _E), (f'e_ff1_b_{_l}', _F),
                   (f'e_ff2_b_{_l}', _E), (f'e_n1_g_{_l}', _E), (f'e_n1_b_{_l}', _E),
                   (f'e_n2_g_{_l}', _E), (f'e_n2_b_{_l}', _E)]
for _l in range(NUM_DEC_LAYERS):
    _we_items += [(f'd_sa_qkv_{_l}', 3 * _E), (f'd_sa_out_{_l}', _E), (f'd_ca_q_{_l}', _E),
                  (f'd_ca_kv_{_l}', 2 * _E), (f'd_ca_out_{_l}', _E), (f'd_ff1_{_l}', _F)]
    _wf_items += [(f'd_ff2_{_l}', _E)]
    _vec_items += [(f'd_sa_qkv_b_{_l}', 3 * _E), (f'd_sa_out_b_{_l}', _E),
                   (f'd_ca_q_b_{_l}', _E), (f'd_ca_kv_b_{_l}', 2 * _E),
                   (f'd_ca_out_b_{_l}', _E), (f'd_ff1_b_{_l}', _F), (f'd_ff2_b_{_l}', _E),
                   (f'd_n1_g_{_l}', _E), (f'd_n1_b_{_l}', _E), (f'd_n2_g_{_l}', _E),
                   (f'd_n2_b_{_l}', _E), (f'd_n3_g_{_l}', _E), (f'd_n3_b_{_l}', _E)]
_we_items += [('gen', GEN_PAD)]
_vec_items += [('enc_n_g', _E), ('enc_n_b', _E), ('dec_n_g', _E), ('dec_n_b', _E),
               ('gen_b', GEN_PAD)]

# all widths are multiples of 128 -> every column offset is lane-aligned
WE_OFF, WE_TOTAL = _layout(_we_items)      # bf16 slab, shape (E, WE_TOTAL)
WF_OFF, WF_TOTAL = _layout(_wf_items)      # bf16 slab, shape (F, WF_TOTAL)
VEC_OFF, VEC_TOTAL = _layout(_vec_items)   # f32 slab,  shape (1, VEC_TOTAL)


# ============================ fused forward kernel ===========================
def _fused_kernel(src_tok_ref, trg_tok_ref, src_kpm_ref, trg_kpm_ref,
                  src_emb_ref, trg_emb_ref, pos_ref,
                  w_e_ref, w_f_ref, vec_ref, out_ref):
    E, H, dh = EMB_SIZE, NHEAD, HEAD_DIM
    Ss = src_tok_ref.shape[1]
    St = trg_tok_ref.shape[1]

    # ---- static-offset views into the packed parameter slabs ----
    def we(name):
        off, w = WE_OFF[name]
        return w_e_ref[:, off:off + w]                 # (E, w) bf16

    def wf(name):
        off, w = WF_OFF[name]
        return w_f_ref[:, off:off + w]                 # (F, w) bf16

    def vec(name):
        off, w = VEC_OFF[name]
        return vec_ref[:, off:off + w]                 # (1, w) f32

    def mxu(a, w_bf16):                                # bf16 operands, f32 accumulation
        return jnp.dot(a.astype(MXU_DTYPE), w_bf16, preferred_element_type=jnp.float32)

    def layer_norm(x, g, b):                           # f32 math on the VPU
        mu = jnp.mean(x, axis=-1, keepdims=True)
        var = jnp.mean(jnp.square(x - mu), axis=-1, keepdims=True)
        return (x - mu) * jax.lax.rsqrt(var + LN_EPS) * g + b

    def attention(q, k, v, bias):
        # q:(Sq,E), k/v:(Sk,E).  Heads are stacked into a batch dim so each site is a
        # single batched MXU matmul pair + one batched softmax; head outputs are
        # re-assembled lane-dense (Sq,128) -> no masked partial stores, no scratch.
        qh = jnp.concatenate([q[:, h * dh:(h + 1) * dh][None] for h in range(H)], axis=0)
        kh = jnp.concatenate([k[:, h * dh:(h + 1) * dh][None] for h in range(H)], axis=0)
        vh = jnp.concatenate([v[:, h * dh:(h + 1) * dh][None] for h in range(H)], axis=0)
        s = jnp.einsum('hqd,hkd->hqk', qh.astype(MXU_DTYPE), kh.astype(MXU_DTYPE),
                       preferred_element_type=jnp.float32)       # (H, Sq, Sk) f32
        s = s + bias                        # 1/sqrt(dh) already folded into Q weights
        s = s - jnp.max(s, axis=-1, keepdims=True)
        p = jnp.exp(s)
        p = p / jnp.sum(p, axis=-1, keepdims=True)               # exact divide
        o = jnp.einsum('hqk,hkd->hqd', p.astype(MXU_DTYPE), vh.astype(MXU_DTYPE),
                       preferred_element_type=jnp.float32)       # (H, Sq, dh)
        return jnp.concatenate([o[h] for h in range(H)], axis=-1)   # (Sq, E) lane-dense

    def self_attn(x, wq, bq, wo, bo, bias):
        qkv = mxu(x, we(wq)) + vec(bq)                 # fused Q/K/V projection
        q, k, v = qkv[:, 0:E], qkv[:, E:2 * E], qkv[:, 2 * E:3 * E]
        return mxu(attention(q, k, v, bias), we(wo)) + vec(bo)

    def cross_attn(x, mem, wq, bq, wkv, bkv, wo, bo, bias):
        q = mxu(x, we(wq)) + vec(bq)
        kv = mxu(mem, we(wkv)) + vec(bkv)              # fused K/V projection
        k, v = kv[:, 0:E], kv[:, E:2 * E]
        return mxu(attention(q, k, v, bias), we(wo)) + vec(bo)

    def ffn(x, w1, b1, w2, b2):
        h = jnp.maximum(mxu(x, we(w1)) + vec(b1), 0.0)
        return mxu(h, wf(w2)) + vec(b2)

    def embed(tok_ref, emb_ref, S, V):
        # embedding lookup as one-hot @ table on the MXU (table pre-scaled by sqrt(E))
        tok = tok_ref[0]                                               # (S, 1) int32
        onehot = jnp.where(jax.lax.broadcasted_iota(jnp.int32, (S, V), 1) == tok,
                           1.0, 0.0).astype(MXU_DTYPE)                 # (S, V) bf16
        x = jnp.dot(onehot, emb_ref[...], preferred_element_type=jnp.float32)
        return x + pos_ref[0:S, :]                                     # + positional enc

    # ---- additive masks (PyTorch float key-padding-mask semantics: ADDED to logits) ----
    src_kpm = src_kpm_ref[...]                                         # (1, 1, Ss)
    trg_kpm = trg_kpm_ref[...]                                         # (1, 1, St)
    row_i = jax.lax.broadcasted_iota(jnp.int32, (St, St), 0)
    col_i = jax.lax.broadcasted_iota(jnp.int32, (St, St), 1)
    causal = jnp.where(col_i > row_i, float('-inf'), 0.0).astype(jnp.float32)
    enc_bias = src_kpm                                                 # (1, 1, Ss)
    dec_self_bias = causal[None, :, :] + trg_kpm                       # (1, St, St)
    dec_cross_bias = src_kpm                                           # (1, 1, Ss)

    # ---------------- encoder (post-norm layers) ----------------
    x = embed(src_tok_ref, src_emb_ref, Ss, SRC_VOCAB)
    for l in range(NUM_ENC_LAYERS):
        sa = self_attn(x, f'e_qkv_{l}', f'e_qkv_b_{l}', f'e_out_{l}', f'e_out_b_{l}',
                       enc_bias)
        x = layer_norm(x + sa, vec(f'e_n1_g_{l}'), vec(f'e_n1_b_{l}'))
        h = ffn(x, f'e_ff1_{l}', f'e_ff1_b_{l}', f'e_ff2_{l}', f'e_ff2_b_{l}')
        x = layer_norm(x + h, vec(f'e_n2_g_{l}'), vec(f'e_n2_b_{l}'))
    memory = layer_norm(x, vec('enc_n_g'), vec('enc_n_b'))

    # ---------------- decoder (post-norm layers) ----------------
    y = embed(trg_tok_ref, trg_emb_ref, St, TRG_VOCAB)
    for l in range(NUM_DEC_LAYERS):
        sa = self_attn(y, f'd_sa_qkv_{l}', f'd_sa_qkv_b_{l}', f'd_sa_out_{l}',
                       f'd_sa_out_b_{l}', dec_self_bias)
        y = layer_norm(y + sa, vec(f'd_n1_g_{l}'), vec(f'd_n1_b_{l}'))
        ca = cross_attn(y, memory, f'd_ca_q_{l}', f'd_ca_q_b_{l}', f'd_ca_kv_{l}',
                        f'd_ca_kv_b_{l}', f'd_ca_out_{l}', f'd_ca_out_b_{l}',
                        dec_cross_bias)
        y = layer_norm(y + ca, vec(f'd_n2_g_{l}'), vec(f'd_n2_b_{l}'))
        h = ffn(y, f'd_ff1_{l}', f'd_ff1_b_{l}', f'd_ff2_{l}', f'd_ff2_b_{l}')
        y = layer_norm(y + h, vec(f'd_n3_g_{l}'), vec(f'd_n3_b_{l}'))
    y = layer_norm(y, vec('dec_n_g'), vec('dec_n_b'))

    # ---------------- generator (lane-padded to 128 columns) ----------------
    logits = mxu(y, we('gen')) + vec('gen_b')                          # (St, GEN_PAD)
    out_ref[...] = logits[None, :, :].astype(out_ref.dtype)


# =============================== parameter init ==============================
def positional_encoding_table(emb_size, maxlen=POS_MAXLEN):
    den = jnp.exp(-jnp.arange(0, emb_size, 2, dtype=jnp.float32)
                  * math.log(10000.0) / emb_size)
    pos = jnp.arange(0, maxlen, dtype=jnp.float32).reshape(maxlen, 1)
    pe = jnp.zeros((maxlen, emb_size), jnp.float32)
    pe = pe.at[:, 0::2].set(jnp.sin(pos * den))
    pe = pe.at[:, 1::2].set(jnp.cos(pos * den))
    return pe                                         # (maxlen, E) f32


def init_params(key):
    E, F = EMB_SIZE, FFN_HID_DIM
    keys = iter(jax.random.split(key, 64))

    def nrm(shape):
        return jax.random.normal(next(keys), shape, jnp.float32) * 0.02

    # raw (in, out)-layout weight matrices keyed by packed-layout names
    mats = {}
    for l in range(NUM_ENC_LAYERS):
        mats[f'e_qkv_{l}'] = nrm((E, 3 * E))
        mats[f'e_out_{l}'] = nrm((E, E))
        mats[f'e_ff1_{l}'] = nrm((E, F))
        mats[f'e_ff2_{l}'] = nrm((F, E))
    for l in range(NUM_DEC_LAYERS):
        mats[f'd_sa_qkv_{l}'] = nrm((E, 3 * E))
        mats[f'd_sa_out_{l}'] = nrm((E, E))
        mats[f'd_ca_q_{l}'] = nrm((E, E))
        mats[f'd_ca_kv_{l}'] = nrm((E, 2 * E))
        mats[f'd_ca_out_{l}'] = nrm((E, E))
        mats[f'd_ff1_{l}'] = nrm((E, F))
        mats[f'd_ff2_{l}'] = nrm((F, E))
    mats['gen'] = jnp.zeros((E, GEN_PAD), jnp.float32).at[:, :TRG_VOCAB].set(
        nrm((E, TRG_VOCAB)))

    # 1-D params: biases zero, layer-norm gains one
    vecs = {}
    for name, (_, w) in VEC_OFF.items():
        is_gain = ('_g_' in name) or name.endswith('_n_g')
        vecs[name] = jnp.ones((w,), jnp.float32) if is_gain else jnp.zeros((w,), jnp.float32)

    # fold 1/sqrt(head_dim) attention scale into the Q projections (init-time, free)
    scale = 1.0 / math.sqrt(HEAD_DIM)
    for l in range(NUM_ENC_LAYERS):
        mats[f'e_qkv_{l}'] = mats[f'e_qkv_{l}'].at[:, :E].multiply(scale)
        vecs[f'e_qkv_b_{l}'] = vecs[f'e_qkv_b_{l}'].at[:E].multiply(scale)
    for l in range(NUM_DEC_LAYERS):
        mats[f'd_sa_qkv_{l}'] = mats[f'd_sa_qkv_{l}'].at[:, :E].multiply(scale)
        vecs[f'd_sa_qkv_b_{l}'] = vecs[f'd_sa_qkv_b_{l}'].at[:E].multiply(scale)
        mats[f'd_ca_q_{l}'] = mats[f'd_ca_q_{l}'] * scale
        vecs[f'd_ca_q_b_{l}'] = vecs[f'd_ca_q_b_{l}'] * scale

    # pack into three DMA-friendly slabs (weights stored bf16 ONCE, no per-call casts)
    w_e = jnp.zeros((E, WE_TOTAL), jnp.float32)
    for name, (off, w) in WE_OFF.items():
        w_e = w_e.at[:, off:off + w].set(mats[name])
    w_f = jnp.zeros((F, WF_TOTAL), jnp.float32)
    for name, (off, w) in WF_OFF.items():
        w_f = w_f.at[:, off:off + w].set(mats[name])
    vec = jnp.zeros((1, VEC_TOTAL), jnp.float32)
    for name, (off, w) in VEC_OFF.items():
        vec = vec.at[0, off:off + w].set(vecs[name])

    return {
        # embedding tables pre-scaled by sqrt(E), stored bf16 (f32 accumulation in-kernel)
        'src_emb': (nrm((SRC_VOCAB, E)) * math.sqrt(E)).astype(jnp.bfloat16),
        'trg_emb': (nrm((TRG_VOCAB, E)) * math.sqrt(E)).astype(jnp.bfloat16),
        'pos': positional_encoding_table(E),
        'w_e': w_e.astype(jnp.bfloat16),
        'w_f': w_f.astype(jnp.bfloat16),
        'vec': vec,
    }


# ================================ forward pass ===============================
def seq2seq_forward(params, src, trg):
    Ss, B = src.shape
    St, _ = trg.shape

    # batch-major token columns + float key-padding masks (tiny host-side relayouts;
    # embedding gather / sqrt(E) scale / positional add all run inside the kernel)
    src_tok = src.T.reshape(B, Ss, 1).astype(jnp.int32)
    trg_tok = trg.T.reshape(B, St, 1).astype(jnp.int32)
    src_kpm = (src == PAD_IDX).astype(jnp.float32).T.reshape(B, 1, Ss)
    trg_kpm = (trg == PAD_IDX).astype(jnp.float32).T.reshape(B, 1, St)

    def rep(arr):                        # replicated block (weights): same tile every step
        zeros = (0,) * arr.ndim
        return pl.BlockSpec(arr.shape, lambda b: zeros)

    in_specs = [
        pl.BlockSpec((1, Ss, 1), lambda b: (b, 0, 0)),
        pl.BlockSpec((1, St, 1), lambda b: (b, 0, 0)),
        pl.BlockSpec((1, 1, Ss), lambda b: (b, 0, 0)),
        pl.BlockSpec((1, 1, St), lambda b: (b, 0, 0)),
        rep(params['src_emb']), rep(params['trg_emb']), rep(params['pos']),
        rep(params['w_e']), rep(params['w_f']), rep(params['vec']),
    ]

    logits_pad = pl.pallas_call(
        _fused_kernel,
        out_shape=jax.ShapeDtypeStruct((B, St, GEN_PAD), jnp.float32),
        grid=(B,),
        in_specs=in_specs,
        out_specs=pl.BlockSpec((1, St, GEN_PAD), lambda b: (b, 0, 0)),
        compiler_params=pltpu.CompilerParams(
            dimension_semantics=("parallel",),      # batch elements are independent
            vmem_limit_bytes=32 * 1024 * 1024),
    )(src_tok, trg_tok, src_kpm, trg_kpm,
      params['src_emb'], params['trg_emb'], params['pos'],
      params['w_e'], params['w_f'], params['vec'])

    # un-pad the generator columns, return seq-first (St, B, TRG_VOCAB)
    return logits_pad[:, :, :TRG_VOCAB].transpose(1, 0, 2)


# ==================================== main ===================================
if __name__ == "__main__":
    key = jax.random.PRNGKey(0)
    k_p, k_src, k_trg = jax.random.split(key, 3)

    params = init_params(k_p)

    SRC_SEQ, TRG_SEQ, BATCH = 8, 8, 2
    src = jax.random.randint(k_src, (SRC_SEQ, BATCH), 0, SRC_VOCAB, dtype=jnp.int32)
    trg = jax.random.randint(k_trg, (TRG_SEQ, BATCH), 0, TRG_VOCAB, dtype=jnp.int32)

    logits = jax.jit(seq2seq_forward)(params, src, trg)
    logits = jax.block_until_ready(logits)

    assert logits.shape == (TRG_SEQ, BATCH, TRG_VOCAB)
    assert bool(jnp.all(jnp.isfinite(logits)))
    print("KERNEL_OK")
</pallas_src>

<mosaic_0001>
module attributes {stable_mosaic.version = 11 : i64} {
  func.func @_fused_kernel(%arg0: i32, %arg1: memref<1x8x1xi32, #tpu.memory_space<vmem>>, %arg2: memref<1x8x1xi32, #tpu.memory_space<vmem>>, %arg3: memref<1x1x8xf32, #tpu.memory_space<vmem>>, %arg4: memref<1x1x8xf32, #tpu.memory_space<vmem>>, %arg5: memref<96x128xbf16, #tpu.memory_space<vmem>>, %arg6: memref<80x128xbf16, #tpu.memory_space<vmem>>, %arg7: memref<64x128xf32, #tpu.memory_space<vmem>>, %arg8: memref<128x4224xbf16, #tpu.memory_space<vmem>>, %arg9: memref<256x512xbf16, #tpu.memory_space<vmem>>, %arg10: memref<1x7808xf32, #tpu.memory_space<vmem>>, %arg11: memref<1x8x128xf32, #tpu.memory_space<vmem>>) attributes {dimension_semantics = [#tpu.dimension_semantics<parallel>], iteration_bounds = array<i64: 2>, scalar_prefetch = 0 : i64, scratch_operands = 0 : i64, tpu.core_type = #tpu.core_type<tc>, window_params = [{transform_indices = @transform_0, window_bounds = array<i64: 1, 8, 1>}, {transform_indices = @transform_1, window_bounds = array<i64: 1, 8, 1>}, {transform_indices = @transform_2, window_bounds = array<i64: 1, 1, 8>}, {transform_indices = @transform_3, window_bounds = array<i64: 1, 1, 8>}, {pipeline_mode = #tpu.pipeline_mode<synchronous>, transform_indices = @transform_4, window_bounds = array<i64: 96, 128>}, {pipeline_mode = #tpu.pipeline_mode<synchronous>, transform_indices = @transform_5, window_bounds = array<i64: 80, 128>}, {pipeline_mode = #tpu.pipeline_mode<synchronous>, transform_indices = @transform_6, window_bounds = array<i64: 64, 128>}, {pipeline_mode = #tpu.pipeline_mode<synchronous>, transform_indices = @transform_7, window_bounds = array<i64: 128, 4224>}, {pipeline_mode = #tpu.pipeline_mode<synchronous>, transform_indices = @transform_8, window_bounds = array<i64: 256, 512>}, {pipeline_mode = #tpu.pipeline_mode<synchronous>, transform_indices = @transform_9, window_bounds = array<i64: 1, 7808>}, {transform_indices = @transform_10, window_bounds = array<i64: 1, 8, 128>}]} {
    %c0 = arith.constant 0 : index
    %c0_0 = arith.constant 0 : index
    %c0_1 = arith.constant 0 : index
    %0 = vector.load %arg3[%c0, %c0_0, %c0_1] : memref<1x1x8xf32, #tpu.memory_space<vmem>>, vector<1x1x8xf32>
    %c0_2 = arith.constant 0 : index
    %c0_3 = arith.constant 0 : index
    %c0_4 = arith.constant 0 : index
    %1 = vector.load %arg4[%c0_2, %c0_3, %c0_4] : memref<1x1x8xf32, #tpu.memory_space<vmem>>, vector<1x1x8xf32>
    %2 = tpu.iota {dimensions = array<i32: 0>} : vector<8x8xi32>
    %3 = tpu.iota {dimensions = array<i32: 1>} : vector<8x8xi32>
    %4 = arith.cmpi sgt, %3, %2 : vector<8x8xi32>
    %cst = arith.constant 0xFF800000 : f32
    %cst_5 = arith.constant 0.000000e+00 : f32
    %5 = vector.broadcast %cst : f32 to vector<8x8xf32>
    %6 = vector.broadcast %cst_5 : f32 to vector<8x8xf32>
    %7 = arith.select %4, %5, %6 : vector<8x8xi1>, vector<8x8xf32>
    %8 = vector.shape_cast %7 : vector<8x8xf32> to vector<1x8x8xf32>
    %9 = vector.broadcast %1 : vector<1x1x8xf32> to vector<1x8x8xf32>
    %10 = arith.addf %8, %9 : vector<1x8x8xf32>
    %c0_6 = arith.constant 0 : index
    %c0_7 = arith.constant 0 : index
    %c0_8 = arith.constant 0 : index
    %11 = vector.load %arg1[%c0_6, %c0_7, %c0_8] : memref<1x8x1xi32, #tpu.memory_space<vmem>>, vector<1x8x1xi32>
    %12 = vector.shape_cast %11 : vector<1x8x1xi32> to vector<8x1xi32>
    %13 = tpu.iota {dimensions = array<i32: 1>} : vector<8x96xi32>
    %14 = vector.broadcast %12 : vector<8x1xi32> to vector<8x96xi32>
    %15 = arith.cmpi eq, %13, %14 : vector<8x96xi32>
    %cst_9 = arith.constant 1.000000e+00 : f32
    %cst_10 = arith.constant 0.000000e+00 : f32
    %16 = vector.broadcast %cst_9 : f32 to vector<8x96xf32>
    %17 = vector.broadcast %cst_10 : f32 to vector<8x96xf32>
    %18 = arith.select %15, %16, %17 : vector<8x96xi1>, vector<8x96xf32>
    %19 = arith.truncf %18 : vector<8x96xf32> to vector<8x96xbf16>
    %c0_11 = arith.constant 0 : index
    %c0_12 = arith.constant 0 : index
    %20 = vector.load %arg5[%c0_11, %c0_12] : memref<96x128xbf16, #tpu.memory_space<vmem>>, vector<96x128xbf16>
    %cst_13 = arith.constant dense<0.000000e+00> : vector<8x128xf32>
    %21 = tpu.matmul %19, %20, %cst_13 {dimension_numbers = #tpu.dot_dimension_numbers<[1], [0], [0], [1], [0, 0, 1, 1], [], []>} : vector<8x96xbf16>, vector<96x128xbf16>, vector<8x128xf32> -> vector<8x128xf32>
    %c0_14 = arith.constant 0 : index
    %c0_15 = arith.constant 0 : index
    %22 = vector.load %arg7[%c0_14, %c0_15] : memref<64x128xf32, #tpu.memory_space<vmem>>, vector<8x128xf32>
    %23 = arith.addf %21, %22 : vector<8x128xf32>
    %c0_16 = arith.constant 0 : index
    %c0_17 = arith.constant 0 : index
    %24 = vector.load %arg8[%c0_16, %c0_17] : memref<128x4224xbf16, #tpu.memory_space<vmem>>, vector<128x384xbf16>
    %25 = arith.truncf %23 : vector<8x128xf32> to vector<8x128xbf16>
    %cst_18 = arith.constant dense<0.000000e+00> : vector<8x384xf32>
    %26 = tpu.matmul %25, %24, %cst_18 {dimension_numbers = #tpu.dot_dimension_numbers<[1], [0], [0], [1], [0, 0, 1, 1], [], []>} : vector<8x128xbf16>, vector<128x384xbf16>, vector<8x384xf32> -> vector<8x384xf32>
    %c0_19 = arith.constant 0 : index
    %c0_20 = arith.constant 0 : index
    %27 = vector.load %arg10[%c0_19, %c0_20] : memref<1x7808xf32, #tpu.memory_space<vmem>>, vector<1x384xf32>
    %28 = vector.broadcast %27 : vector<1x384xf32> to vector<8x384xf32>
    %29 = arith.addf %26, %28 : vector<8x384xf32>
    %30 = vector.extract_strided_slice %29 {offsets = [0, 0], sizes = [8, 128], strides = [1, 1]} : vector<8x384xf32> to vector<8x128xf32>
    %31 = vector.extract_strided_slice %29 {offsets = [0, 128], sizes = [8, 128], strides = [1, 1]} : vector<8x384xf32> to vector<8x128xf32>
    %32 = vector.extract_strided_slice %29 {offsets = [0, 256], sizes = [8, 128], strides = [1, 1]} : vector<8x384xf32> to vector<8x128xf32>
    %33 = vector.extract_strided_slice %30 {offsets = [0, 0], sizes = [8, 32], strides = [1, 1]} : vector<8x128xf32> to vector<8x32xf32>
    %34 = vector.shape_cast %33 : vector<8x32xf32> to vector<1x8x32xf32>
    %35 = vector.extract_strided_slice %30 {offsets = [0, 32], sizes = [8, 32], strides = [1, 1]} : vector<8x128xf32> to vector<8x32xf32>
    %36 = vector.shape_cast %35 : vector<8x32xf32> to vector<1x8x32xf32>
    %37 = vector.extract_strided_slice %30 {offsets = [0, 64], sizes = [8, 32], strides = [1, 1]} : vector<8x128xf32> to vector<8x32xf32>
    %38 = vector.shape_cast %37 : vector<8x32xf32> to vector<1x8x32xf32>
    %39 = vector.extract_strided_slice %30 {offsets = [0, 96], sizes = [8, 32], strides = [1, 1]} : vector<8x128xf32> to vector<8x32xf32>
    %40 = vector.shape_cast %39 : vector<8x32xf32> to vector<1x8x32xf32>
    %41 = tpu.concatenate %34, %36, %38, %40 in 0 : vector<1x8x32xf32>, vector<1x8x32xf32>, vector<1x8x32xf32>, vector<1x8x32xf32> -> vector<4x8x32xf32>
    %42 = vector.extract_strided_slice %31 {offsets = [0, 0], sizes = [8, 32], strides = [1, 1]} : vector<8x128xf32> to vector<8x32xf32>
    %43 = vector.shape_cast %42 : vector<8x32xf32> to vector<1x8x32xf32>
    %44 = vector.extract_strided_slice %31 {offsets = [0, 32], sizes = [8, 32], strides = [1, 1]} : vector<8x128xf32> to vector<8x32xf32>
    %45 = vector.shape_cast %44 : vector<8x32xf32> to vector<1x8x32xf32>
    %46 = vector.extract_strided_slice %31 {offsets = [0, 64], sizes = [8, 32], strides = [1, 1]} : vector<8x128xf32> to vector<8x32xf32>
    %47 = vector.shape_cast %46 : vector<8x32xf32> to vector<1x8x32xf32>
    %48 = vector.extract_strided_slice %31 {offsets = [0, 96], sizes = [8, 32], strides = [1, 1]} : vector<8x128xf32> to vector<8x32xf32>
    %49 = vector.shape_cast %48 : vector<8x32xf32> to vector<1x8x32xf32>
    %50 = tpu.concatenate %43, %45, %47, %49 in 0 : vector<1x8x32xf32>, vector<1x8x32xf32>, vector<1x8x32xf32>, vector<1x8x32xf32> -> vector<4x8x32xf32>
    %51 = vector.extract_strided_slice %32 {offsets = [0, 0], sizes = [8, 32], strides = [1, 1]} : vector<8x128xf32> to vector<8x32xf32>
    %52 = vector.shape_cast %51 : vector<8x32xf32> to vector<1x8x32xf32>
    %53 = vector.extract_strided_slice %32 {offsets = [0, 32], sizes = [8, 32], strides = [1, 1]} : vector<8x128xf32> to vector<8x32xf32>
    %54 = vector.shape_cast %53 : vector<8x32xf32> to vector<1x8x32xf32>
    %55 = vector.extract_strided_slice %32 {offsets = [0, 64], sizes = [8, 32], strides = [1, 1]} : vector<8x128xf32> to vector<8x32xf32>
    %56 = vector.shape_cast %55 : vector<8x32xf32> to vector<1x8x32xf32>
    %57 = vector.extract_strided_slice %32 {offsets = [0, 96], sizes = [8, 32], strides = [1, 1]} : vector<8x128xf32> to vector<8x32xf32>
    %58 = vector.shape_cast %57 : vector<8x32xf32> to vector<1x8x32xf32>
    %59 = tpu.concatenate %52, %54, %56, %58 in 0 : vector<1x8x32xf32>, vector<1x8x32xf32>, vector<1x8x32xf32>, vector<1x8x32xf32> -> vector<4x8x32xf32>
    %60 = arith.truncf %41 : vector<4x8x32xf32> to vector<4x8x32xbf16>
    %61 = arith.truncf %50 : vector<4x8x32xf32> to vector<4x8x32xbf16>
    "tpu.trace_start"() <{level = 10 : i32, message = "hqd,hkd->hqk"}> : () -> ()
    %cst_21 = arith.constant dense<0.000000e+00> : vector<4x8x8xf32>
    %62 = tpu.matmul %60, %61, %cst_21 {dimension_numbers = #tpu.dot_dimension_numbers<[2], [2], [1], [1], [0, 0, 0, 1, 1, 1], [0], [0]>} : vector<4x8x32xbf16>, vector<4x8x32xbf16>, vector<4x8x8xf32> -> vector<4x8x8xf32>
    "tpu.trace_stop"() : () -> ()
    %63 = vector.broadcast %0 : vector<1x1x8xf32> to vector<4x8x8xf32>
    %64 = arith.addf %62, %63 : vector<4x8x8xf32>
    %cst_22 = arith.constant dense<0xFF800000> : vector<4x8xf32>
    %65 = vector.multi_reduction <maximumf>, %64, %cst_22 [2] : vector<4x8x8xf32> to vector<4x8xf32>
    %66 = vector.shape_cast %65 : vector<4x8xf32> to vector<4x8x1xf32>
    %67 = vector.broadcast %66 : vector<4x8x1xf32> to vector<4x8x8xf32>
    %68 = arith.subf %64, %67 : vector<4x8x8xf32>
    %69 = math.exp %68 : vector<4x8x8xf32>
    %cst_23 = arith.constant dense<0.000000e+00> : vector<4x8xf32>
    %70 = vector.multi_reduction <add>, %69, %cst_23 [2] : vector<4x8x8xf32> to vector<4x8xf32>
    %71 = vector.shape_cast %70 : vector<4x8xf32> to vector<4x8x1xf32>
    %72 = vector.broadcast %71 : vector<4x8x1xf32> to vector<4x8x8xf32>
    %73 = arith.divf %69, %72 : vector<4x8x8xf32>
    %74 = arith.truncf %73 : vector<4x8x8xf32> to vector<4x8x8xbf16>
    %75 = arith.truncf %59 : vector<4x8x32xf32> to vector<4x8x32xbf16>
    "tpu.trace_start"() <{level = 10 : i32, message = "hqk,hkd->hqd"}> : () -> ()
    %cst_24 = arith.constant dense<0.000000e+00> : vector<4x8x32xf32>
    %76 = tpu.matmul %74, %75, %cst_24 {dimension_numbers = #tpu.dot_dimension_numbers<[2], [1], [1], [2], [0, 0, 0, 1, 1, 2], [0], [0]>} : vector<4x8x8xbf16>, vector<4x8x32xbf16>, vector<4x8x32xf32> -> vector<4x8x32xf32>
    "tpu.trace_stop"() : () -> ()
    %77 = vector.extract_strided_slice %76 {offsets = [0, 0, 0], sizes = [1, 8, 32], strides = [1, 1, 1]} : vector<4x8x32xf32> to vector<1x8x32xf32>
    %78 = vector.shape_cast %77 : vector<1x8x32xf32> to vector<8x32xf32>
    %79 = vector.extract_strided_slice %76 {offsets = [1, 0, 0], sizes = [1, 8, 32], strides = [1, 1, 1]} : vector<4x8x32xf32> to vector<1x8x32xf32>
    %80 = vector.shape_cast %79 : vector<1x8x32xf32> to vector<8x32xf32>
    %81 = vector.extract_strided_slice %76 {offsets = [2, 0, 0], sizes = [1, 8, 32], strides = [1, 1, 1]} : vector<4x8x32xf32> to vector<1x8x32xf32>
    %82 = vector.shape_cast %81 : vector<1x8x32xf32> to vector<8x32xf32>
    %83 = vector.extract_strided_slice %76 {offsets = [3, 0, 0], sizes = [1, 8, 32], strides = [1, 1, 1]} : vector<4x8x32xf32> to vector<1x8x32xf32>
    %84 = vector.shape_cast %83 : vector<1x8x32xf32> to vector<8x32xf32>
    %85 = tpu.concatenate %78, %80, %82, %84 in 1 : vector<8x32xf32>, vector<8x32xf32>, vector<8x32xf32>, vector<8x32xf32> -> vector<8x128xf32>
    %c0_25 = arith.constant 0 : index
    %c384 = arith.constant 384 : index
    %86 = vector.load %arg8[%c0_25, %c384] : memref<128x4224xbf16, #tpu.memory_space<vmem>>, vector<128x128xbf16>
    %87 = arith.truncf %85 : vector<8x128xf32> to vector<8x128xbf16>
    %cst_26 = arith.constant dense<0.000000e+00> : vector<8x128xf32>
    %88 = tpu.matmul %87, %86, %cst_26 {dimension_numbers = #tpu.dot_dimension_numbers<[1], [0], [0], [1], [0, 0, 1, 1], [], []>} : vector<8x128xbf16>, vector<128x128xbf16>, vector<8x128xf32> -> vector<8x128xf32>
    %c0_27 = arith.constant 0 : index
    %c384_28 = arith.constant 384 : index
    %89 = vector.load %arg10[%c0_27, %c384_28] : memref<1x7808xf32, #tpu.memory_space<vmem>>, vector<1x128xf32>
    %90 = vector.broadcast %89 : vector<1x128xf32> to vector<8x128xf32>
    %91 = arith.addf %88, %90 : vector<8x128xf32>
    %92 = arith.addf %23, %91 : vector<8x128xf32>
    %c0_29 = arith.constant 0 : index
    %c896 = arith.constant 896 : index
    %93 = vector.load %arg10[%c0_29, %c896] : memref<1x7808xf32, #tpu.memory_space<vmem>>, vector<1x128xf32>
    %c0_30 = arith.constant 0 : index
    %c1024 = arith.constant 1024 : index
    %94 = vector.load %arg10[%c0_30, %c1024] : memref<1x7808xf32, #tpu.memory_space<vmem>>, vector<1x128xf32>
    %cst_31 = arith.constant dense<0.000000e+00> : vector<8xf32>
    %95 = vector.multi_reduction <add>, %92, %cst_31 [1] : vector<8x128xf32> to vector<8xf32>
    %96 = vector.shape_cast %95 : vector<8xf32> to vector<8x1xf32>
    %cst_32 = arith.constant 1.280000e+02 : f32
    %97 = vector.broadcast %cst_32 : f32 to vector<8x1xf32>
    %98 = arith.divf %96, %97 : vector<8x1xf32>
    %99 = vector.broadcast %98 : vector<8x1xf32> to vector<8x128xf32>
    %100 = arith.subf %92, %99 : vector<8x128xf32>
    %101 = arith.mulf %100, %100 : vector<8x128xf32>
    %cst_33 = arith.constant dense<0.000000e+00> : vector<8xf32>
    %102 = vector.multi_reduction <add>, %101, %cst_33 [1] : vector<8x128xf32> to vector<8xf32>
    %103 = vector.shape_cast %102 : vector<8xf32> to vector<8x1xf32>
    %cst_34 = arith.constant 1.280000e+02 : f32
    %104 = vector.broadcast %cst_34 : f32 to vector<8x1xf32>
    %105 = arith.divf %103, %104 : vector<8x1xf32>
    %106 = vector.broadcast %98 : vector<8x1xf32> to vector<8x128xf32>
    %107 = arith.subf %92, %106 : vector<8x128xf32>
    %cst_35 = arith.constant 9.99999974E-6 : f32
    %108 = vector.broadcast %cst_35 : f32 to vector<8x1xf32>
    %109 = arith.addf %105, %108 : vector<8x1xf32>
    %110 = math.rsqrt %109 : vector<8x1xf32>
    %111 = vector.broadcast %110 : vector<8x1xf32> to vector<8x128xf32>
    %112 = arith.mulf %107, %111 : vector<8x128xf32>
    %113 = vector.broadcast %93 : vector<1x128xf32> to vector<8x128xf32>
    %114 = arith.mulf %112, %113 : vector<8x128xf32>
    %115 = vector.broadcast %94 : vector<1x128xf32> to vector<8x128xf32>
    %116 = arith.addf %114, %115 : vector<8x128xf32>
    %c0_36 = arith.constant 0 : index
    %c512 = arith.constant 512 : index
    %117 = vector.load %arg8[%c0_36, %c512] : memref<128x4224xbf16, #tpu.memory_space<vmem>>, vector<128x256xbf16>
    %118 = arith.truncf %116 : vector<8x128xf32> to vector<8x128xbf16>
    %cst_37 = arith.constant dense<0.000000e+00> : vector<8x256xf32>
    %119 = tpu.matmul %118, %117, %cst_37 {dimension_numbers = #tpu.dot_dimension_numbers<[1], [0], [0], [1], [0, 0, 1, 1], [], []>} : vector<8x128xbf16>, vector<128x256xbf16>, vector<8x256xf32> -> vector<8x256xf32>
    %c0_38 = arith.constant 0 : index
    %c512_39 = arith.constant 512 : index
    %120 = vector.load %arg10[%c0_38, %c512_39] : memref<1x7808xf32, #tpu.memory_space<vmem>>, vector<1x256xf32>
    %121 = vector.broadcast %120 : vector<1x256xf32> to vector<8x256xf32>
    %122 = arith.addf %119, %121 : vector<8x256xf32>
    %cst_40 = arith.constant 0.000000e+00 : f32
    %123 = vector.broadcast %cst_40 : f32 to vector<8x256xf32>
    %124 = arith.maximumf %122, %123 : vector<8x256xf32>
    %c0_41 = arith.constant 0 : index
    %c0_42 = arith.constant 0 : index
    %125 = vector.load %arg9[%c0_41, %c0_42] : memref<256x512xbf16, #tpu.memory_space<vmem>>, vector<256x128xbf16>
    %126 = arith.truncf %124 : vector<8x256xf32> to vector<8x256xbf16>
    %cst_43 = arith.constant dense<0.000000e+00> : vector<8x128xf32>
    %127 = tpu.matmul %126, %125, %cst_43 {dimension_numbers = #tpu.dot_dimension_numbers<[1], [0], [0], [1], [0, 0, 1, 1], [], []>} : vector<8x256xbf16>, vector<256x128xbf16>, vector<8x128xf32> -> vector<8x128xf32>
    %c0_44 = arith.constant 0 : index
    %c768 = arith.constant 768 : index
    %128 = vector.load %arg10[%c0_44, %c768] : memref<1x7808xf32, #tpu.memory_space<vmem>>, vector<1x128xf32>
    %129 = vector.broadcast %128 : vector<1x128xf32> to vector<8x128xf32>
    %130 = arith.addf %127, %129 : vector<8x128xf32>
    %131 = arith.addf %116, %130 : vector<8x128xf32>
    %c0_45 = arith.constant 0 : index
    %c1152 = arith.constant 1152 : index
    %132 = vector.load %arg10[%c0_45, %c1152] : memref<1x7808xf32, #tpu.memory_space<vmem>>, vector<1x128xf32>
    %c0_46 = arith.constant 0 : index
    %c1280 = arith.constant 1280 : index
    %133 = vector.load %arg10[%c0_46, %c1280] : memref<1x7808xf32, #tpu.memory_space<vmem>>, vector<1x128xf32>
    %cst_47 = arith.constant dense<0.000000e+00> : vector<8xf32>
    %134 = vector.multi_reduction <add>, %131, %cst_47 [1] : vector<8x128xf32> to vector<8xf32>
    %135 = vector.shape_cast %134 : vector<8xf32> to vector<8x1xf32>
    %cst_48 = arith.constant 1.280000e+02 : f32
    %136 = vector.broadcast %cst_48 : f32 to vector<8x1xf32>
    %137 = arith.divf %135, %136 : vector<8x1xf32>
    %138 = vector.broadcast %137 : vector<8x1xf32> to vector<8x128xf32>
    %139 = arith.subf %131, %138 : vector<8x128xf32>
    %140 = arith.mulf %139, %139 : vector<8x128xf32>
    %cst_49 = arith.constant dense<0.000000e+00> : vector<8xf32>
    %141 = vector.multi_reduction <add>, %140, %cst_49 [1] : vector<8x128xf32> to vector<8xf32>
    %142 = vector.shape_cast %141 : vector<8xf32> to vector<8x1xf32>
    %cst_50 = arith.constant 1.280000e+02 : f32
    %143 = vector.broadcast %cst_50 : f32 to vector<8x1xf32>
    %144 = arith.divf %142, %143 : vector<8x1xf32>
    %145 = vector.broadcast %137 : vector<8x1xf32> to vector<8x128xf32>
    %146 = arith.subf %131, %145 : vector<8x128xf32>
    %cst_51 = arith.constant 9.99999974E-6 : f32
    %147 = vector.broadcast %cst_51 : f32 to vector<8x1xf32>
    %148 = arith.addf %144, %147 : vector<8x1xf32>
    %149 = math.rsqrt %148 : vector<8x1xf32>
    %150 = vector.broadcast %149 : vector<8x1xf32> to vector<8x128xf32>
    %151 = arith.mulf %146, %150 : vector<8x128xf32>
    %152 = vector.broadcast %132 : vector<1x128xf32> to vector<8x128xf32>
    %153 = arith.mulf %151, %152 : vector<8x128xf32>
    %154 = vector.broadcast %133 : vector<1x128xf32> to vector<8x128xf32>
    %155 = arith.addf %153, %154 : vector<8x128xf32>
    %c0_52 = arith.constant 0 : index
    %c768_53 = arith.constant 768 : index
    %156 = vector.load %arg8[%c0_52, %c768_53] : memref<128x4224xbf16, #tpu.memory_space<vmem>>, vector<128x384xbf16>
    %157 = arith.truncf %155 : vector<8x128xf32> to vector<8x128xbf16>
    %cst_54 = arith.constant dense<0.000000e+00> : vector<8x384xf32>
    %158 = tpu.matmul %157, %156, %cst_54 {dimension_numbers = #tpu.dot_dimension_numbers<[1], [0], [0], [1], [0, 0, 1, 1], [], []>} : vector<8x128xbf16>, vector<128x384xbf16>, vector<8x384xf32> -> vector<8x384xf32>
    %c0_55 = arith.constant 0 : index
    %c1408 = arith.constant 1408 : index
    %159 = vector.load %arg10[%c0_55, %c1408] : memref<1x7808xf32, #tpu.memory_space<vmem>>, vector<1x384xf32>
    %160 = vector.broadcast %159 : vector<1x384xf32> to vector<8x384xf32>
    %161 = arith.addf %158, %160 : vector<8x384xf32>
    %162 = vector.extract_strided_slice %161 {offsets = [0, 0], sizes = [8, 128], strides = [1, 1]} : vector<8x384xf32> to vector<8x128xf32>
    %163 = vector.extract_strided_slice %161 {offsets = [0, 128], sizes = [8, 128], strides = [1, 1]} : vector<8x384xf32> to vector<8x128xf32>
    %164 = vector.extract_strided_slice %161 {offsets = [0, 256], sizes = [8, 128], strides = [1, 1]} : vector<8x384xf32> to vector<8x128xf32>
    %165 = vector.extract_strided_slice %162 {offsets = [0, 0], sizes = [8, 32], strides = [1, 1]} : vector<8x128xf32> to vector<8x32xf32>
    %166 = vector.shape_cast %165 : vector<8x32xf32> to vector<1x8x32xf32>
    %167 = vector.extract_strided_slice %162 {offsets = [0, 32], sizes = [8, 32], strides = [1, 1]} : vector<8x128xf32> to vector<8x32xf32>
    %168 = vector.shape_cast %167 : vector<8x32xf32> to vector<1x8x32xf32>
    %169 = vector.extract_strided_slice %162 {offsets = [0, 64], sizes = [8, 32], strides = [1, 1]} : vector<8x128xf32> to vector<8x32xf32>
    %170 = vector.shape_cast %169 : vector<8x32xf32> to vector<1x8x32xf32>
    %171 = vector.extract_strided_slice %162 {offsets = [0, 96], sizes = [8, 32], strides = [1, 1]} : vector<8x128xf32> to vector<8x32xf32>
    %172 = vector.shape_cast %171 : vector<8x32xf32> to vector<1x8x32xf32>
    %173 = tpu.concatenate %166, %168, %170, %172 in 0 : vector<1x8x32xf32>, vector<1x8x32xf32>, vector<1x8x32xf32>, vector<1x8x32xf32> -> vector<4x8x32xf32>
    %174 = vector.extract_strided_slice %163 {offsets = [0, 0], sizes = [8, 32], strides = [1, 1]} : vector<8x128xf32> to vector<8x32xf32>
    %175 = vector.shape_cast %174 : vector<8x32xf32> to vector<1x8x32xf32>
    %176 = vector.extract_strided_slice %163 {offsets = [0, 32], sizes = [8, 32], strides = [1, 1]} : vector<8x128xf32> to vector<8x32xf32>
    %177 = vector.shape_cast %176 : vector<8x32xf32> to vector<1x8x32xf32>
    %178 = vector.extract_strided_slice %163 {offsets = [0, 64], sizes = [8, 32], strides = [1, 1]} : vector<8x128xf32> to vector<8x32xf32>
    %179 = vector.shape_cast %178 : vector<8x32xf32> to vector<1x8x32xf32>
    %180 = vector.extract_strided_slice %163 {offsets = [0, 96], sizes = [8, 32], strides = [1, 1]} : vector<8x128xf32> to vector<8x32xf32>
    %181 = vector.shape_cast %180 : vector<8x32xf32> to vector<1x8x32xf32>
    %182 = tpu.concatenate %175, %177, %179, %181 in 0 : vector<1x8x32xf32>, vector<1x8x32xf32>, vector<1x8x32xf32>, vector<1x8x32xf32> -> vector<4x8x32xf32>
    %183 = vector.extract_strided_slice %164 {offsets = [0, 0], sizes = [8, 32], strides = [1, 1]} : vector<8x128xf32> to vector<8x32xf32>
    %184 = vector.shape_cast %183 : vector<8x32xf32> to vector<1x8x32xf32>
    %185 = vector.extract_strided_slice %164 {offsets = [0, 32], sizes = [8, 32], strides = [1, 1]} : vector<8x128xf32> to vector<8x32xf32>
    %186 = vector.shape_cast %185 : vector<8x32xf32> to vector<1x8x32xf32>
    %187 = vector.extract_strided_slice %164 {offsets = [0, 64], sizes = [8, 32], strides = [1, 1]} : vector<8x128xf32> to vector<8x32xf32>
    %188 = vector.shape_cast %187 : vector<8x32xf32> to vector<1x8x32xf32>
    %189 = vector.extract_strided_slice %164 {offsets = [0, 96], sizes = [8, 32], strides = [1, 1]} : vector<8x128xf32> to vector<8x32xf32>
    %190 = vector.shape_cast %189 : vector<8x32xf32> to vector<1x8x32xf32>
    %191 = tpu.concatenate %184, %186, %188, %190 in 0 : vector<1x8x32xf32>, vector<1x8x32xf32>, vector<1x8x32xf32>, vector<1x8x32xf32> -> vector<4x8x32xf32>
    %192 = arith.truncf %173 : vector<4x8x32xf32> to vector<4x8x32xbf16>
    %193 = arith.truncf %182 : vector<4x8x32xf32> to vector<4x8x32xbf16>
    "tpu.trace_start"() <{level = 10 : i32, message = "hqd,hkd->hqk"}> : () -> ()
    %cst_56 = arith.constant dense<0.000000e+00> : vector<4x8x8xf32>
    %194 = tpu.matmul %192, %193, %cst_56 {dimension_numbers = #tpu.dot_dimension_numbers<[2], [2], [1], [1], [0, 0, 0, 1, 1, 1], [0], [0]>} : vector<4x8x32xbf16>, vector<4x8x32xbf16>, vector<4x8x8xf32> -> vector<4x8x8xf32>
    "tpu.trace_stop"() : () -> ()
    %195 = vector.broadcast %0 : vector<1x1x8xf32> to vector<4x8x8xf32>
    %196 = arith.addf %194, %195 : vector<4x8x8xf32>
    %cst_57 = arith.constant dense<0xFF800000> : vector<4x8xf32>
    %197 = vector.multi_reduction <maximumf>, %196, %cst_57 [2] : vector<4x8x8xf32> to vector<4x8xf32>
    %198 = vector.shape_cast %197 : vector<4x8xf32> to vector<4x8x1xf32>
    %199 = vector.broadcast %198 : vector<4x8x1xf32> to vector<4x8x8xf32>
    %200 = arith.subf %196, %199 : vector<4x8x8xf32>
    %201 = math.exp %200 : vector<4x8x8xf32>
    %cst_58 = arith.constant dense<0.000000e+00> : vector<4x8xf32>
    %202 = vector.multi_reduction <add>, %201, %cst_58 [2] : vector<4x8x8xf32> to vector<4x8xf32>
    %203 = vector.shape_cast %202 : vector<4x8xf32> to vector<4x8x1xf32>
    %204 = vector.broadcast %203 : vector<4x8x1xf32> to vector<4x8x8xf32>
    %205 = arith.divf %201, %204 : vector<4x8x8xf32>
    %206 = arith.truncf %205 : vector<4x8x8xf32> to vector<4x8x8xbf16>
    %207 = arith.truncf %191 : vector<4x8x32xf32> to vector<4x8x32xbf16>
    "tpu.trace_start"() <{level = 10 : i32, message = "hqk,hkd->hqd"}> : () -> ()
    %cst_59 = arith.constant dense<0.000000e+00> : vector<4x8x32xf32>
    %208 = tpu.matmul %206, %207, %cst_59 {dimension_numbers = #tpu.dot_dimension_numbers<[2], [1], [1], [2], [0, 0, 0, 1, 1, 2], [0], [0]>} : vector<4x8x8xbf16>, vector<4x8x32xbf16>, vector<4x8x32xf32> -> vector<4x8x32xf32>
    "tpu.trace_stop"() : () -> ()
    %209 = vector.extract_strided_slice %208 {offsets = [0, 0, 0], sizes = [1, 8, 32], strides = [1, 1, 1]} : vector<4x8x32xf32> to vector<1x8x32xf32>
    %210 = vector.shape_cast %209 : vector<1x8x32xf32> to vector<8x32xf32>
    %211 = vector.extract_strided_slice %208 {offsets = [1, 0, 0], sizes = [1, 8, 32], strides = [1, 1, 1]} : vector<4x8x32xf32> to vector<1x8x32xf32>
    %212 = vector.shape_cast %211 : vector<1x8x32xf32> to vector<8x32xf32>
    %213 = vector.extract_strided_slice %208 {offsets = [2, 0, 0], sizes = [1, 8, 32], strides = [1, 1, 1]} : vector<4x8x32xf32> to vector<1x8x32xf32>
    %214 = vector.shape_cast %213 : vector<1x8x32xf32> to vector<8x32xf32>
    %215 = vector.extract_strided_slice %208 {offsets = [3, 0, 0], sizes = [1, 8, 32], strides = [1, 1, 1]} : vector<4x8x32xf32> to vector<1x8x32xf32>
    %216 = vector.shape_cast %215 : vector<1x8x32xf32> to vector<8x32xf32>
    %217 = tpu.concatenate %210, %212, %214, %216 in 1 : vector<8x32xf32>, vector<8x32xf32>, vector<8x32xf32>, vector<8x32xf32> -> vector<8x128xf32>
    %c0_60 = arith.constant 0 : index
    %c1152_61 = arith.constant 1152 : index
    %218 = vector.load %arg8[%c0_60, %c1152_61] : memref<128x4224xbf16, #tpu.memory_space<vmem>>, vector<128x128xbf16>
    %219 = arith.truncf %217 : vector<8x128xf32> to vector<8x128xbf16>
    %cst_62 = arith.constant dense<0.000000e+00> : vector<8x128xf32>
    %220 = tpu.matmul %219, %218, %cst_62 {dimension_numbers = #tpu.dot_dimension_numbers<[1], [0], [0], [1], [0, 0, 1, 1], [], []>} : vector<8x128xbf16>, vector<128x128xbf16>, vector<8x128xf32> -> vector<8x128xf32>
    %c0_63 = arith.constant 0 : index
    %c1792 = arith.constant 1792 : index
    %221 = vector.load %arg10[%c0_63, %c1792] : memref<1x7808xf32, #tpu.memory_space<vmem>>, vector<1x128xf32>
    %222 = vector.broadcast %221 : vector<1x128xf32> to vector<8x128xf32>
    %223 = arith.addf %220, %222 : vector<8x128xf32>
    %224 = arith.addf %155, %223 : vector<8x128xf32>
    %c0_64 = arith.constant 0 : index
    %c2304 = arith.constant 2304 : index
    %225 = vector.load %arg10[%c0_64, %c2304] : memref<1x7808xf32, #tpu.memory_space<vmem>>, vector<1x128xf32>
    %c0_65 = arith.constant 0 : index
    %c2432 = arith.constant 2432 : index
    %226 = vector.load %arg10[%c0_65, %c2432] : memref<1x7808xf32, #tpu.memory_space<vmem>>, vector<1x128xf32>
    %cst_66 = arith.constant dense<0.000000e+00> : vector<8xf32>
    %227 = vector.multi_reduction <add>, %224, %cst_66 [1] : vector<8x128xf32> to vector<8xf32>
    %228 = vector.shape_cast %227 : vector<8xf32> to vector<8x1xf32>
    %cst_67 = arith.constant 1.280000e+02 : f32
    %229 = vector.broadcast %cst_67 : f32 to vector<8x1xf32>
    %230 = arith.divf %228, %229 : vector<8x1xf32>
    %231 = vector.broadcast %230 : vector<8x1xf32> to vector<8x128xf32>
    %232 = arith.subf %224, %231 : vector<8x128xf32>
    %233 = arith.mulf %232, %232 : vector<8x128xf32>
    %cst_68 = arith.constant dense<0.000000e+00> : vector<8xf32>
    %234 = vector.multi_reduction <add>, %233, %cst_68 [1] : vector<8x128xf32> to vector<8xf32>
    %235 = vector.shape_cast %234 : vector<8xf32> to vector<8x1xf32>
    %cst_69 = arith.constant 1.280000e+02 : f32
    %236 = vector.broadcast %cst_69 : f32 to vector<8x1xf32>
    %237 = arith.divf %235, %236 : vector<8x1xf32>
    %238 = vector.broadcast %230 : vector<8x1xf32> to vector<8x128xf32>
    %239 = arith.subf %224, %238 : vector<8x128xf32>
    %cst_70 = arith.constant 9.99999974E-6 : f32
    %240 = vector.broadcast %cst_70 : f32 to vector<8x1xf32>
    %241 = arith.addf %237, %240 : vector<8x1xf32>
    %242 = math.rsqrt %241 : vector<8x1xf32>
    %243 = vector.broadcast %242 : vector<8x1xf32> to vector<8x128xf32>
    %244 = arith.mulf %239, %243 : vector<8x128xf32>
    %245 = vector.broadcast %225 : vector<1x128xf32> to vector<8x128xf32>
    %246 = arith.mulf %244, %245 : vector<8x128xf32>
    %247 = vector.broadcast %226 : vector<1x128xf32> to vector<8x128xf32>
    %248 = arith.addf %246, %247 : vector<8x128xf32>
    %c0_71 = arith.constant 0 : index
    %c1280_72 = arith.constant 1280 : index
    %249 = vector.load %arg8[%c0_71, %c1280_72] : memref<128x4224xbf16, #tpu.memory_space<vmem>>, vector<128x256xbf16>
    %250 = arith.truncf %248 : vector<8x128xf32> to vector<8x128xbf16>
    %cst_73 = arith.constant dense<0.000000e+00> : vector<8x256xf32>
    %251 = tpu.matmul %250, %249, %cst_73 {dimension_numbers = #tpu.dot_dimension_numbers<[1], [0], [0], [1], [0, 0, 1, 1], [], []>} : vector<8x128xbf16>, vector<128x256xbf16>, vector<8x256xf32> -> vector<8x256xf32>
    %c0_74 = arith.constant 0 : index
    %c1920 = arith.constant 1920 : index
    %252 = vector.load %arg10[%c0_74, %c1920] : memref<1x7808xf32, #tpu.memory_space<vmem>>, vector<1x256xf32>
    %253 = vector.broadcast %252 : vector<1x256xf32> to vector<8x256xf32>
    %254 = arith.addf %251, %253 : vector<8x256xf32>
    %cst_75 = arith.constant 0.000000e+00 : f32
    %255 = vector.broadcast %cst_75 : f32 to vector<8x256xf32>
    %256 = arith.maximumf %254, %255 : vector<8x256xf32>
    %c0_76 = arith.constant 0 : index
    %c128 = arith.constant 128 : index
    %257 = vector.load %arg9[%c0_76, %c128] : memref<256x512xbf16, #tpu.memory_space<vmem>>, vector<256x128xbf16>
    %258 = arith.truncf %256 : vector<8x256xf32> to vector<8x256xbf16>
    %cst_77 = arith.constant dense<0.000000e+00> : vector<8x128xf32>
    %259 = tpu.matmul %258, %257, %cst_77 {dimension_numbers = #tpu.dot_dimension_numbers<[1], [0], [0], [1], [0, 0, 1, 1], [], []>} : vector<8x256xbf16>, vector<256x128xbf16>, vector<8x128xf32> -> vector<8x128xf32>
    %c0_78 = arith.constant 0 : index
    %c2176 = arith.constant 2176 : index
    %260 = vector.load %arg10[%c0_78, %c2176] : memref<1x7808xf32, #tpu.memory_space<vmem>>, vector<1x128xf32>
    %261 = vector.broadcast %260 : vector<1x128xf32> to vector<8x128xf32>
    %262 = arith.addf %259, %261 : vector<8x128xf32>
    %263 = arith.addf %248, %262 : vector<8x128xf32>
    %c0_79 = arith.constant 0 : index
    %c2560 = arith.constant 2560 : index
    %264 = vector.load %arg10[%c0_79, %c2560] : memref<1x7808xf32, #tpu.memory_space<vmem>>, vector<1x128xf32>
    %c0_80 = arith.constant 0 : index
    %c2688 = arith.constant 2688 : index
    %265 = vector.load %arg10[%c0_80, %c2688] : memref<1x7808xf32, #tpu.memory_space<vmem>>, vector<1x128xf32>
    %cst_81 = arith.constant dense<0.000000e+00> : vector<8xf32>
    %266 = vector.multi_reduction <add>, %263, %cst_81 [1] : vector<8x128xf32> to vector<8xf32>
    %267 = vector.shape_cast %266 : vector<8xf32> to vector<8x1xf32>
    %cst_82 = arith.constant 1.280000e+02 : f32
    %268 = vector.broadcast %cst_82 : f32 to vector<8x1xf32>
    %269 = arith.divf %267, %268 : vector<8x1xf32>
    %270 = vector.broadcast %269 : vector<8x1xf32> to vector<8x128xf32>
    %271 = arith.subf %263, %270 : vector<8x128xf32>
    %272 = arith.mulf %271, %271 : vector<8x128xf32>
    %cst_83 = arith.constant dense<0.000000e+00> : vector<8xf32>
    %273 = vector.multi_reduction <add>, %272, %cst_83 [1] : vector<8x128xf32> to vector<8xf32>
    %274 = vector.shape_cast %273 : vector<8xf32> to vector<8x1xf32>
    %cst_84 = arith.constant 1.280000e+02 : f32
    %275 = vector.broadcast %cst_84 : f32 to vector<8x1xf32>
    %276 = arith.divf %274, %275 : vector<8x1xf32>
    %277 = vector.broadcast %269 : vector<8x1xf32> to vector<8x128xf32>
    %278 = arith.subf %263, %277 : vector<8x128xf32>
    %cst_85 = arith.constant 9.99999974E-6 : f32
    %279 = vector.broadcast %cst_85 : f32 to vector<8x1xf32>
    %280 = arith.addf %276, %279 : vector<8x1xf32>
    %281 = math.rsqrt %280 : vector<8x1xf32>
    %282 = vector.broadcast %281 : vector<8x1xf32> to vector<8x128xf32>
    %283 = arith.mulf %278, %282 : vector<8x128xf32>
    %284 = vector.broadcast %264 : vector<1x128xf32> to vector<8x128xf32>
    %285 = arith.mulf %283, %284 : vector<8x128xf32>
    %286 = vector.broadcast %265 : vector<1x128xf32> to vector<8x128xf32>
    %287 = arith.addf %285, %286 : vector<8x128xf32>
    %c0_86 = arith.constant 0 : index
    %c7168 = arith.constant 7168 : index
    %288 = vector.load %arg10[%c0_86, %c7168] : memref<1x7808xf32, #tpu.memory_space<vmem>>, vector<1x128xf32>
    %c0_87 = arith.constant 0 : index
    %c7296 = arith.constant 7296 : index
    %289 = vector.load %arg10[%c0_87, %c7296] : memref<1x7808xf32, #tpu.memory_space<vmem>>, vector<1x128xf32>
    %cst_88 = arith.constant dense<0.000000e+00> : vector<8xf32>
    %290 = vector.multi_reduction <add>, %287, %cst_88 [1] : vector<8x128xf32> to vector<8xf32>
    %291 = vector.shape_cast %290 : vector<8xf32> to vector<8x1xf32>
    %cst_89 = arith.constant 1.280000e+02 : f32
    %292 = vector.broadcast %cst_89 : f32 to vector<8x1xf32>
    %293 = arith.divf %291, %292 : vector<8x1xf32>
    %294 = vector.broadcast %293 : vector<8x1xf32> to vector<8x128xf32>
    %295 = arith.subf %287, %294 : vector<8x128xf32>
    %296 = arith.mulf %295, %295 : vector<8x128xf32>
    %cst_90 = arith.constant dense<0.000000e+00> : vector<8xf32>
    %297 = vector.multi_reduction <add>, %296, %cst_90 [1] : vector<8x128xf32> to vector<8xf32>
    %298 = vector.shape_cast %297 : vector<8xf32> to vector<8x1xf32>
    %cst_91 = arith.constant 1.280000e+02 : f32
    %299 = vector.broadcast %cst_91 : f32 to vector<8x1xf32>
    %300 = arith.divf %298, %299 : vector<8x1xf32>
    %301 = vector.broadcast %293 : vector<8x1xf32> to vector<8x128xf32>
    %302 = arith.subf %287, %301 : vector<8x128xf32>
    %cst_92 = arith.constant 9.99999974E-6 : f32
    %303 = vector.broadcast %cst_92 : f32 to vector<8x1xf32>
    %304 = arith.addf %300, %303 : vector<8x1xf32>
    %305 = math.rsqrt %304 : vector<8x1xf32>
    %306 = vector.broadcast %305 : vector<8x1xf32> to vector<8x128xf32>
    %307 = arith.mulf %302, %306 : vector<8x128xf32>
    %308 = vector.broadcast %288 : vector<1x128xf32> to vector<8x128xf32>
    %309 = arith.mulf %307, %308 : vector<8x128xf32>
    %310 = vector.broadcast %289 : vector<1x128xf32> to vector<8x128xf32>
    %311 = arith.addf %309, %310 : vector<8x128xf32>
    %c0_93 = arith.constant 0 : index
    %c0_94 = arith.constant 0 : index
    %c0_95 = arith.constant 0 : index
    %312 = vector.load %arg2[%c0_93, %c0_94, %c0_95] : memref<1x8x1xi32, #tpu.memory_space<vmem>>, vector<1x8x1xi32>
    %313 = vector.shape_cast %312 : vector<1x8x1xi32> to vector<8x1xi32>
    %314 = tpu.iota {dimensions = array<i32: 1>} : vector<8x80xi32>
    %315 = vector.broadcast %313 : vector<8x1xi32> to vector<8x80xi32>
    %316 = arith.cmpi eq, %314, %315 : vector<8x80xi32>
    %cst_96 = arith.constant 1.000000e+00 : f32
    %cst_97 = arith.constant 0.000000e+00 : f32
    %317 = vector.broadcast %cst_96 : f32 to vector<8x80xf32>
    %318 = vector.broadcast %cst_97 : f32 to vector<8x80xf32>
    %319 = arith.select %316, %317, %318 : vector<8x80xi1>, vector<8x80xf32>
    %320 = arith.truncf %319 : vector<8x80xf32> to vector<8x80xbf16>
    %c0_98 = arith.constant 0 : index
    %c0_99 = arith.constant 0 : index
    %321 = vector.load %arg6[%c0_98, %c0_99] : memref<80x128xbf16, #tpu.memory_space<vmem>>, vector<80x128xbf16>
    %cst_100 = arith.constant dense<0.000000e+00> : vector<8x128xf32>
    %322 = tpu.matmul %320, %321, %cst_100 {dimension_numbers = #tpu.dot_dimension_numbers<[1], [0], [0], [1], [0, 0, 1, 1], [], []>} : vector<8x80xbf16>, vector<80x128xbf16>, vector<8x128xf32> -> vector<8x128xf32>
    %c0_101 = arith.constant 0 : index
    %c0_102 = arith.constant 0 : index
    %323 = vector.load %arg7[%c0_101, %c0_102] : memref<64x128xf32, #tpu.memory_space<vmem>>, vector<8x128xf32>
    %324 = arith.addf %322, %323 : vector<8x128xf32>
    %c0_103 = arith.constant 0 : index
    %c1536 = arith.constant 1536 : index
    %325 = vector.load %arg8[%c0_103, %c1536] : memref<128x4224xbf16, #tpu.memory_space<vmem>>, vector<128x384xbf16>
    %326 = arith.truncf %324 : vector<8x128xf32> to vector<8x128xbf16>
    %cst_104 = arith.constant dense<0.000000e+00> : vector<8x384xf32>
    %327 = tpu.matmul %326, %325, %cst_104 {dimension_numbers = #tpu.dot_dimension_numbers<[1], [0], [0], [1], [0, 0, 1, 1], [], []>} : vector<8x128xbf16>, vector<128x384xbf16>, vector<8x384xf32> -> vector<8x384xf32>
    %c0_105 = arith.constant 0 : index
    %c2816 = arith.constant 2816 : index
    %328 = vector.load %arg10[%c0_105, %c2816] : memref<1x7808xf32, #tpu.memory_space<vmem>>, vector<1x384xf32>
    %329 = vector.broadcast %328 : vector<1x384xf32> to vector<8x384xf32>
    %330 = arith.addf %327, %329 : vector<8x384xf32>
    %331 = vector.extract_strided_slice %330 {offsets = [0, 0], sizes = [8, 128], strides = [1, 1]} : vector<8x384xf32> to vector<8x128xf32>
    %332 = vector.extract_strided_slice %330 {offsets = [0, 128], sizes = [8, 128], strides = [1, 1]} : vector<8x384xf32> to vector<8x128xf32>
    %333 = vector.extract_strided_slice %330 {offsets = [0, 256], sizes = [8, 128], strides = [1, 1]} : vector<8x384xf32> to vector<8x128xf32>
    %334 = vector.extract_strided_slice %331 {offsets = [0, 0], sizes = [8, 32], strides = [1, 1]} : vector<8x128xf32> to vector<8x32xf32>
    %335 = vector.shape_cast %334 : vector<8x32xf32> to vector<1x8x32xf32>
    %336 = vector.extract_strided_slice %331 {offsets = [0, 32], sizes = [8, 32], strides = [1, 1]} : vector<8x128xf32> to vector<8x32xf32>
    %337 = vector.shape_cast %336 : vector<8x32xf32> to vector<1x8x32xf32>
    %338 = vector.extract_strided_slice %331 {offsets = [0, 64], sizes = [8, 32], strides = [1, 1]} : vector<8x128xf32> to vector<8x32xf32>
    %339 = vector.shape_cast %338 : vector<8x32xf32> to vector<1x8x32xf32>
    %340 = vector.extract_strided_slice %331 {offsets = [0, 96], sizes = [8, 32], strides = [1, 1]} : vector<8x128xf32> to vector<8x32xf32>
    %341 = vector.shape_cast %340 : vector<8x32xf32> to vector<1x8x32xf32>
    %342 = tpu.concatenate %335, %337, %339, %341 in 0 : vector<1x8x32xf32>, vector<1x8x32xf32>, vector<1x8x32xf32>, vector<1x8x32xf32> -> vector<4x8x32xf32>
    %343 = vector.extract_strided_slice %332 {offsets = [0, 0], sizes = [8, 32], strides = [1, 1]} : vector<8x128xf32> to vector<8x32xf32>
    %344 = vector.shape_cast %343 : vector<8x32xf32> to vector<1x8x32xf32>
    %345 = vector.extract_strided_slice %332 {offsets = [0, 32], sizes = [8, 32], strides = [1, 1]} : vector<8x128xf32> to vector<8x32xf32>
    %346 = vector.shape_cast %345 : vector<8x32xf32> to vector<1x8x32xf32>
    %347 = vector.extract_strided_slice %332 {offsets = [0, 64], sizes = [8, 32], strides = [1, 1]} : vector<8x128xf32> to vector<8x32xf32>
    %348 = vector.shape_cast %347 : vector<8x32xf32> to vector<1x8x32xf32>
    %349 = vector.extract_strided_slice %332 {offsets = [0, 96], sizes = [8, 32], strides = [1, 1]} : vector<8x128xf32> to vector<8x32xf32>
    %350 = vector.shape_cast %349 : vector<8x32xf32> to vector<1x8x32xf32>
    %351 = tpu.concatenate %344, %346, %348, %350 in 0 : vector<1x8x32xf32>, vector<1x8x32xf32>, vector<1x8x32xf32>, vector<1x8x32xf32> -> vector<4x8x32xf32>
    %352 = vector.extract_strided_slice %333 {offsets = [0, 0], sizes = [8, 32], strides = [1, 1]} : vector<8x128xf32> to vector<8x32xf32>
    %353 = vector.shape_cast %352 : vector<8x32xf32> to vector<1x8x32xf32>
    %354 = vector.extract_strided_slice %333 {offsets = [0, 32], sizes = [8, 32], strides = [1, 1]} : vector<8x128xf32> to vector<8x32xf32>
    %355 = vector.shape_cast %354 : vector<8x32xf32> to vector<1x8x32xf32>
    %356 = vector.extract_strided_slice %333 {offsets = [0, 64], sizes = [8, 32], strides = [1, 1]} : vector<8x128xf32> to vector<8x32xf32>
    %357 = vector.shape_cast %356 : vector<8x32xf32> to vector<1x8x32xf32>
    %358 = vector.extract_strided_slice %333 {offsets = [0, 96], sizes = [8, 32], strides = [1, 1]} : vector<8x128xf32> to vector<8x32xf32>
    %359 = vector.shape_cast %358 : vector<8x32xf32> to vector<1x8x32xf32>
    %360 = tpu.concatenate %353, %355, %357, %359 in 0 : vector<1x8x32xf32>, vector<1x8x32xf32>, vector<1x8x32xf32>, vector<1x8x32xf32> -> vector<4x8x32xf32>
    %361 = arith.truncf %342 : vector<4x8x32xf32> to vector<4x8x32xbf16>
    %362 = arith.truncf %351 : vector<4x8x32xf32> to vector<4x8x32xbf16>
    "tpu.trace_start"() <{level = 10 : i32, message = "hqd,hkd->hqk"}> : () -> ()
    %cst_106 = arith.constant dense<0.000000e+00> : vector<4x8x8xf32>
    %363 = tpu.matmul %361, %362, %cst_106 {dimension_numbers = #tpu.dot_dimension_numbers<[2], [2], [1], [1], [0, 0, 0, 1, 1, 1], [0], [0]>} : vector<4x8x32xbf16>, vector<4x8x32xbf16>, vector<4x8x8xf32> -> vector<4x8x8xf32>
    "tpu.trace_stop"() : () -> ()
    %364 = vector.broadcast %10 : vector<1x8x8xf32> to vector<4x8x8xf32>
    %365 = arith.addf %363, %364 : vector<4x8x8xf32>
    %cst_107 = arith.constant dense<0xFF800000> : vector<4x8xf32>
    %366 = vector.multi_reduction <maximumf>, %365, %cst_107 [2] : vector<4x8x8xf32> to vector<4x8xf32>
    %367 = vector.shape_cast %366 : vector<4x8xf32> to vector<4x8x1xf32>
    %368 = vector.broadcast %367 : vector<4x8x1xf32> to vector<4x8x8xf32>
    %369 = arith.subf %365, %368 : vector<4x8x8xf32>
    %370 = math.exp %369 : vector<4x8x8xf32>
    %cst_108 = arith.constant dense<0.000000e+00> : vector<4x8xf32>
    %371 = vector.multi_reduction <add>, %370, %cst_108 [2] : vector<4x8x8xf32> to vector<4x8xf32>
    %372 = vector.shape_cast %371 : vector<4x8xf32> to vector<4x8x1xf32>
    %373 = vector.broadcast %372 : vector<4x8x1xf32> to vector<4x8x8xf32>
    %374 = arith.divf %370, %373 : vector<4x8x8xf32>
    %375 = arith.truncf %374 : vector<4x8x8xf32> to vector<4x8x8xbf16>
    %376 = arith.truncf %360 : vector<4x8x32xf32> to vector<4x8x32xbf16>
    "tpu.trace_start"() <{level = 10 : i32, message = "hqk,hkd->hqd"}> : () -> ()
    %cst_109 = arith.constant dense<0.000000e+00> : vector<4x8x32xf32>
    %377 = tpu.matmul %375, %376, %cst_109 {dimension_numbers = #tpu.dot_dimension_numbers<[2], [1], [1], [2], [0, 0, 0, 1, 1, 2], [0], [0]>} : vector<4x8x8xbf16>, vector<4x8x32xbf16>, vector<4x8x32xf32> -> vector<4x8x32xf32>
    "tpu.trace_stop"() : () -> ()
    %378 = vector.extract_strided_slice %377 {offsets = [0, 0, 0], sizes = [1, 8, 32], strides = [1, 1, 1]} : vector<4x8x32xf32> to vector<1x8x32xf32>
    %379 = vector.shape_cast %378 : vector<1x8x32xf32> to vector<8x32xf32>
    %380 = vector.extract_strided_slice %377 {offsets = [1, 0, 0], sizes = [1, 8, 32], strides = [1, 1, 1]} : vector<4x8x32xf32> to vector<1x8x32xf32>
    %381 = vector.shape_cast %380 : vector<1x8x32xf32> to vector<8x32xf32>
    %382 = vector.extract_strided_slice %377 {offsets = [2, 0, 0], sizes = [1, 8, 32], strides = [1, 1, 1]} : vector<4x8x32xf32> to vector<1x8x32xf32>
    %383 = vector.shape_cast %382 : vector<1x8x32xf32> to vector<8x32xf32>
    %384 = vector.extract_strided_slice %377 {offsets = [3, 0, 0], sizes = [1, 8, 32], strides = [1, 1, 1]} : vector<4x8x32xf32> to vector<1x8x32xf32>
    %385 = vector.shape_cast %384 : vector<1x8x32xf32> to vector<8x32xf32>
    %386 = tpu.concatenate %379, %381, %383, %385 in 1 : vector<8x32xf32>, vector<8x32xf32>, vector<8x32xf32>, vector<8x32xf32> -> vector<8x128xf32>
    %c0_110 = arith.constant 0 : index
    %c1920_111 = arith.constant 1920 : index
    %387 = vector.load %arg8[%c0_110, %c1920_111] : memref<128x4224xbf16, #tpu.memory_space<vmem>>, vector<128x128xbf16>
    %388 = arith.truncf %386 : vector<8x128xf32> to vector<8x128xbf16>
    %cst_112 = arith.constant dense<0.000000e+00> : vector<8x128xf32>
    %389 = tpu.matmul %388, %387, %cst_112 {dimension_numbers = #tpu.dot_dimension_numbers<[1], [0], [0], [1], [0, 0, 1, 1], [], []>} : vector<8x128xbf16>, vector<128x128xbf16>, vector<8x128xf32> -> vector<8x128xf32>
    %c0_113 = arith.constant 0 : index
    %c3200 = arith.constant 3200 : index
    %390 = vector.load %arg10[%c0_113, %c3200] : memref<1x7808xf32, #tpu.memory_space<vmem>>, vector<1x128xf32>
    %391 = vector.broadcast %390 : vector<1x128xf32> to vector<8x128xf32>
    %392 = arith.addf %389, %391 : vector<8x128xf32>
    %393 = arith.addf %324, %392 : vector<8x128xf32>
    %c0_114 = arith.constant 0 : index
    %c4224 = arith.constant 4224 : index
    %394 = vector.load %arg10[%c0_114, %c4224] : memref<1x7808xf32, #tpu.memory_space<vmem>>, vector<1x128xf32>
    %c0_115 = arith.constant 0 : index
    %c4352 = arith.constant 4352 : index
    %395 = vector.load %arg10[%c0_115, %c4352] : memref<1x7808xf32, #tpu.memory_space<vmem>>, vector<1x128xf32>
    %cst_116 = arith.constant dense<0.000000e+00> : vector<8xf32>
    %396 = vector.multi_reduction <add>, %393, %cst_116 [1] : vector<8x128xf32> to vector<8xf32>
    %397 = vector.shape_cast %396 : vector<8xf32> to vector<8x1xf32>
    %cst_117 = arith.constant 1.280000e+02 : f32
    %398 = vector.broadcast %cst_117 : f32 to vector<8x1xf32>
    %399 = arith.divf %397, %398 : vector<8x1xf32>
    %400 = vector.broadcast %399 : vector<8x1xf32> to vector<8x128xf32>
    %401 = arith.subf %393, %400 : vector<8x128xf32>
    %402 = arith.mulf %401, %401 : vector<8x128xf32>
    %cst_118 = arith.constant dense<0.000000e+00> : vector<8xf32>
    %403 = vector.multi_reduction <add>, %402, %cst_118 [1] : vector<8x128xf32> to vector<8xf32>
    %404 = vector.shape_cast %403 : vector<8xf32> to vector<8x1xf32>
    %cst_119 = arith.constant 1.280000e+02 : f32
    %405 = vector.broadcast %cst_119 : f32 to vector<8x1xf32>
    %406 = arith.divf %404, %405 : vector<8x1xf32>
    %407 = vector.broadcast %399 : vector<8x1xf32> to vector<8x128xf32>
    %408 = arith.subf %393, %407 : vector<8x128xf32>
    %cst_120 = arith.constant 9.99999974E-6 : f32
    %409 = vector.broadcast %cst_120 : f32 to vector<8x1xf32>
    %410 = arith.addf %406, %409 : vector<8x1xf32>
    %411 = math.rsqrt %410 : vector<8x1xf32>
    %412 = vector.broadcast %411 : vector<8x1xf32> to vector<8x128xf32>
    %413 = arith.mulf %408, %412 : vector<8x128xf32>
    %414 = vector.broadcast %394 : vector<1x128xf32> to vector<8x128xf32>
    %415 = arith.mulf %413, %414 : vector<8x128xf32>
    %416 = vector.broadcast %395 : vector<1x128xf32> to vector<8x128xf32>
    %417 = arith.addf %415, %416 : vector<8x128xf32>
    %c0_121 = arith.constant 0 : index
    %c2048 = arith.constant 2048 : index
    %418 = vector.load %arg8[%c0_121, %c2048] : memref<128x4224xbf16, #tpu.memory_space<vmem>>, vector<128x128xbf16>
    %419 = arith.truncf %417 : vector<8x128xf32> to vector<8x128xbf16>
    %cst_122 = arith.constant dense<0.000000e+00> : vector<8x128xf32>
    %420 = tpu.matmul %419, %418, %cst_122 {dimension_numbers = #tpu.dot_dimension_numbers<[1], [0], [0], [1], [0, 0, 1, 1], [], []>} : vector<8x128xbf16>, vector<128x128xbf16>, vector<8x128xf32> -> vector<8x128xf32>
    %c0_123 = arith.constant 0 : index
    %c3328 = arith.constant 3328 : index
    %421 = vector.load %arg10[%c0_123, %c3328] : memref<1x7808xf32, #tpu.memory_space<vmem>>, vector<1x128xf32>
    %422 = vector.broadcast %421 : vector<1x128xf32> to vector<8x128xf32>
    %423 = arith.addf %420, %422 : vector<8x128xf32>
    %c0_124 = arith.constant 0 : index
    %c2176_125 = arith.constant 2176 : index
    %424 = vector.load %arg8[%c0_124, %c2176_125] : memref<128x4224xbf16, #tpu.memory_space<vmem>>, vector<128x256xbf16>
    %425 = arith.truncf %311 : vector<8x128xf32> to vector<8x128xbf16>
    %cst_126 = arith.constant dense<0.000000e+00> : vector<8x256xf32>
    %426 = tpu.matmul %425, %424, %cst_126 {dimension_numbers = #tpu.dot_dimension_numbers<[1], [0], [0], [1], [0, 0, 1, 1], [], []>} : vector<8x128xbf16>, vector<128x256xbf16>, vector<8x256xf32> -> vector<8x256xf32>
    %c0_127 = arith.constant 0 : index
    %c3456 = arith.constant 3456 : index
    %427 = vector.load %arg10[%c0_127, %c3456] : memref<1x7808xf32, #tpu.memory_space<vmem>>, vector<1x256xf32>
    %428 = vector.broadcast %427 : vector<1x256xf32> to vector<8x256xf32>
    %429 = arith.addf %426, %428 : vector<8x256xf32>
    %430 = vector.extract_strided_slice %429 {offsets = [0, 0], sizes = [8, 128], strides = [1, 1]} : vector<8x256xf32> to vector<8x128xf32>
    %431 = vector.extract_strided_slice %429 {offsets = [0, 128], sizes = [8, 128], strides = [1, 1]} : vector<8x256xf32> to vector<8x128xf32>
    %432 = vector.extract_strided_slice %423 {offsets = [0, 0], sizes = [8, 32], strides = [1, 1]} : vector<8x128xf32> to vector<8x32xf32>
    %433 = vector.shape_cast %432 : vector<8x32xf32> to vector<1x8x32xf32>
    %434 = vector.extract_strided_slice %423 {offsets = [0, 32], sizes = [8, 32], strides = [1, 1]} : vector<8x128xf32> to vector<8x32xf32>
    %435 = vector.shape_cast %434 : vector<8x32xf32> to vector<1x8x32xf32>
    %436 = vector.extract_strided_slice %423 {offsets = [0, 64], sizes = [8, 32], strides = [1, 1]} : vector<8x128xf32> to vector<8x32xf32>
    %437 = vector.shape_cast %436 : vector<8x32xf32> to vector<1x8x32xf32>
    %438 = vector.extract_strided_slice %423 {offsets = [0, 96], sizes = [8, 32], strides = [1, 1]} : vector<8x128xf32> to vector<8x32xf32>
    %439 = vector.shape_cast %438 : vector<8x32xf32> to vector<1x8x32xf32>
    %440 = tpu.concatenate %433, %435, %437, %439 in 0 : vector<1x8x32xf32>, vector<1x8x32xf32>, vector<1x8x32xf32>, vector<1x8x32xf32> -> vector<4x8x32xf32>
    %441 = vector.extract_strided_slice %430 {offsets = [0, 0], sizes = [8, 32], strides = [1, 1]} : vector<8x128xf32> to vector<8x32xf32>
    %442 = vector.shape_cast %441 : vector<8x32xf32> to vector<1x8x32xf32>
    %443 = vector.extract_strided_slice %430 {offsets = [0, 32], sizes = [8, 32], strides = [1, 1]} : vector<8x128xf32> to vector<8x32xf32>
    %444 = vector.shape_cast %443 : vector<8x32xf32> to vector<1x8x32xf32>
    %445 = vector.extract_strided_slice %430 {offsets = [0, 64], sizes = [8, 32], strides = [1, 1]} : vector<8x128xf32> to vector<8x32xf32>
    %446 = vector.shape_cast %445 : vector<8x32xf32> to vector<1x8x32xf32>
    %447 = vector.extract_strided_slice %430 {offsets = [0, 96], sizes = [8, 32], strides = [1, 1]} : vector<8x128xf32> to vector<8x32xf32>
    %448 = vector.shape_cast %447 : vector<8x32xf32> to vector<1x8x32xf32>
    %449 = tpu.concatenate %442, %444, %446, %448 in 0 : vector<1x8x32xf32>, vector<1x8x32xf32>, vector<1x8x32xf32>, vector<1x8x32xf32> -> vector<4x8x32xf32>
    %450 = vector.extract_strided_slice %431 {offsets = [0, 0], sizes = [8, 32], strides = [1, 1]} : vector<8x128xf32> to vector<8x32xf32>
    %451 = vector.shape_cast %450 : vector<8x32xf32> to vector<1x8x32xf32>
    %452 = vector.extract_strided_slice %431 {offsets = [0, 32], sizes = [8, 32], strides = [1, 1]} : vector<8x128xf32> to vector<8x32xf32>
    %453 = vector.shape_cast %452 : vector<8x32xf32> to vector<1x8x32xf32>
    %454 = vector.extract_strided_slice %431 {offsets = [0, 64], sizes = [8, 32], strides = [1, 1]} : vector<8x128xf32> to vector<8x32xf32>
    %455 = vector.shape_cast %454 : vector<8x32xf32> to vector<1x8x32xf32>
    %456 = vector.extract_strided_slice %431 {offsets = [0, 96], sizes = [8, 32], strides = [1, 1]} : vector<8x128xf32> to vector<8x32xf32>
    %457 = vector.shape_cast %456 : vector<8x32xf32> to vector<1x8x32xf32>
    %458 = tpu.concatenate %451, %453, %455, %457 in 0 : vector<1x8x32xf32>, vector<1x8x32xf32>, vector<1x8x32xf32>, vector<1x8x32xf32> -> vector<4x8x32xf32>
    %459 = arith.truncf %440 : vector<4x8x32xf32> to vector<4x8x32xbf16>
    %460 = arith.truncf %449 : vector<4x8x32xf32> to vector<4x8x32xbf16>
    "tpu.trace_start"() <{level = 10 : i32, message = "hqd,hkd->hqk"}> : () -> ()
    %cst_128 = arith.constant dense<0.000000e+00> : vector<4x8x8xf32>
    %461 = tpu.matmul %459, %460, %cst_128 {dimension_numbers = #tpu.dot_dimension_numbers<[2], [2], [1], [1], [0, 0, 0, 1, 1, 1], [0], [0]>} : vector<4x8x32xbf16>, vector<4x8x32xbf16>, vector<4x8x8xf32> -> vector<4x8x8xf32>
    "tpu.trace_stop"() : () -> ()
    %462 = vector.broadcast %0 : vector<1x1x8xf32> to vector<4x8x8xf32>
    %463 = arith.addf %461, %462 : vector<4x8x8xf32>
    %cst_129 = arith.constant dense<0xFF800000> : vector<4x8xf32>
    %464 = vector.multi_reduction <maximumf>, %463, %cst_129 [2] : vector<4x8x8xf32> to vector<4x8xf32>
    %465 = vector.shape_cast %464 : vector<4x8xf32> to vector<4x8x1xf32>
    %466 = vector.broadcast %465 : vector<4x8x1xf32> to vector<4x8x8xf32>
    %467 = arith.subf %463, %466 : vector<4x8x8xf32>
    %468 = math.exp %467 : vector<4x8x8xf32>
    %cst_130 = arith.constant dense<0.000000e+00> : vector<4x8xf32>
    %469 = vector.multi_reduction <add>, %468, %cst_130 [2] : vector<4x8x8xf32> to vector<4x8xf32>
    %470 = vector.shape_cast %469 : vector<4x8xf32> to vector<4x8x1xf32>
    %471 = vector.broadcast %470 : vector<4x8x1xf32> to vector<4x8x8xf32>
    %472 = arith.divf %468, %471 : vector<4x8x8xf32>
    %473 = arith.truncf %472 : vector<4x8x8xf32> to vector<4x8x8xbf16>
    %474 = arith.truncf %458 : vector<4x8x32xf32> to vector<4x8x32xbf16>
    "tpu.trace_start"() <{level = 10 : i32, message = "hqk,hkd->hqd"}> : () -> ()
    %cst_131 = arith.constant dense<0.000000e+00> : vector<4x8x32xf32>
    %475 = tpu.matmul %473, %474, %cst_131 {dimension_numbers = #tpu.dot_dimension_numbers<[2], [1], [1], [2], [0, 0, 0, 1, 1, 2], [0], [0]>} : vector<4x8x8xbf16>, vector<4x8x32xbf16>, vector<4x8x32xf32> -> vector<4x8x32xf32>
    "tpu.trace_stop"() : () -> ()
    %476 = vector.extract_strided_slice %475 {offsets = [0, 0, 0], sizes = [1, 8, 32], strides = [1, 1, 1]} : vector<4x8x32xf32> to vector<1x8x32xf32>
    %477 = vector.shape_cast %476 : vector<1x8x32xf32> to vector<8x32xf32>
    %478 = vector.extract_strided_slice %475 {offsets = [1, 0, 0], sizes = [1, 8, 32], strides = [1, 1, 1]} : vector<4x8x32xf32> to vector<1x8x32xf32>
    %479 = vector.shape_cast %478 : vector<1x8x32xf32> to vector<8x32xf32>
    %480 = vector.extract_strided_slice %475 {offsets = [2, 0, 0], sizes = [1, 8, 32], strides = [1, 1, 1]} : vector<4x8x32xf32> to vector<1x8x32xf32>
    %481 = vector.shape_cast %480 : vector<1x8x32xf32> to vector<8x32xf32>
    %482 = vector.extract_strided_slice %475 {offsets = [3, 0, 0], sizes = [1, 8, 32], strides = [1, 1, 1]} : vector<4x8x32xf32> to vector<1x8x32xf32>
    %483 = vector.shape_cast %482 : vector<1x8x32xf32> to vector<8x32xf32>
    %484 = tpu.concatenate %477, %479, %481, %483 in 1 : vector<8x32xf32>, vector<8x32xf32>, vector<8x32xf32>, vector<8x32xf32> -> vector<8x128xf32>
    %c0_132 = arith.constant 0 : index
    %c2432_133 = arith.constant 2432 : index
    %485 = vector.load %arg8[%c0_132, %c2432_133] : memref<128x4224xbf16, #tpu.memory_space<vmem>>, vector<128x128xbf16>
    %486 = arith.truncf %484 : vector<8x128xf32> to vector<8x128xbf16>
    %cst_134 = arith.constant dense<0.000000e+00> : vector<8x128xf32>
    %487 = tpu.matmul %486, %485, %cst_134 {dimension_numbers = #tpu.dot_dimension_numbers<[1], [0], [0], [1], [0, 0, 1, 1], [], []>} : vector<8x128xbf16>, vector<128x128xbf16>, vector<8x128xf32> -> vector<8x128xf32>
    %c0_135 = arith.constant 0 : index
    %c3712 = arith.constant 3712 : index
    %488 = vector.load %arg10[%c0_135, %c3712] : memref<1x7808xf32, #tpu.memory_space<vmem>>, vector<1x128xf32>
    %489 = vector.broadcast %488 : vector<1x128xf32> to vector<8x128xf32>
    %490 = arith.addf %487, %489 : vector<8x128xf32>
    %491 = arith.addf %417, %490 : vector<8x128xf32>
    %c0_136 = arith.constant 0 : index
    %c4480 = arith.constant 4480 : index
    %492 = vector.load %arg10[%c0_136, %c4480] : memref<1x7808xf32, #tpu.memory_space<vmem>>, vector<1x128xf32>
    %c0_137 = arith.constant 0 : index
    %c4608 = arith.constant 4608 : index
    %493 = vector.load %arg10[%c0_137, %c4608] : memref<1x7808xf32, #tpu.memory_space<vmem>>, vector<1x128xf32>
    %cst_138 = arith.constant dense<0.000000e+00> : vector<8xf32>
    %494 = vector.multi_reduction <add>, %491, %cst_138 [1] : vector<8x128xf32> to vector<8xf32>
    %495 = vector.shape_cast %494 : vector<8xf32> to vector<8x1xf32>
    %cst_139 = arith.constant 1.280000e+02 : f32
    %496 = vector.broadcast %cst_139 : f32 to vector<8x1xf32>
    %497 = arith.divf %495, %496 : vector<8x1xf32>
    %498 = vector.broadcast %497 : vector<8x1xf32> to vector<8x128xf32>
    %499 = arith.subf %491, %498 : vector<8x128xf32>
    %500 = arith.mulf %499, %499 : vector<8x128xf32>
    %cst_140 = arith.constant dense<0.000000e+00> : vector<8xf32>
    %501 = vector.multi_reduction <add>, %500, %cst_140 [1] : vector<8x128xf32> to vector<8xf32>
    %502 = vector.shape_cast %501 : vector<8xf32> to vector<8x1xf32>
    %cst_141 = arith.constant 1.280000e+02 : f32
    %503 = vector.broadcast %cst_141 : f32 to vector<8x1xf32>
    %504 = arith.divf %502, %503 : vector<8x1xf32>
    %505 = vector.broadcast %497 : vector<8x1xf32> to vector<8x128xf32>
    %506 = arith.subf %491, %505 : vector<8x128xf32>
    %cst_142 = arith.constant 9.99999974E-6 : f32
    %507 = vector.broadcast %cst_142 : f32 to vector<8x1xf32>
    %508 = arith.addf %504, %507 : vector<8x1xf32>
    %509 = math.rsqrt %508 : vector<8x1xf32>
    %510 = vector.broadcast %509 : vector<8x1xf32> to vector<8x128xf32>
    %511 = arith.mulf %506, %510 : vector<8x128xf32>
    %512 = vector.broadcast %492 : vector<1x128xf32> to vector<8x128xf32>
    %513 = arith.mulf %511, %512 : vector<8x128xf32>
    %514 = vector.broadcast %493 : vector<1x128xf32> to vector<8x128xf32>
    %515 = arith.addf %513, %514 : vector<8x128xf32>
    %c0_143 = arith.constant 0 : index
    %c2560_144 = arith.constant 2560 : index
    %516 = vector.load %arg8[%c0_143, %c2560_144] : memref<128x4224xbf16, #tpu.memory_space<vmem>>, vector<128x256xbf16>
    %517 = arith.truncf %515 : vector<8x128xf32> to vector<8x128xbf16>
    %cst_145 = arith.constant dense<0.000000e+00> : vector<8x256xf32>
    %518 = tpu.matmul %517, %516, %cst_145 {dimension_numbers = #tpu.dot_dimension_numbers<[1], [0], [0], [1], [0, 0, 1, 1], [], []>} : vector<8x128xbf16>, vector<128x256xbf16>, vector<8x256xf32> -> vector<8x256xf32>
    %c0_146 = arith.constant 0 : index
    %c3840 = arith.constant 3840 : index
    %519 = vector.load %arg10[%c0_146, %c3840] : memref<1x7808xf32, #tpu.memory_space<vmem>>, vector<1x256xf32>
    %520 = vector.broadcast %519 : vector<1x256xf32> to vector<8x256xf32>
    %521 = arith.addf %518, %520 : vector<8x256xf32>
    %cst_147 = arith.constant 0.000000e+00 : f32
    %522 = vector.broadcast %cst_147 : f32 to vector<8x256xf32>
    %523 = arith.maximumf %521, %522 : vector<8x256xf32>
    %c0_148 = arith.constant 0 : index
    %c256 = arith.constant 256 : index
    %524 = vector.load %arg9[%c0_148, %c256] : memref<256x512xbf16, #tpu.memory_space<vmem>>, vector<256x128xbf16>
    %525 = arith.truncf %523 : vector<8x256xf32> to vector<8x256xbf16>
    %cst_149 = arith.constant dense<0.000000e+00> : vector<8x128xf32>
    %526 = tpu.matmul %525, %524, %cst_149 {dimension_numbers = #tpu.dot_dimension_numbers<[1], [0], [0], [1], [0, 0, 1, 1], [], []>} : vector<8x256xbf16>, vector<256x128xbf16>, vector<8x128xf32> -> vector<8x128xf32>
    %c0_150 = arith.constant 0 : index
    %c4096 = arith.constant 4096 : index
    %527 = vector.load %arg10[%c0_150, %c4096] : memref<1x7808xf32, #tpu.memory_space<vmem>>, vector<1x128xf32>
    %528 = vector.broadcast %527 : vector<1x128xf32> to vector<8x128xf32>
    %529 = arith.addf %526, %528 : vector<8x128xf32>
    %530 = arith.addf %515, %529 : vector<8x128xf32>
    %c0_151 = arith.constant 0 : index
    %c4736 = arith.constant 4736 : index
    %531 = vector.load %arg10[%c0_151, %c4736] : memref<1x7808xf32, #tpu.memory_space<vmem>>, vector<1x128xf32>
    %c0_152 = arith.constant 0 : index
    %c4864 = arith.constant 4864 : index
    %532 = vector.load %arg10[%c0_152, %c4864] : memref<1x7808xf32, #tpu.memory_space<vmem>>, vector<1x128xf32>
    %cst_153 = arith.constant dense<0.000000e+00> : vector<8xf32>
    %533 = vector.multi_reduction <add>, %530, %cst_153 [1] : vector<8x128xf32> to vector<8xf32>
    %534 = vector.shape_cast %533 : vector<8xf32> to vector<8x1xf32>
    %cst_154 = arith.constant 1.280000e+02 : f32
    %535 = vector.broadcast %cst_154 : f32 to vector<8x1xf32>
    %536 = arith.divf %534, %535 : vector<8x1xf32>
    %537 = vector.broadcast %536 : vector<8x1xf32> to vector<8x128xf32>
    %538 = arith.subf %530, %537 : vector<8x128xf32>
    %539 = arith.mulf %538, %538 : vector<8x128xf32>
    %cst_155 = arith.constant dense<0.000000e+00> : vector<8xf32>
    %540 = vector.multi_reduction <add>, %539, %cst_155 [1] : vector<8x128xf32> to vector<8xf32>
    %541 = vector.shape_cast %540 : vector<8xf32> to vector<8x1xf32>
    %cst_156 = arith.constant 1.280000e+02 : f32
    %542 = vector.broadcast %cst_156 : f32 to vector<8x1xf32>
    %543 = arith.divf %541, %542 : vector<8x1xf32>
    %544 = vector.broadcast %536 : vector<8x1xf32> to vector<8x128xf32>
    %545 = arith.subf %530, %544 : vector<8x128xf32>
    %cst_157 = arith.constant 9.99999974E-6 : f32
    %546 = vector.broadcast %cst_157 : f32 to vector<8x1xf32>
    %547 = arith.addf %543, %546 : vector<8x1xf32>
    %548 = math.rsqrt %547 : vector<8x1xf32>
    %549 = vector.broadcast %548 : vector<8x1xf32> to vector<8x128xf32>
    %550 = arith.mulf %545, %549 : vector<8x128xf32>
    %551 = vector.broadcast %531 : vector<1x128xf32> to vector<8x128xf32>
    %552 = arith.mulf %550, %551 : vector<8x128xf32>
    %553 = vector.broadcast %532 : vector<1x128xf32> to vector<8x128xf32>
    %554 = arith.addf %552, %553 : vector<8x128xf32>
    %c0_158 = arith.constant 0 : index
    %c2816_159 = arith.constant 2816 : index
    %555 = vector.load %arg8[%c0_158, %c2816_159] : memref<128x4224xbf16, #tpu.memory_space<vmem>>, vector<128x384xbf16>
    %556 = arith.truncf %554 : vector<8x128xf32> to vector<8x128xbf16>
    %cst_160 = arith.constant dense<0.000000e+00> : vector<8x384xf32>
    %557 = tpu.matmul %556, %555, %cst_160 {dimension_numbers = #tpu.dot_dimension_numbers<[1], [0], [0], [1], [0, 0, 1, 1], [], []>} : vector<8x128xbf16>, vector<128x384xbf16>, vector<8x384xf32> -> vector<8x384xf32>
    %c0_161 = arith.constant 0 : index
    %c4992 = arith.constant 4992 : index
    %558 = vector.load %arg10[%c0_161, %c4992] : memref<1x7808xf32, #tpu.memory_space<vmem>>, vector<1x384xf32>
    %559 = vector.broadcast %558 : vector<1x384xf32> to vector<8x384xf32>
    %560 = arith.addf %557, %559 : vector<8x384xf32>
    %561 = vector.extract_strided_slice %560 {offsets = [0, 0], sizes = [8, 128], strides = [1, 1]} : vector<8x384xf32> to vector<8x128xf32>
    %562 = vector.extract_strided_slice %560 {offsets = [0, 128], sizes = [8, 128], strides = [1, 1]} : vector<8x384xf32> to vector<8x128xf32>
    %563 = vector.extract_strided_slice %560 {offsets = [0, 256], sizes = [8, 128], strides = [1, 1]} : vector<8x384xf32> to vector<8x128xf32>
    %564 = vector.extract_strided_slice %561 {offsets = [0, 0], sizes = [8, 32], strides = [1, 1]} : vector<8x128xf32> to vector<8x32xf32>
    %565 = vector.shape_cast %564 : vector<8x32xf32> to vector<1x8x32xf32>
    %566 = vector.extract_strided_slice %561 {offsets = [0, 32], sizes = [8, 32], strides = [1, 1]} : vector<8x128xf32> to vector<8x32xf32>
    %567 = vector.shape_cast %566 : vector<8x32xf32> to vector<1x8x32xf32>
    %568 = vector.extract_strided_slice %561 {offsets = [0, 64], sizes = [8, 32], strides = [1, 1]} : vector<8x128xf32> to vector<8x32xf32>
    %569 = vector.shape_cast %568 : vector<8x32xf32> to vector<1x8x32xf32>
    %570 = vector.extract_strided_slice %561 {offsets = [0, 96], sizes = [8, 32], strides = [1, 1]} : vector<8x128xf32> to vector<8x32xf32>
    %571 = vector.shape_cast %570 : vector<8x32xf32> to vector<1x8x32xf32>
    %572 = tpu.concatenate %565, %567, %569, %571 in 0 : vector<1x8x32xf32>, vector<1x8x32xf32>, vector<1x8x32xf32>, vector<1x8x32xf32> -> vector<4x8x32xf32>
    %573 = vector.extract_strided_slice %562 {offsets = [0, 0], sizes = [8, 32], strides = [1, 1]} : vector<8x128xf32> to vector<8x32xf32>
    %574 = vector.shape_cast %573 : vector<8x32xf32> to vector<1x8x32xf32>
    %575 = vector.extract_strided_slice %562 {offsets = [0, 32], sizes = [8, 32], strides = [1, 1]} : vector<8x128xf32> to vector<8x32xf32>
    %576 = vector.shape_cast %575 : vector<8x32xf32> to vector<1x8x32xf32>
    %577 = vector.extract_strided_slice %562 {offsets = [0, 64], sizes = [8, 32], strides = [1, 1]} : vector<8x128xf32> to vector<8x32xf32>
    %578 = vector.shape_cast %577 : vector<8x32xf32> to vector<1x8x32xf32>
    %579 = vector.extract_strided_slice %562 {offsets = [0, 96], sizes = [8, 32], strides = [1, 1]} : vector<8x128xf32> to vector<8x32xf32>
    %580 = vector.shape_cast %579 : vector<8x32xf32> to vector<1x8x32xf32>
    %581 = tpu.concatenate %574, %576, %578, %580 in 0 : vector<1x8x32xf32>, vector<1x8x32xf32>, vector<1x8x32xf32>, vector<1x8x32xf32> -> vector<4x8x32xf32>
    %582 = vector.extract_strided_slice %563 {offsets = [0, 0], sizes = [8, 32], strides = [1, 1]} : vector<8x128xf32> to vector<8x32xf32>
    %583 = vector.shape_cast %582 : vector<8x32xf32> to vector<1x8x32xf32>
    %584 = vector.extract_strided_slice %563 {offsets = [0, 32], sizes = [8, 32], strides = [1, 1]} : vector<8x128xf32> to vector<8x32xf32>
    %585 = vector.shape_cast %584 : vector<8x32xf32> to vector<1x8x32xf32>
    %586 = vector.extract_strided_slice %563 {offsets = [0, 64], sizes = [8, 32], strides = [1, 1]} : vector<8x128xf32> to vector<8x32xf32>
    %587 = vector.shape_cast %586 : vector<8x32xf32> to vector<1x8x32xf32>
    %588 = vector.extract_strided_slice %563 {offsets = [0, 96], sizes = [8, 32], strides = [1, 1]} : vector<8x128xf32> to vector<8x32xf32>
    %589 = vector.shape_cast %588 : vector<8x32xf32> to vector<1x8x32xf32>
    %590 = tpu.concatenate %583, %585, %587, %589 in 0 : vector<1x8x32xf32>, vector<1x8x32xf32>, vector<1x8x32xf32>, vector<1x8x32xf32> -> vector<4x8x32xf32>
    %591 = arith.truncf %572 : vector<4x8x32xf32> to vector<4x8x32xbf16>
    %592 = arith.truncf %581 : vector<4x8x32xf32> to vector<4x8x32xbf16>
    "tpu.trace_start"() <{level = 10 : i32, message = "hqd,hkd->hqk"}> : () -> ()
    %cst_162 = arith.constant dense<0.000000e+00> : vector<4x8x8xf32>
    %593 = tpu.matmul %591, %592, %cst_162 {dimension_numbers = #tpu.dot_dimension_numbers<[2], [2], [1], [1], [0, 0, 0, 1, 1, 1], [0], [0]>} : vector<4x8x32xbf16>, vector<4x8x32xbf16>, vector<4x8x8xf32> -> vector<4x8x8xf32>
    "tpu.trace_stop"() : () -> ()
    %594 = vector.broadcast %10 : vector<1x8x8xf32> to vector<4x8x8xf32>
    %595 = arith.addf %593, %594 : vector<4x8x8xf32>
    %cst_163 = arith.constant dense<0xFF800000> : vector<4x8xf32>
    %596 = vector.multi_reduction <maximumf>, %595, %cst_163 [2] : vector<4x8x8xf32> to vector<4x8xf32>
    %597 = vector.shape_cast %596 : vector<4x8xf32> to vector<4x8x1xf32>
    %598 = vector.broadcast %597 : vector<4x8x1xf32> to vector<4x8x8xf32>
    %599 = arith.subf %595, %598 : vector<4x8x8xf32>
    %600 = math.exp %599 : vector<4x8x8xf32>
    %cst_164 = arith.constant dense<0.000000e+00> : vector<4x8xf32>
    %601 = vector.multi_reduction <add>, %600, %cst_164 [2] : vector<4x8x8xf32> to vector<4x8xf32>
    %602 = vector.shape_cast %601 : vector<4x8xf32> to vector<4x8x1xf32>
    %603 = vector.broadcast %602 : vector<4x8x1xf32> to vector<4x8x8xf32>
    %604 = arith.divf %600, %603 : vector<4x8x8xf32>
    %605 = arith.truncf %604 : vector<4x8x8xf32> to vector<4x8x8xbf16>
    %606 = arith.truncf %590 : vector<4x8x32xf32> to vector<4x8x32xbf16>
    "tpu.trace_start"() <{level = 10 : i32, message = "hqk,hkd->hqd"}> : () -> ()
    %cst_165 = arith.constant dense<0.000000e+00> : vector<4x8x32xf32>
    %607 = tpu.matmul %605, %606, %cst_165 {dimension_numbers = #tpu.dot_dimension_numbers<[2], [1], [1], [2], [0, 0, 0, 1, 1, 2], [0], [0]>} : vector<4x8x8xbf16>, vector<4x8x32xbf16>, vector<4x8x32xf32> -> vector<4x8x32xf32>
    "tpu.trace_stop"() : () -> ()
    %608 = vector.extract_strided_slice %607 {offsets = [0, 0, 0], sizes = [1, 8, 32], strides = [1, 1, 1]} : vector<4x8x32xf32> to vector<1x8x32xf32>
    %609 = vector.shape_cast %608 : vector<1x8x32xf32> to vector<8x32xf32>
    %610 = vector.extract_strided_slice %607 {offsets = [1, 0, 0], sizes = [1, 8, 32], strides = [1, 1, 1]} : vector<4x8x32xf32> to vector<1x8x32xf32>
    %611 = vector.shape_cast %610 : vector<1x8x32xf32> to vector<8x32xf32>
    %612 = vector.extract_strided_slice %607 {offsets = [2, 0, 0], sizes = [1, 8, 32], strides = [1, 1, 1]} : vector<4x8x32xf32> to vector<1x8x32xf32>
    %613 = vector.shape_cast %612 : vector<1x8x32xf32> to vector<8x32xf32>
    %614 = vector.extract_strided_slice %607 {offsets = [3, 0, 0], sizes = [1, 8, 32], strides = [1, 1, 1]} : vector<4x8x32xf32> to vector<1x8x32xf32>
    %615 = vector.shape_cast %614 : vector<1x8x32xf32> to vector<8x32xf32>
    %616 = tpu.concatenate %609, %611, %613, %615 in 1 : vector<8x32xf32>, vector<8x32xf32>, vector<8x32xf32>, vector<8x32xf32> -> vector<8x128xf32>
    %c0_166 = arith.constant 0 : index
    %c3200_167 = arith.constant 3200 : index
    %617 = vector.load %arg8[%c0_166, %c3200_167] : memref<128x4224xbf16, #tpu.memory_space<vmem>>, vector<128x128xbf16>
    %618 = arith.truncf %616 : vector<8x128xf32> to vector<8x128xbf16>
    %cst_168 = arith.constant dense<0.000000e+00> : vector<8x128xf32>
    %619 = tpu.matmul %618, %617, %cst_168 {dimension_numbers = #tpu.dot_dimension_numbers<[1], [0], [0], [1], [0, 0, 1, 1], [], []>} : vector<8x128xbf16>, vector<128x128xbf16>, vector<8x128xf32> -> vector<8x128xf32>
    %c0_169 = arith.constant 0 : index
    %c5376 = arith.constant 5376 : index
    %620 = vector.load %arg10[%c0_169, %c5376] : memref<1x7808xf32, #tpu.memory_space<vmem>>, vector<1x128xf32>
    %621 = vector.broadcast %620 : vector<1x128xf32> to vector<8x128xf32>
    %622 = arith.addf %619, %621 : vector<8x128xf32>
    %623 = arith.addf %554, %622 : vector<8x128xf32>
    %c0_170 = arith.constant 0 : index
    %c6400 = arith.constant 6400 : index
    %624 = vector.load %arg10[%c0_170, %c6400] : memref<1x7808xf32, #tpu.memory_space<vmem>>, vector<1x128xf32>
    %c0_171 = arith.constant 0 : index
    %c6528 = arith.constant 6528 : index
    %625 = vector.load %arg10[%c0_171, %c6528] : memref<1x7808xf32, #tpu.memory_space<vmem>>, vector<1x128xf32>
    %cst_172 = arith.constant dense<0.000000e+00> : vector<8xf32>
    %626 = vector.multi_reduction <add>, %623, %cst_172 [1] : vector<8x128xf32> to vector<8xf32>
    %627 = vector.shape_cast %626 : vector<8xf32> to vector<8x1xf32>
    %cst_173 = arith.constant 1.280000e+02 : f32
    %628 = vector.broadcast %cst_173 : f32 to vector<8x1xf32>
    %629 = arith.divf %627, %628 : vector<8x1xf32>
    %630 = vector.broadcast %629 : vector<8x1xf32> to vector<8x128xf32>
    %631 = arith.subf %623, %630 : vector<8x128xf32>
    %632 = arith.mulf %631, %631 : vector<8x128xf32>
    %cst_174 = arith.constant dense<0.000000e+00> : vector<8xf32>
    %633 = vector.multi_reduction <add>, %632, %cst_174 [1] : vector<8x128xf32> to vector<8xf32>
    %634 = vector.shape_cast %633 : vector<8xf32> to vector<8x1xf32>
    %cst_175 = arith.constant 1.280000e+02 : f32
    %635 = vector.broadcast %cst_175 : f32 to vector<8x1xf32>
    %636 = arith.divf %634, %635 : vector<8x1xf32>
    %637 = vector.broadcast %629 : vector<8x1xf32> to vector<8x128xf32>
    %638 = arith.subf %623, %637 : vector<8x128xf32>
    %cst_176 = arith.constant 9.99999974E-6 : f32
    %639 = vector.broadcast %cst_176 : f32 to vector<8x1xf32>
    %640 = arith.addf %636, %639 : vector<8x1xf32>
    %641 = math.rsqrt %640 : vector<8x1xf32>
    %642 = vector.broadcast %641 : vector<8x1xf32> to vector<8x128xf32>
    %643 = arith.mulf %638, %642 : vector<8x128xf32>
    %644 = vector.broadcast %624 : vector<1x128xf32> to vector<8x128xf32>
    %645 = arith.mulf %643, %644 : vector<8x128xf32>
    %646 = vector.broadcast %625 : vector<1x128xf32> to vector<8x128xf32>
    %647 = arith.addf %645, %646 : vector<8x128xf32>
    %c0_177 = arith.constant 0 : index
    %c3328_178 = arith.constant 3328 : index
    %648 = vector.load %arg8[%c0_177, %c3328_178] : memref<128x4224xbf16, #tpu.memory_space<vmem>>, vector<128x128xbf16>
    %649 = arith.truncf %647 : vector<8x128xf32> to vector<8x128xbf16>
    %cst_179 = arith.constant dense<0.000000e+00> : vector<8x128xf32>
    %650 = tpu.matmul %649, %648, %cst_179 {dimension_numbers = #tpu.dot_dimension_numbers<[1], [0], [0], [1], [0, 0, 1, 1], [], []>} : vector<8x128xbf16>, vector<128x128xbf16>, vector<8x128xf32> -> vector<8x128xf32>
    %c0_180 = arith.constant 0 : index
    %c5504 = arith.constant 5504 : index
    %651 = vector.load %arg10[%c0_180, %c5504] : memref<1x7808xf32, #tpu.memory_space<vmem>>, vector<1x128xf32>
    %652 = vector.broadcast %651 : vector<1x128xf32> to vector<8x128xf32>
    %653 = arith.addf %650, %652 : vector<8x128xf32>
    %c0_181 = arith.constant 0 : index
    %c3456_182 = arith.constant 3456 : index
    %654 = vector.load %arg8[%c0_181, %c3456_182] : memref<128x4224xbf16, #tpu.memory_space<vmem>>, vector<128x256xbf16>
    %655 = arith.truncf %311 : vector<8x128xf32> to vector<8x128xbf16>
    %cst_183 = arith.constant dense<0.000000e+00> : vector<8x256xf32>
    %656 = tpu.matmul %655, %654, %cst_183 {dimension_numbers = #tpu.dot_dimension_numbers<[1], [0], [0], [1], [0, 0, 1, 1], [], []>} : vector<8x128xbf16>, vector<128x256xbf16>, vector<8x256xf32> -> vector<8x256xf32>
    %c0_184 = arith.constant 0 : index
    %c5632 = arith.constant 5632 : index
    %657 = vector.load %arg10[%c0_184, %c5632] : memref<1x7808xf32, #tpu.memory_space<vmem>>, vector<1x256xf32>
    %658 = vector.broadcast %657 : vector<1x256xf32> to vector<8x256xf32>
    %659 = arith.addf %656, %658 : vector<8x256xf32>
    %660 = vector.extract_strided_slice %659 {offsets = [0, 0], sizes = [8, 128], strides = [1, 1]} : vector<8x256xf32> to vector<8x128xf32>
    %661 = vector.extract_strided_slice %659 {offsets = [0, 128], sizes = [8, 128], strides = [1, 1]} : vector<8x256xf32> to vector<8x128xf32>
    %662 = vector.extract_strided_slice %653 {offsets = [0, 0], sizes = [8, 32], strides = [1, 1]} : vector<8x128xf32> to vector<8x32xf32>
    %663 = vector.shape_cast %662 : vector<8x32xf32> to vector<1x8x32xf32>
    %664 = vector.extract_strided_slice %653 {offsets = [0, 32], sizes = [8, 32], strides = [1, 1]} : vector<8x128xf32> to vector<8x32xf32>
    %665 = vector.shape_cast %664 : vector<8x32xf32> to vector<1x8x32xf32>
    %666 = vector.extract_strided_slice %653 {offsets = [0, 64], sizes = [8, 32], strides = [1, 1]} : vector<8x128xf32> to vector<8x32xf32>
    %667 = vector.shape_cast %666 : vector<8x32xf32> to vector<1x8x32xf32>
    %668 = vector.extract_strided_slice %653 {offsets = [0, 96], sizes = [8, 32], strides = [1, 1]} : vector<8x128xf32> to vector<8x32xf32>
    %669 = vector.shape_cast %668 : vector<8x32xf32> to vector<1x8x32xf32>
    %670 = tpu.concatenate %663, %665, %667, %669 in 0 : vector<1x8x32xf32>, vector<1x8x32xf32>, vector<1x8x32xf32>, vector<1x8x32xf32> -> vector<4x8x32xf32>
    %671 = vector.extract_strided_slice %660 {offsets = [0, 0], sizes = [8, 32], strides = [1, 1]} : vector<8x128xf32> to vector<8x32xf32>
    %672 = vector.shape_cast %671 : vector<8x32xf32> to vector<1x8x32xf32>
    %673 = vector.extract_strided_slice %660 {offsets = [0, 32], sizes = [8, 32], strides = [1, 1]} : vector<8x128xf32> to vector<8x32xf32>
    %674 = vector.shape_cast %673 : vector<8x32xf32> to vector<1x8x32xf32>
    %675 = vector.extract_strided_slice %660 {offsets = [0, 64], sizes = [8, 32], strides = [1, 1]} : vector<8x128xf32> to vector<8x32xf32>
    %676 = vector.shape_cast %675 : vector<8x32xf32> to vector<1x8x32xf32>
    %677 = vector.extract_strided_slice %660 {offsets = [0, 96], sizes = [8, 32], strides = [1, 1]} : vector<8x128xf32> to vector<8x32xf32>
    %678 = vector.shape_cast %677 : vector<8x32xf32> to vector<1x8x32xf32>
    %679 = tpu.concatenate %672, %674, %676, %678 in 0 : vector<1x8x32xf32>, vector<1x8x32xf32>, vector<1x8x32xf32>, vector<1x8x32xf32> -> vector<4x8x32xf32>
    %680 = vector.extract_strided_slice %661 {offsets = [0, 0], sizes = [8, 32], strides = [1, 1]} : vector<8x128xf32> to vector<8x32xf32>
    %681 = vector.shape_cast %680 : vector<8x32xf32> to vector<1x8x32xf32>
    %682 = vector.extract_strided_slice %661 {offsets = [0, 32], sizes = [8, 32], strides = [1, 1]} : vector<8x128xf32> to vector<8x32xf32>
    %683 = vector.shape_cast %682 : vector<8x32xf32> to vector<1x8x32xf32>
    %684 = vector.extract_strided_slice %661 {offsets = [0, 64], sizes = [8, 32], strides = [1, 1]} : vector<8x128xf32> to vector<8x32xf32>
    %685 = vector.shape_cast %684 : vector<8x32xf32> to vector<1x8x32xf32>
    %686 = vector.extract_strided_slice %661 {offsets = [0, 96], sizes = [8, 32], strides = [1, 1]} : vector<8x128xf32> to vector<8x32xf32>
    %687 = vector.shape_cast %686 : vector<8x32xf32> to vector<1x8x32xf32>
    %688 = tpu.concatenate %681, %683, %685, %687 in 0 : vector<1x8x32xf32>, vector<1x8x32xf32>, vector<1x8x32xf32>, vector<1x8x32xf32> -> vector<4x8x32xf32>
    %689 = arith.truncf %670 : vector<4x8x32xf32> to vector<4x8x32xbf16>
    %690 = arith.truncf %679 : vector<4x8x32xf32> to vector<4x8x32xbf16>
    "tpu.trace_start"() <{level = 10 : i32, message = "hqd,hkd->hqk"}> : () -> ()
    %cst_185 = arith.constant dense<0.000000e+00> : vector<4x8x8xf32>
    %691 = tpu.matmul %689, %690, %cst_185 {dimension_numbers = #tpu.dot_dimension_numbers<[2], [2], [1], [1], [0, 0, 0, 1, 1, 1], [0], [0]>} : vector<4x8x32xbf16>, vector<4x8x32xbf16>, vector<4x8x8xf32> -> vector<4x8x8xf32>
    "tpu.trace_stop"() : () -> ()
    %692 = vector.broadcast %0 : vector<1x1x8xf32> to vector<4x8x8xf32>
    %693 = arith.addf %691, %692 : vector<4x8x8xf32>
    %cst_186 = arith.constant dense<0xFF800000> : vector<4x8xf32>
    %694 = vector.multi_reduction <maximumf>, %693, %cst_186 [2] : vector<4x8x8xf32> to vector<4x8xf32>
    %695 = vector.shape_cast %694 : vector<4x8xf32> to vector<4x8x1xf32>
    %696 = vector.broadcast %695 : vector<4x8x1xf32> to vector<4x8x8xf32>
    %697 = arith.subf %693, %696 : vector<4x8x8xf32>
    %698 = math.exp %697 : vector<4x8x8xf32>
    %cst_187 = arith.constant dense<0.000000e+00> : vector<4x8xf32>
    %699 = vector.multi_reduction <add>, %698, %cst_187 [2] : vector<4x8x8xf32> to vector<4x8xf32>
    %700 = vector.shape_cast %699 : vector<4x8xf32> to vector<4x8x1xf32>
    %701 = vector.broadcast %700 : vector<4x8x1xf32> to vector<4x8x8xf32>
    %702 = arith.divf %698, %701 : vector<4x8x8xf32>
    %703 = arith.truncf %702 : vector<4x8x8xf32> to vector<4x8x8xbf16>
    %704 = arith.truncf %688 : vector<4x8x32xf32> to vector<4x8x32xbf16>
    "tpu.trace_start"() <{level = 10 : i32, message = "hqk,hkd->hqd"}> : () -> ()
    %cst_188 = arith.constant dense<0.000000e+00> : vector<4x8x32xf32>
    %705 = tpu.matmul %703, %704, %cst_188 {dimension_numbers = #tpu.dot_dimension_numbers<[2], [1], [1], [2], [0, 0, 0, 1, 1, 2], [0], [0]>} : vector<4x8x8xbf16>, vector<4x8x32xbf16>, vector<4x8x32xf32> -> vector<4x8x32xf32>
    "tpu.trace_stop"() : () -> ()
    %706 = vector.extract_strided_slice %705 {offsets = [0, 0, 0], sizes = [1, 8, 32], strides = [1, 1, 1]} : vector<4x8x32xf32> to vector<1x8x32xf32>
    %707 = vector.shape_cast %706 : vector<1x8x32xf32> to vector<8x32xf32>
    %708 = vector.extract_strided_slice %705 {offsets = [1, 0, 0], sizes = [1, 8, 32], strides = [1, 1, 1]} : vector<4x8x32xf32> to vector<1x8x32xf32>
    %709 = vector.shape_cast %708 : vector<1x8x32xf32> to vector<8x32xf32>
    %710 = vector.extract_strided_slice %705 {offsets = [2, 0, 0], sizes = [1, 8, 32], strides = [1, 1, 1]} : vector<4x8x32xf32> to vector<1x8x32xf32>
    %711 = vector.shape_cast %710 : vector<1x8x32xf32> to vector<8x32xf32>
    %712 = vector.extract_strided_slice %705 {offsets = [3, 0, 0], sizes = [1, 8, 32], strides = [1, 1, 1]} : vector<4x8x32xf32> to vector<1x8x32xf32>
    %713 = vector.shape_cast %712 : vector<1x8x32xf32> to vector<8x32xf32>
    %714 = tpu.concatenate %707, %709, %711, %713 in 1 : vector<8x32xf32>, vector<8x32xf32>, vector<8x32xf32>, vector<8x32xf32> -> vector<8x128xf32>
    %c0_189 = arith.constant 0 : index
    %c3712_190 = arith.constant 3712 : index
    %715 = vector.load %arg8[%c0_189, %c3712_190] : memref<128x4224xbf16, #tpu.memory_space<vmem>>, vector<128x128xbf16>
    %716 = arith.truncf %714 : vector<8x128xf32> to vector<8x128xbf16>
    %cst_191 = arith.constant dense<0.000000e+00> : vector<8x128xf32>
    %717 = tpu.matmul %716, %715, %cst_191 {dimension_numbers = #tpu.dot_dimension_numbers<[1], [0], [0], [1], [0, 0, 1, 1], [], []>} : vector<8x128xbf16>, vector<128x128xbf16>, vector<8x128xf32> -> vector<8x128xf32>
    %c0_192 = arith.constant 0 : index
    %c5888 = arith.constant 5888 : index
    %718 = vector.load %arg10[%c0_192, %c5888] : memref<1x7808xf32, #tpu.memory_space<vmem>>, vector<1x128xf32>
    %719 = vector.broadcast %718 : vector<1x128xf32> to vector<8x128xf32>
    %720 = arith.addf %717, %719 : vector<8x128xf32>
    %721 = arith.addf %647, %720 : vector<8x128xf32>
    %c0_193 = arith.constant 0 : index
    %c6656 = arith.constant 6656 : index
    %722 = vector.load %arg10[%c0_193, %c6656] : memref<1x7808xf32, #tpu.memory_space<vmem>>, vector<1x128xf32>
    %c0_194 = arith.constant 0 : index
    %c6784 = arith.constant 6784 : index
    %723 = vector.load %arg10[%c0_194, %c6784] : memref<1x7808xf32, #tpu.memory_space<vmem>>, vector<1x128xf32>
    %cst_195 = arith.constant dense<0.000000e+00> : vector<8xf32>
    %724 = vector.multi_reduction <add>, %721, %cst_195 [1] : vector<8x128xf32> to vector<8xf32>
    %725 = vector.shape_cast %724 : vector<8xf32> to vector<8x1xf32>
    %cst_196 = arith.constant 1.280000e+02 : f32
    %726 = vector.broadcast %cst_196 : f32 to vector<8x1xf32>
    %727 = arith.divf %725, %726 : vector<8x1xf32>
    %728 = vector.broadcast %727 : vector<8x1xf32> to vector<8x128xf32>
    %729 = arith.subf %721, %728 : vector<8x128xf32>
    %730 = arith.mulf %729, %729 : vector<8x128xf32>
    %cst_197 = arith.constant dense<0.000000e+00> : vector<8xf32>
    %731 = vector.multi_reduction <add>, %730, %cst_197 [1] : vector<8x128xf32> to vector<8xf32>
    %732 = vector.shape_cast %731 : vector<8xf32> to vector<8x1xf32>
    %cst_198 = arith.constant 1.280000e+02 : f32
    %733 = vector.broadcast %cst_198 : f32 to vector<8x1xf32>
    %734 = arith.divf %732, %733 : vector<8x1xf32>
    %735 = vector.broadcast %727 : vector<8x1xf32> to vector<8x128xf32>
    %736 = arith.subf %721, %735 : vector<8x128xf32>
    %cst_199 = arith.constant 9.99999974E-6 : f32
    %737 = vector.broadcast %cst_199 : f32 to vector<8x1xf32>
    %738 = arith.addf %734, %737 : vector<8x1xf32>
    %739 = math.rsqrt %738 : vector<8x1xf32>
    %740 = vector.broadcast %739 : vector<8x1xf32> to vector<8x128xf32>
    %741 = arith.mulf %736, %740 : vector<8x128xf32>
    %742 = vector.broadcast %722 : vector<1x128xf32> to vector<8x128xf32>
    %743 = arith.mulf %741, %742 : vector<8x128xf32>
    %744 = vector.broadcast %723 : vector<1x128xf32> to vector<8x128xf32>
    %745 = arith.addf %743, %744 : vector<8x128xf32>
    %c0_200 = arith.constant 0 : index
    %c3840_201 = arith.constant 3840 : index
    %746 = vector.load %arg8[%c0_200, %c3840_201] : memref<128x4224xbf16, #tpu.memory_space<vmem>>, vector<128x256xbf16>
    %747 = arith.truncf %745 : vector<8x128xf32> to vector<8x128xbf16>
    %cst_202 = arith.constant dense<0.000000e+00> : vector<8x256xf32>
    %748 = tpu.matmul %747, %746, %cst_202 {dimension_numbers = #tpu.dot_dimension_numbers<[1], [0], [0], [1], [0, 0, 1, 1], [], []>} : vector<8x128xbf16>, vector<128x256xbf16>, vector<8x256xf32> -> vector<8x256xf32>
    %c0_203 = arith.constant 0 : index
    %c6016 = arith.constant 6016 : index
    %749 = vector.load %arg10[%c0_203, %c6016] : memref<1x7808xf32, #tpu.memory_space<vmem>>, vector<1x256xf32>
    %750 = vector.broadcast %749 : vector<1x256xf32> to vector<8x256xf32>
    %751 = arith.addf %748, %750 : vector<8x256xf32>
    %cst_204 = arith.constant 0.000000e+00 : f32
    %752 = vector.broadcast %cst_204 : f32 to vector<8x256xf32>
    %753 = arith.maximumf %751, %752 : vector<8x256xf32>
    %c0_205 = arith.constant 0 : index
    %c384_206 = arith.constant 384 : index
    %754 = vector.load %arg9[%c0_205, %c384_206] : memref<256x512xbf16, #tpu.memory_space<vmem>>, vector<256x128xbf16>
    %755 = arith.truncf %753 : vector<8x256xf32> to vector<8x256xbf16>
    %cst_207 = arith.constant dense<0.000000e+00> : vector<8x128xf32>
    %756 = tpu.matmul %755, %754, %cst_207 {dimension_numbers = #tpu.dot_dimension_numbers<[1], [0], [0], [1], [0, 0, 1, 1], [], []>} : vector<8x256xbf16>, vector<256x128xbf16>, vector<8x128xf32> -> vector<8x128xf32>
    %c0_208 = arith.constant 0 : index
    %c6272 = arith.constant 6272 : index
    %757 = vector.load %arg10[%c0_208, %c6272] : memref<1x7808xf32, #tpu.memory_space<vmem>>, vector<1x128xf32>
    %758 = vector.broadcast %757 : vector<1x128xf32> to vector<8x128xf32>
    %759 = arith.addf %756, %758 : vector<8x128xf32>
    %760 = arith.addf %745, %759 : vector<8x128xf32>
    %c0_209 = arith.constant 0 : index
    %c6912 = arith.constant 6912 : index
    %761 = vector.load %arg10[%c0_209, %c6912] : memref<1x7808xf32, #tpu.memory_space<vmem>>, vector<1x128xf32>
    %c0_210 = arith.constant 0 : index
    %c7040 = arith.constant 7040 : index
    %762 = vector.load %arg10[%c0_210, %c7040] : memref<1x7808xf32, #tpu.memory_space<vmem>>, vector<1x128xf32>
    %cst_211 = arith.constant dense<0.000000e+00> : vector<8xf32>
    %763 = vector.multi_reduction <add>, %760, %cst_211 [1] : vector<8x128xf32> to vector<8xf32>
    %764 = vector.shape_cast %763 : vector<8xf32> to vector<8x1xf32>
    %cst_212 = arith.constant 1.280000e+02 : f32
    %765 = vector.broadcast %cst_212 : f32 to vector<8x1xf32>
    %766 = arith.divf %764, %765 : vector<8x1xf32>
    %767 = vector.broadcast %766 : vector<8x1xf32> to vector<8x128xf32>
    %768 = arith.subf %760, %767 : vector<8x128xf32>
    %769 = arith.mulf %768, %768 : vector<8x128xf32>
    %cst_213 = arith.constant dense<0.000000e+00> : vector<8xf32>
    %770 = vector.multi_reduction <add>, %769, %cst_213 [1] : vector<8x128xf32> to vector<8xf32>
    %771 = vector.shape_cast %770 : vector<8xf32> to vector<8x1xf32>
    %cst_214 = arith.constant 1.280000e+02 : f32
    %772 = vector.broadcast %cst_214 : f32 to vector<8x1xf32>
    %773 = arith.divf %771, %772 : vector<8x1xf32>
    %774 = vector.broadcast %766 : vector<8x1xf32> to vector<8x128xf32>
    %775 = arith.subf %760, %774 : vector<8x128xf32>
    %cst_215 = arith.constant 9.99999974E-6 : f32
    %776 = vector.broadcast %cst_215 : f32 to vector<8x1xf32>
    %777 = arith.addf %773, %776 : vector<8x1xf32>
    %778 = math.rsqrt %777 : vector<8x1xf32>
    %779 = vector.broadcast %778 : vector<8x1xf32> to vector<8x128xf32>
    %780 = arith.mulf %775, %779 : vector<8x128xf32>
    %781 = vector.broadcast %761 : vector<1x128xf32> to vector<8x128xf32>
    %782 = arith.mulf %780, %781 : vector<8x128xf32>
    %783 = vector.broadcast %762 : vector<1x128xf32> to vector<8x128xf32>
    %784 = arith.addf %782, %783 : vector<8x128xf32>
    %c0_216 = arith.constant 0 : index
    %c7424 = arith.constant 7424 : index
    %785 = vector.load %arg10[%c0_216, %c7424] : memref<1x7808xf32, #tpu.memory_space<vmem>>, vector<1x128xf32>
    %c0_217 = arith.constant 0 : index
    %c7552 = arith.constant 7552 : index
    %786 = vector.load %arg10[%c0_217, %c7552] : memref<1x7808xf32, #tpu.memory_space<vmem>>, vector<1x128xf32>
    %cst_218 = arith.constant dense<0.000000e+00> : vector<8xf32>
    %787 = vector.multi_reduction <add>, %784, %cst_218 [1] : vector<8x128xf32> to vector<8xf32>
    %788 = vector.shape_cast %787 : vector<8xf32> to vector<8x1xf32>
    %cst_219 = arith.constant 1.280000e+02 : f32
    %789 = vector.broadcast %cst_219 : f32 to vector<8x1xf32>
    %790 = arith.divf %788, %789 : vector<8x1xf32>
    %791 = vector.broadcast %790 : vector<8x1xf32> to vector<8x128xf32>
    %792 = arith.subf %784, %791 : vector<8x128xf32>
    %793 = arith.mulf %792, %792 : vector<8x128xf32>
    %cst_220 = arith.constant dense<0.000000e+00> : vector<8xf32>
    %794 = vector.multi_reduction <add>, %793, %cst_220 [1] : vector<8x128xf32> to vector<8xf32>
    %795 = vector.shape_cast %794 : vector<8xf32> to vector<8x1xf32>
    %cst_221 = arith.constant 1.280000e+02 : f32
    %796 = vector.broadcast %cst_221 : f32 to vector<8x1xf32>
    %797 = arith.divf %795, %796 : vector<8x1xf32>
    %798 = vector.broadcast %790 : vector<8x1xf32> to vector<8x128xf32>
    %799 = arith.subf %784, %798 : vector<8x128xf32>
    %cst_222 = arith.constant 9.99999974E-6 : f32
    %800 = vector.broadcast %cst_222 : f32 to vector<8x1xf32>
    %801 = arith.addf %797, %800 : vector<8x1xf32>
    %802 = math.rsqrt %801 : vector<8x1xf32>
    %803 = vector.broadcast %802 : vector<8x1xf32> to vector<8x128xf32>
    %804 = arith.mulf %799, %803 : vector<8x128xf32>
    %805 = vector.broadcast %785 : vector<1x128xf32> to vector<8x128xf32>
    %806 = arith.mulf %804, %805 : vector<8x128xf32>
    %807 = vector.broadcast %786 : vector<1x128xf32> to vector<8x128xf32>
    %808 = arith.addf %806, %807 : vector<8x128xf32>
    %c0_223 = arith.constant 0 : index
    %c4096_224 = arith.constant 4096 : index
    %809 = vector.load %arg8[%c0_223, %c4096_224] : memref<128x4224xbf16, #tpu.memory_space<vmem>>, vector<128x128xbf16>
    %810 = arith.truncf %808 : vector<8x128xf32> to vector<8x128xbf16>
    %cst_225 = arith.constant dense<0.000000e+00> : vector<8x128xf32>
    %811 = tpu.matmul %810, %809, %cst_225 {dimension_numbers = #tpu.dot_dimension_numbers<[1], [0], [0], [1], [0, 0, 1, 1], [], []>} : vector<8x128xbf16>, vector<128x128xbf16>, vector<8x128xf32> -> vector<8x128xf32>
    %c0_226 = arith.constant 0 : index
    %c7680 = arith.constant 7680 : index
    %812 = vector.load %arg10[%c0_226, %c7680] : memref<1x7808xf32, #tpu.memory_space<vmem>>, vector<1x128xf32>
    %813 = vector.broadcast %812 : vector<1x128xf32> to vector<8x128xf32>
    %814 = arith.addf %811, %813 : vector<8x128xf32>
    %815 = vector.shape_cast %814 : vector<8x128xf32> to vector<1x8x128xf32>
    %c0_227 = arith.constant 0 : index
    %c0_228 = arith.constant 0 : index
    %c0_229 = arith.constant 0 : index
    %816 = vector.load %arg11[%c0_227, %c0_228, %c0_229] : memref<1x8x128xf32, #tpu.memory_space<vmem>>, vector<1x8x128xf32>
    tpu.vector_store %arg11[%c0_227, %c0_228, %c0_229], %815 {strides = array<i32>} : memref<1x8x128xf32, #tpu.memory_space<vmem>>, vector<1x8x128xf32>,
    return
  }
  func.func @transform_0(%arg0: i32) -> (i32, i32, i32) {
    %c0_i32 = arith.constant 0 : i32
    %c0_i32_0 = arith.constant 0 : i32
    %c0_i32_1 = arith.constant 0 : i32
    return %arg0, %c0_i32, %c0_i32_0 : i32, i32, i32
  }
  func.func @transform_1(%arg0: i32) -> (i32, i32, i32) {
    %c0_i32 = arith.constant 0 : i32
    %c0_i32_0 = arith.constant 0 : i32
    %c0_i32_1 = arith.constant 0 : i32
    return %arg0, %c0_i32, %c0_i32_0 : i32, i32, i32
  }
  func.func @transform_2(%arg0: i32) -> (i32, i32, i32) {
    %c0_i32 = arith.constant 0 : i32
    %c0_i32_0 = arith.constant 0 : i32
    %c0_i32_1 = arith.constant 0 : i32
    return %arg0, %c0_i32, %c0_i32_0 : i32, i32, i32
  }
  func.func @transform_3(%arg0: i32) -> (i32, i32, i32) {
    %c0_i32 = arith.constant 0 : i32
    %c0_i32_0 = arith.constant 0 : i32
    %c0_i32_1 = arith.constant 0 : i32
    return %arg0, %c0_i32, %c0_i32_0 : i32, i32, i32
  }
  func.func @transform_4(%arg0: i32) -> (i32, i32) {
    %c0_i32 = arith.constant 0 : i32
    %c0_i32_0 = arith.constant 0 : i32
    %c0_i32_1 = arith.constant 0 : i32
    return %c0_i32, %c0_i32_0 : i32, i32
  }
  func.func @transform_5(%arg0: i32) -> (i32, i32) {
    %c0_i32 = arith.constant 0 : i32
    %c0_i32_0 = arith.constant 0 : i32
    %c0_i32_1 = arith.constant 0 : i32
    return %c0_i32, %c0_i32_0 : i32, i32
  }
  func.func @transform_6(%arg0: i32) -> (i32, i32) {
    %c0_i32 = arith.constant 0 : i32
    %c0_i32_0 = arith.constant 0 : i32
    %c0_i32_1 = arith.constant 0 : i32
    return %c0_i32, %c0_i32_0 : i32, i32
  }
  func.func @transform_7(%arg0: i32) -> (i32, i32) {
    %c0_i32 = arith.constant 0 : i32
    %c0_i32_0 = arith.constant 0 : i32
    %c0_i32_1 = arith.constant 0 : i32
    return %c0_i32, %c0_i32_0 : i32, i32
  }
  func.func @transform_8(%arg0: i32) -> (i32, i32) {
    %c0_i32 = arith.constant 0 : i32
    %c0_i32_0 = arith.constant 0 : i32
    %c0_i32_1 = arith.constant 0 : i32
    return %c0_i32, %c0_i32_0 : i32, i32
  }
  func.func @transform_9(%arg0: i32) -> (i32, i32) {
    %c0_i32 = arith.constant 0 : i32
    %c0_i32_0 = arith.constant 0 : i32
    %c0_i32_1 = arith.constant 0 : i32
    return %c0_i32, %c0_i32_0 : i32, i32
  }
  func.func @transform_10(%arg0: i32) -> (i32, i32, i32) {
    %c0_i32 = arith.constant 0 : i32
    %c0_i32_0 = arith.constant 0 : i32
    %c0_i32_1 = arith.constant 0 : i32
    return %arg0, %c0_i32, %c0_i32_0 : i32, i32, i32
  }
}

</mosaic_0001>

<bundles_post_ra>
// kernel: seq2seq_forward.1
= control target key start
LH: loop header
LB: loop body
LE: loop exit
PB: predicated region body
PF: predicated region fallthrough
CT: control target
= control target key end

     0   :  { %15 = vsyncpa [#allocation3], 0  ;;  %s10810_s0 = inlined_call_operand.vmem [shape: s32[2,8,1], index: 0, kind: input, shape index: {}]   ;;  %s10811_s1 = inlined_call_operand.vmem [shape: s32[2,8,1], index: 1, kind: input, shape index: {}]   ;;  %s10812_s2 = inlined_call_operand.vmem [shape: f32[2,1,8], index: 2, kind: input, shape index: {}]   ;;  %s10813_s3 = inlined_call_operand.vmem [shape: f32[2,1,8], index: 3, kind: input, shape index: {}]   ;;  %s10814_s4 = inlined_call_operand.hbm [shape: bf16[96,128], index: 4, kind: input, shape index: {}]   ;;  %s10815_s5 = inlined_call_operand.hbm [shape: bf16[80,128], index: 5, kind: input, shape index: {}]   ;;  %s10816_s6 = inlined_call_operand.hbm [shape: f32[64,128], index: 6, kind: input, shape index: {}]   ;;  %s10817_s7 = inlined_call_operand.hbm [shape: bf16[128,4224], index: 7, kind: input, shape index: {}]   ;;  %s10818_s8 = inlined_call_operand.hbm [shape: bf16[256,512], index: 8, kind: input, shape index: {}]   ;;  %s10819_s9 = inlined_call_operand.hbm [shape: f32[1,7808], index: 9, kind: input, shape index: {}]   ;;  %s10820_s10 = inlined_call_operand.vmem [shape: f32[2,8,128], index: 10, kind: output, shape index: {}]  }
   0x1   :  { %16 = vsyncpa [#allocation5], 0 }
   0x2   :  { %17 = vsyncpa [#allocation8], 0 }
   0x3   :  { %18 = vsyncpa [#allocation11], 0  ;;  %s9914_s13 = smov 0  }
   0x4 LB: > { %s9920_s14 = sadd.s32 4294967295, %s9837_s13   ;;  %p7682_p0 = scmp.ge.s32.totalorder %s9837_s13, 1  ;;  %s9837_s13 = sphi %s9914_s13, %s24_s13  }
   0x5   : > { %p285_p1 = scmp.lt.s32.totalorder %s9837_s13, 3  ;;  %p10823_p2 = scmp.eq.s32.totalorder %s9920_s14, 0 }
   0x6   : > { %s9839_s16 = smov [#allocation4]   ;;  %s9840_s18 = smov [#allocation7]  }
   0x7   : > { %p9925_p3 = pnand %p7682_p0, %p285_p1  ;;  %s310_s17 = sshll.u32 %s9839_s16, 4  ;;  %s9929_s17 = int_to_ptr.vmem [resolvable:$true] %s310_s17 }
   0x8   : > { %s336_s19 = sshll.u32 %s9840_s18, 4  ;;  %s9841_s21 = smov [#allocation2]   ;;  %s9933_s19 = int_to_ptr.vmem [resolvable:$true] %s336_s19 }
   0x9   : > { %s10825_s15 = scalar_select %p9925_p3, 1, 0 }
   0xa   : > { %p9046_p4 = pneg %p9925_p3  ;;  %s9941_s22 = sshll.u32 %s9841_s21, 4  ;;  %s298_s22 = int_to_ptr.vmem [resolvable:$true] %s9941_s22 }
   0xb   : > { %s9647_s25 = scalar_lea.hbm %s10815_s5, 640 }
   0xc   : > { %p9937_p5 = pnand %p10823_p2, %p9046_p4  ;;  %p9648_p6 = scmp.ne.s32.totalorder %s10815_s5, %s9647_s25 }
   0xd   : > { %p9654_p10 = scmp.lt.u32.totalorder %s9647_s25, %s10815_s5 }
   0xe   : > { %p9951_p7 = pneg %p9937_p5 }
  0x10   : > { %p9650_p8 = pnand %p9951_p7, %p9648_p6 }
  0x12   : > { %p9651_p9 = pneg %p9650_p8 }
  0x14   : > { %p9656_p11 = pnand %p9654_p10, %p9651_p9 }
  0x16   : > { %9659 = shalt.err (!%p9656_p11)
}
  0x17   : > { %s9660_s11 = scalar_lea.vmem %s9929_s17, 640  ;;  %p9668_p1 = scmp.lt.s32.totalorder %s9929_s17, %s9929_s17 }
  0x18   : > { %p9661_p12 = scmp.ne.s32.totalorder %s9929_s17, %s9660_s11  ;;  %p9669_p4 = scmp.lt.s32.totalorder %s9660_s11, %s9660_s11 }
  0x1a   : > { %p9663_p13 = pnand %p9661_p12, %p9951_p7  ;;  %p9670_p6 = por %p9669_p4, %p9668_p1 }
  0x1c   : > { %p9664_p0 = pneg %p9663_p13 }
  0x1e   : > { %p9671_p8 = pnand %p9670_p6, %p9664_p0 }
  0x20   : > { %9674 = shalt.err (!%p9671_p8)
}
  0x21   : > { %s10821_s12 = smov 64   ;;  %s10822_s16 = smov 4  }
  0x22   : > { %9052 = dma.hbm_to_vmem [thread:$0]  (!%p9937_p5), %s10815_s5, 640, %s9929_s17, [#allocation5], %s10821_s12, %s10821_s12, %s10822_s16  }
  0x23   : > { %s9675_s25 = scalar_lea.hbm %s10817_s7, 33792 }
  0x24   : > { %p9676_p9 = scmp.ne.s32.totalorder %s10817_s7, %s9675_s25  ;;  %p9682_p12 = scmp.lt.u32.totalorder %s9675_s25, %s10817_s7 }
  0x26   : > { %p9678_p10 = pnand %p9676_p9, %p9951_p7 }
  0x28   : > { %p9679_p11 = pneg %p9678_p10 }
  0x2a   : > { %p9684_p13 = pnand %p9682_p12, %p9679_p11 }
  0x2c   : > { %9687 = shalt.err (!%p9684_p13)
}
  0x2d   : > { %s9688_s17 = scalar_lea.vmem %s9933_s19, 33792  ;;  %p9696_p6 = scmp.lt.s32.totalorder %s9933_s19, %s9933_s19 }
  0x2e   : > { %p9689_p0 = scmp.ne.s32.totalorder %s9933_s19, %s9688_s17  ;;  %p9697_p8 = scmp.lt.s32.totalorder %s9688_s17, %s9688_s17 }
  0x30   : > { %p9691_p1 = pnand %p9689_p0, %p9951_p7  ;;  %p9698_p9 = por %p9697_p8, %p9696_p6 }
  0x32   : > { %p9692_p4 = pneg %p9691_p1 }
  0x34   : > { %p9699_p10 = pnand %p9698_p9, %p9692_p4 }
  0x36   : > { %9702 = shalt.err (!%p9699_p10)
}
  0x37   : > { %s9844_s11 = smov 2112   ;;  %s9845_s18 = smov 132  }
  0x38   : > { %9058 = dma.hbm_to_vmem [thread:$0]  (!%p9937_p5), %s10817_s7, 33792, %s9933_s19, [#allocation8], %s9844_s11, %s9844_s11, %s9845_s18  }
  0x39   : > { %s9846_s24 = smov [#allocation6]   ;;  %s9703_s29 = scalar_lea.hbm %s10814_s4, 768 }
  0x3a   : > { %s323_s25 = sshll.u32 %s9846_s24, 4  ;;  %p9704_p11 = scmp.ne.s32.totalorder %s10814_s4, %s9703_s29  ;;  %s324_s25 = int_to_ptr.vmem [resolvable:$true] %s323_s25 }
  0x3b   : > { %p9710_p0 = scmp.lt.u32.totalorder %s9703_s29, %s10814_s4 }
  0x3c   : > { %p9706_p12 = pnand %p9704_p11, %p9951_p7 }
  0x3e   : > { %p9707_p13 = pneg %p9706_p12 }
  0x40   : > { %p9712_p1 = pnand %p9710_p0, %p9707_p13 }
  0x42   : > { %9715 = shalt.err (!%p9712_p1)
}
  0x43   : > { %s9716_s19 = scalar_lea.vmem %s298_s22, 768  ;;  %p9724_p9 = scmp.lt.s32.totalorder %s298_s22, %s298_s22 }
  0x44   : > { %p9717_p4 = scmp.ne.s32.totalorder %s298_s22, %s9716_s19  ;;  %p9725_p10 = scmp.lt.s32.totalorder %s9716_s19, %s9716_s19 }
  0x46   : > { %p9719_p6 = pnand %p9717_p4, %p9951_p7  ;;  %p9726_p2 = por %p9725_p10, %p9724_p9 }
  0x48   : > { %p9720_p8 = pneg %p9719_p6 }
  0x4a   : > { %p9727_p3 = pnand %p9726_p2, %p9720_p8 }
  0x4c   : > { %9730 = shalt.err (!%p9727_p3)
}
  0x4d   : > { %s10828_s11 = smov 4   ;;  %s10829_s18 = smov 64  }
  0x4e   : > { %9049 = dma.hbm_to_vmem [thread:$0]  (!%p9937_p5), %s10814_s4, 768, %s298_s22, [#allocation3], %s10829_s18, %s10829_s18, %s10828_s11  }
  0x4f   : > { %s9731_s24 = scalar_lea.hbm %s10816_s6, 1024 }
  0x50   : > { %p9732_p2 = scmp.ne.s32.totalorder %s10816_s6, %s9731_s24  ;;  %p9738_p12 = scmp.lt.u32.totalorder %s9731_s24, %s10816_s6 }
  0x52   : > { %p9734_p3 = pnand %p9732_p2, %p9951_p7 }
  0x54   : > { %p9735_p11 = pneg %p9734_p3 }
  0x56   : > { %p9740_p13 = pnand %p9738_p12, %p9735_p11 }
  0x58   : > { %9743 = shalt.err (!%p9740_p13)
}
  0x59   : > { %s9744_s17 = scalar_lea.vmem %s324_s25, 1024  ;;  %p9752_p6 = scmp.lt.s32.totalorder %s324_s25, %s324_s25 }
  0x5a   : > { %p9745_p0 = scmp.ne.s32.totalorder %s324_s25, %s9744_s17  ;;  %p9753_p8 = scmp.lt.s32.totalorder %s9744_s17, %s9744_s17 }
  0x5c   : > { %p9747_p1 = pnand %p9745_p0, %p9951_p7  ;;  %p9754_p9 = por %p9753_p8, %p9752_p6 }
  0x5e   : > { %p9748_p4 = pneg %p9747_p1 }
  0x60   : > { %p9755_p10 = pnand %p9754_p9, %p9748_p4 }
  0x62   : > { %9758 = shalt.err (!%p9755_p10)
}
  0x63   : > { %s9847_s22 = smov 128   ;;  %s9848_s19 = smov 8  }
  0x64   : > { %9055 = dma.hbm_to_vmem [thread:$0]  (!%p9937_p5), %s10816_s6, 1024, %s324_s25, [#allocation5], %s9847_s22, %s9847_s22, %s9848_s19  }
  0x65   : > { %s9849_s12 = smov [#allocation9]   ;;  %s9759_s24 = scalar_lea.hbm %s10818_s8, 8192 }
  0x66   : > { %s349_s16 = sshll.u32 %s9849_s12, 4  ;;  %p9760_p2 = scmp.ne.s32.totalorder %s10818_s8, %s9759_s24  ;;  %s350_s16 = int_to_ptr.vmem [resolvable:$true] %s349_s16 }
  0x67   : > { %p9766_p12 = scmp.lt.u32.totalorder %s9759_s24, %s10818_s8 }
  0x68   : > { %p9762_p3 = pnand %p9760_p2, %p9951_p7 }
  0x6a   : > { %p9763_p11 = pneg %p9762_p3 }
  0x6c   : > { %p9768_p13 = pnand %p9766_p12, %p9763_p11 }
  0x6e   : > { %9771 = shalt.err (!%p9768_p13)
}
  0x6f   : > { %s9772_s25 = scalar_lea.vmem %s350_s16, 8192  ;;  %p9780_p6 = scmp.lt.s32.totalorder %s350_s16, %s350_s16 }
  0x70   : > { %p9773_p0 = scmp.ne.s32.totalorder %s350_s16, %s9772_s25  ;;  %p9781_p8 = scmp.lt.s32.totalorder %s9772_s25, %s9772_s25 }
  0x72   : > { %p9775_p1 = pnand %p9773_p0, %p9951_p7  ;;  %p9782_p9 = por %p9781_p8, %p9780_p6 }
  0x74   : > { %p9776_p4 = pneg %p9775_p1 }
  0x76   : > { %p9783_p10 = pnand %p9782_p9, %p9776_p4 }
  0x78   : > { %9786 = shalt.err (!%p9783_p10)
}
  0x79   : > { %s9850_s17 = smov 256   ;;  %s9851_s22 = smov 16  }
  0x7a   : > { %9061 = dma.hbm_to_vmem [thread:$0]  (!%p9937_p5), %s10818_s8, 8192, %s350_s16, [#allocation8], %s9850_s17, %s9850_s17, %s9851_s22  }
  0x7b   : > { %s9852_s18 = smov [#allocation10]   ;;  %s9787_s24 = scalar_lea.hbm %s10819_s9, 976 }
  0x7c   : > { %s363_s12 = sshll.u32 %s9852_s18, 4  ;;  %p9788_p2 = scmp.ne.s32.totalorder %s10819_s9, %s9787_s24  ;;  %s364_s12 = int_to_ptr.vmem [resolvable:$true] %s363_s12 }
  0x7d   : > { %p9794_p12 = scmp.lt.u32.totalorder %s9787_s24, %s10819_s9 }
  0x7e   : > { %p9790_p3 = pnand %p9788_p2, %p9951_p7 }
  0x80   : > { %p9791_p11 = pneg %p9790_p3 }
  0x82   : > { %p9796_p13 = pnand %p9794_p12, %p9791_p11 }
  0x84   : > { %9799 = shalt.err (!%p9796_p13)
}
  0x85   : > { %s9800_s16 = scalar_lea.vmem %s364_s12, 976  ;;  %s9807_s25 = scalar_lea.vmem %s364_s12, 992 }
  0x86   : > { %p9801_p0 = scmp.ne.s32.totalorder %s364_s12, %s9800_s16  ;;  %p9808_p6 = scmp.lt.s32.totalorder %s364_s12, %s364_s12 }
  0x87   : > { %p9809_p8 = scmp.lt.s32.totalorder %s9807_s25, %s9800_s16 }
  0x88   : > { %p9803_p1 = pnand %p9801_p0, %p9951_p7 }
  0x89   : > { %p9810_p9 = por %p9809_p8, %p9808_p6 }
  0x8a   : > { %p9804_p4 = pneg %p9803_p1 }
  0x8c   : > { %p9811_p10 = pnand %p9810_p9, %p9804_p4 }
  0x8e   : > { %9814 = shalt.err (!%p9811_p10)
}
  0x8f   : > { %9064 = dma.hbm_to_vmem [thread:$0]  (!%p9937_p5), %s10819_s9, 976, %s364_s12, [#allocation11]  }
  0x90   : > { %p10830_p2 = scmp.ne.s32.totalorder %s10825_s15, 0 }
  0x91   : > { %p10831_p3 = scmp.eq.s32.totalorder (!%p10830_p2), %s9920_s14, 0 }
  0x92   : > { %402 = sbr.rel (%p10830_p2) target bundleno = 14023 (0x36c7), region = 60 }
  0x99   : > { %9820 = dma.done.wait (%p10831_p3), [#allocation3], 768   ;;  %p10832_p7 = pmov %p10831_p3 }
  0x9a   : > { %p10833_p11 = pmov %p10831_p3 }
  0x9b   : > { %9822 = vsyncadd (%p10832_p7), [#allocation3], 4294966528 }
  0x9c   : > { %9824 = dma.done.wait (%p10833_p11), [#allocation5], 1664   ;;  %p10834_p12 = pmov %p10831_p3 }
  0x9d   : > { %p10835_p13 = pmov %p10831_p3 }
  0x9e   : > { %9826 = vsyncadd (%p10834_p12), [#allocation5], 4294965632 }
  0x9f   : > { %9828 = dma.done.wait (%p10835_p13), [#allocation8], 41984   ;;  %p10836_p5 = pmov %p10831_p3 }
  0xa0   : > { %p10837_p0 = pmov %p10831_p3 }
  0xa1   : > { %9830 = vsyncadd (%p10836_p5), [#allocation8], 4294925312 }
  0xa2   : > { %9832 = dma.done.wait (%p10837_p0), [#allocation11], 976   ;;  %p10838_p1 = pmov %p10837_p0 }
  0xa3   : > { %p468_p4 = scmp.lt.s32.totalorder %s9920_s14, 1  ;;  %v9853_v0 = vmov 0   ;;  %v9854_v1 = vmov 0.0   ;;  %v9106_v3 = vld [vmem:[#allocation2] sm:$0xff]   ;;  %v9107_v4 = vld [vmem:[#allocation2 + $0x8] sm:$0xff]   ;;  %vm9855_vm0 = vmmov 0   ;;  %v489_v23 = vlaneseq }
  0xa4   : > { %9834 = vsyncadd (%p10838_p1), [#allocation11], 4294966320  ;;  %9105 = vset.pattern.permute.xlu0 %v9853_v0  ;;  %8444 = vmatprep.subr.bf16.mxu0 %v9854_v1  ;;  %v9108_v5 = vld [vmem:[#allocation2 + $0x10] sm:$0xff]   ;;  %v9112_v6 = vld [vmem:[#allocation7 + $0x4] ss:$132 sps:$4 sm:$0xff]   ;;  %vm558_vm2 = vcmask 785408  }
  0xa5   : > { %s10840_s14 = smov (!%p468_p4, %s9920_s14), 1  ;;  %812 = vmatprep.mubr.bf16.mxu1 %v9853_v0  ;;  %8445 = vmatpush3.bf16.msra.mxu0 %v9106_v3  ;;  %v9114_v7 = vld [vmem:[#allocation7] ss:$132 sps:$4 sm:$0xff]   ;;  %v9116_v8 = vld [vmem:[#allocation7 + $0x10c] ss:$132 sps:$4 sm:$0xff]   ;;  %v10114_v24 = vand.u32 127, %v489_v23 }
  0xa6   : > { %s10100_s15 = sshll.u32 %s10840_s14, 3  ;;  %8446 = vmatprep.subr.bf16.mxu0 %v9854_v1  ;;  %8456 = vmatprep.mubr.msk.bf16.mxu0 %vm9855_vm0, %v9854_v1  ;;  %v9118_v9 = vld [vmem:[#allocation7 + $0x108] ss:$132 sps:$4 sm:$0xff]   ;;  %v9109_v10 = vld [vmem:[#allocation2 + $0x18] sm:$0xff]   ;;  %v9120_v11 = vld [vmem:[#allocation7 + $0x214] ss:$132 sps:$4 sm:$0xff]   ;;  %s10188_s24 = scalar_lea.vmem %s10812_s2, %s10840_s14 }
  0xa7   : > { %s471_s19 = scalar_lea.vmem %s10810_s0, %s10100_s15  ;;  %780 = vmatprep.subr.bf16.mxu1 %v9112_v6  ;;  %v9110_v12 = vld [vmem:[#allocation2 + $0x20] sm:$0xff]   ;;  %v9122_v13 = vld [vmem:[#allocation7 + $0x210] ss:$132 sps:$4 sm:$0xff]   ;;  %v9124_v14 = vld [vmem:[#allocation7 + $0x31c] ss:$132 sps:$4 sm:$0xff]   ;;  %v10138_v45 = vshrl.u32 %v489_v23, 7  ;;  %s475_s29 = scalar_lea.vmem %s10811_s1, %s10100_s15 }
  0xa8   : > { %v502_v2 = vld [vmem:[%s471_s19] sm:$0xff]  ;;  %781 = vmatpush1.bf16.msra.mxu1 %v9114_v7  ;;  %v9126_v15 = vld [vmem:[#allocation7 + $0x318] ss:$132 sps:$4 sm:$0xff]   ;;  %v9111_v16 = vld [vmem:[#allocation2 + $0x28] sm:$0xff]   ;;  %s9856_s11 = smov 96   ;;  %vm905_vm3 = vcmask 261120   ;;  %s481_s25 = scalar_lea.vmem %s10813_s3, %s10840_s14 }
  0xa9   : > { %504 = vperm.xlu0 %9105, %v502_v2   ;;  %8447 = vmatpush3.bf16.msra.mxu0 %v9107_v4  ;;  %v9128_v17 = vld [vmem:[#allocation7 + $0x424] ss:$132 sps:$4 sm:$0xff]   ;;  %v9132_v19 = vld [vmem:[#allocation7 + $0x52c] ss:$132 sps:$4 sm:$0xff]   ;;  %v9136_v21 = vld [vmem:[#allocation7 + $0x634] ss:$132 sps:$4 sm:$0xff]   ;;  %vm493_vm9 = vcmp.gt.s32.totalorder %v10114_v24, %v10138_v45  ;;  %s485_s22 = scalar_lea.vmem %s10820_s10, %s10100_s15 }
  0xaa   : > { %8448 = vmatprep.subr.bf16.mxu0 %v9854_v1  ;;  %782 = vmatprep.subr.bf16.mxu1 %v9116_v8  ;;  %v9130_v18 = vld [vmem:[#allocation7 + $0x420] ss:$132 sps:$4 sm:$0xff]   ;;  %v9134_v20 = vld [vmem:[#allocation7 + $0x528] ss:$132 sps:$4 sm:$0xff]   ;;  %v9138_v22 = vld [vmem:[#allocation7 + $0x630] ss:$132 sps:$4 sm:$0xff]  }
  0xab   : > { %v9115_v26 = vld [vmem:[#allocation7 + $0x8] ss:$132 sps:$4 sm:$0xff]   ;;  %v9119_v29 = vld [vmem:[#allocation7 + $0x110] ss:$132 sps:$4 sm:$0xff]   ;;  %v9123_v30 = vld [vmem:[#allocation7 + $0x218] ss:$132 sps:$4 sm:$0xff]  }
  0xac   : > { %783 = vmatpush1.bf16.msra.mxu1 %v9118_v9  ;;  %v9127_v31 = vld [vmem:[#allocation7 + $0x320] ss:$132 sps:$4 sm:$0xff]   ;;  %v9131_v32 = vld [vmem:[#allocation7 + $0x428] ss:$132 sps:$4 sm:$0xff]   ;;  %v9135_v33 = vld [vmem:[#allocation7 + $0x530] ss:$132 sps:$4 sm:$0xff]  }
  0xad   : > { %8449 = vmatpush3.bf16.msra.mxu0 %v9108_v5  ;;  %784 = vmatprep.subr.bf16.mxu1 %v9120_v11  ;;  %v9139_v34 = vld [vmem:[#allocation7 + $0x638] ss:$132 sps:$4 sm:$0xff]   ;;  %v9143_v37 = vld [vmem:[#allocation7 + $0x740] ss:$132 sps:$4 sm:$0xff]   ;;  %v10141_v46 = vsub.s32 0, %v10138_v45  ;;  %v10144_v47 = vsub.s32 1, %v10138_v45 }
  0xae   : > { %8450 = vmatprep.subr.bf16.mxu0 %v9854_v1  ;;  %v9140_v35 = vld [vmem:[#allocation7 + $0x73c] ss:$132 sps:$4 sm:$0xff]   ;;  %s9857_s18 = smov 64   ;;  %s9858_s12 = smov 32   ;;  %v10160_v5 = vsub.s32 2, %v10138_v45  ;;  %vm1146_vm4 = vcmask 1043456  }
  0xaf   : > { %v9142_v36 = vld [vmem:[#allocation7 + $0x738] ss:$132 sps:$4 sm:$0xff]   ;;  %v521_v38 = vld [vmem:[#allocation6] sm:$0xff]  ;;  %vm1090_vm5 = vcmask 64512   ;;  %vm1341_vm6 = vcmask 523264   ;;  %vm3146_vm8 = vcmask 654336  }
  0xb0   : > { %785 = vmatpush1.bf16.msra.mxu1 %v9122_v13  ;;  %v635_v48 = vld [vmem:[#allocation10] sm:$0x7] }
  0xb1   : > { %8451 = vmatpush3.bf16.msra.mxu0 %v9109_v10  ;;  %786 = vmatprep.subr.bf16.mxu1 %v9124_v14  ;;  %v640_v49 = vrot.slane %v635_v48, %v10141_v46  ;;  %v644_v50 = vrot.slane %v635_v48, %v10144_v47  ;;  %v648_v10 = vrot.slane %v635_v48, %v10160_v5 }
  0xb2   : > { %8452 = vmatprep.subr.bf16.mxu0 %v9854_v1 }
  0xb4   : > { %787 = vmatpush1.bf16.msra.mxu1 %v9126_v15 }
  0xb5   : > { %8453 = vmatpush3.bf16.msra.mxu0 %v9110_v12  ;;  %788 = vmatprep.subr.bf16.mxu1 %v9128_v17 }
  0xb6   : > { %8454 = vmatprep.subr.bf16.mxu0 %v9854_v1 }
  0xb8   : > { %789 = vmatpush1.bf16.msra.mxu1 %v9130_v18 }
  0xb9   : > { %8455 = vmatpush3.bf16.msra.mxu0 %v9111_v16  ;;  %790 = vmatprep.subr.bf16.mxu1 %v9132_v19 }
  0xba   : > { %8460 = vmatprep.subr.bf16.mxu0 %v9854_v1 }
  0xbc   : > { %791 = vmatpush1.bf16.msra.mxu1 %v9134_v20 }
  0xbd   : > { %792 = vmatprep.subr.bf16.mxu1 %v9136_v21 }
  0xc0   : > { %793 = vmatpush1.bf16.msra.mxu1 %v9138_v22  ;;  %v10191_v22 = vld [vmem:[%s10188_s24] ss:$0 sm:$0xff] }
  0xc1   : > { %794 = vmatprep.subr.bf16.mxu1 %v9140_v35 }
  0xc4   : > { %795 = vmatpush1.bf16.msra.mxu1 %v9142_v36 }
  0xc5   : > { %8480 = vmatprep.subr.bf16.mxu1 %v9854_v1 }
 0x128   : > { %v505_v25 = vpop.permute.xlu0 %504 }
 0x129   : > { %vm506_vm1 = vcmp.eq.s32.totalorder %v10114_v24, %v505_v25 }
 0x12a   : > { %v507_v27 = vsel %vm506_vm1, 1.0, %v9854_v1 }
 0x12b   : > { %v508_v28 = vpack.c.bf16 %v507_v27, %v507_v27 }
 0x12d   : > { %8457 = vmatmul.mubr.msk.bf16.vlgmr.msra.gmra.mrb[0].mxu0 %vm558_vm2, %v508_v28 }
 0x12e   : > { %8461 = vmatpush3.bf16.msra.mxu0 %v9115_v26  ;;  %8476 = vmatprep.mubr.msk.bf16.mxu0 %vm9855_vm0, %v9854_v1 }
 0x12f   : > { %8462 = vmatprep.subr.bf16.mxu0 %v9854_v1 }
 0x132   : > { %8463 = vmatpush3.bf16.msra.mxu0 %v9119_v29 }
 0x133   : > { %8464 = vmatprep.subr.bf16.mxu0 %v9854_v1 }
 0x136   : > { %8465 = vmatpush3.bf16.msra.mxu0 %v9123_v30 }
 0x137   : > { %8466 = vmatprep.subr.bf16.mxu0 %v9854_v1 }
 0x13a   : > { %8467 = vmatpush3.bf16.msra.mxu0 %v9127_v31 }
 0x13b   : > { %8468 = vmatprep.subr.bf16.mxu0 %v9854_v1 }
 0x13e   : > { %8469 = vmatpush3.bf16.msra.mxu0 %v9131_v32 }
 0x13f   : > { %8470 = vmatprep.subr.bf16.mxu0 %v9854_v1 }
 0x142   : > { %8471 = vmatpush3.bf16.msra.mxu0 %v9135_v33 }
 0x143   : > { %8472 = vmatprep.subr.bf16.mxu0 %v9854_v1 }
 0x146   : > { %8473 = vmatpush3.bf16.msra.mxu0 %v9139_v34 }
 0x147   : > { %8474 = vmatprep.subr.bf16.mxu0 %v9854_v1 }
 0x14a   : > { %8475 = vmatpush3.bf16.msra.mxu0 %v9143_v37 }
 0x14b   : > { %8498 = vmatprep.subr.bf16.mxu0 %v9854_v1 }
 0x200   : > { %v596_v39 = vpop.f32.mrb[0].mxu0 }
 0x201   : > { %v10130_v40 = vadd.f32 %v596_v39, %v521_v38  ;;  %v8458_v41 = vpop.f32.mrb[1].mxu0 }
 0x202   : > { %v599_v42 = vpop.f32.mrb[2].mxu0 }
 0x203   : > { %v634_v43 = vpack.c.bf16 %v10130_v40, %v10130_v40  ;;  %v8459_v44 = vpop.f32.mrb[3].mxu0 }
 0x205   : > { %813 = vmatmul.mubr.bf16.vlgmr.msra.gmra.mrb[0].mxu1 %v634_v43  ;;  %8477 = vmatmul.mubr.bf16.vlgmr.msra.gmra.mrb[4].mxu0 %v634_v43 }
 0x206   : > { %8482 = vmatprep.mubr.msk.bf16.mxu1 %vm9855_vm0, %v9854_v1  ;;  %8500 = vmatprep.mubr.msk.bf16.mxu0 %vm9855_vm0, %v9854_v1 }
 0x2d8   : > { %v814_v51 = vpop.f32.mrb[0].mxu1  ;;  %v855_v52 = vpop.f32.mrb[4].mxu0 }
 0x2d9   : > { %v815_v53 = vadd.f32 %v814_v51, %v640_v49  ;;  %v816_v54 = vpop.f32.mrb[1].mxu1  ;;  %v8478_v55 = vpop.f32.mrb[5].mxu0  ;;  %v10167_v15 = vadd.f32 %v855_v52, %v648_v10 }
 0x2da   : > { %v817_v56 = vadd.f32 %v816_v54, %v644_v50  ;;  %v818_v57 = vpop.f32.mrb[2].mxu1  ;;  %v858_v58 = vpop.f32.mrb[6].mxu0 }
 0x2db   : > { %v819_v59 = vpop.f32.mrb[3].mxu1  ;;  %862 = vrot.lane.b32.xlu1 %v815_v53, %s9856_s11  ;;  %v8479_v60 = vpop.f32.mrb[7].mxu0  ;;  %v891_v63 = vpack.c.bf16 %v815_v53, %v815_v53  ;;  %v1139_v19 = vpack.c.bf16 %v10167_v15, %v10167_v15 }
 0x2dc   : > { %872 = vrot.lane.b32.xlu0 %v817_v56, %s9856_s11  ;;  %v895_v61 = vpack.c.bf16 %v817_v56, %v817_v56 }
 0x2dd   : > { %v1148_v21 = vsel %vm1146_vm4, %v1139_v19, 0 }
 0x2de   : > { %v910_v62 = vsel %vm905_vm3, %v895_v61, 0 }
 0x2df   : > { %8481 = vmatpush3.bf16.xpose.msra.mxu1 %v910_v62  ;;  %875 = vrot.lane.b32.xlu1 %v817_v56, %s9857_s18 }
 0x2e0   : > { %878 = vrot.lane.b32.xlu0 %v817_v56, %s9858_s12  ;;  %8486 = vmatprep.subr.bf16.mxu1 %v9854_v1 }
 0x2e3   : > { %865 = vrot.lane.b32.xlu1 %v815_v53, %s9857_s18 }
 0x2e4   : > { %868 = vrot.lane.b32.xlu0 %v815_v53, %s9858_s12 }
 0x2e6   : > { %8483 = vmatmul.mubr.msk.bf16.vlgmr.msra.gmra.mrb[4].mxu1 %vm905_vm3, %v891_v63 }
 0x2e7   : > { %8488 = vmatprep.mubr.msk.bf16.mxu1 %vm9855_vm0, %v9854_v1 }
 0x34d   : > { %v863_v2 = vpop.permute.xlu1 %862 }
 0x34e   : > { %v873_v3 = vpop.permute.xlu0 %872  ;;  %v892_v13 = vpack.c.bf16 %v863_v2, %v863_v2 }
 0x34f   : > { %v896_v4 = vpack.c.bf16 %v873_v3, %v873_v3 }
 0x351   : > { %v956_v6 = vsel %vm905_vm3, %v896_v4, 0  ;;  %v876_v7 = vpop.permute.xlu1 %875 }
 0x352   : > { %v879_v8 = vpop.permute.xlu0 %878  ;;  %8487 = vmatpush3.bf16.xpose.msra.mxu1 %v956_v6  ;;  %v897_v11 = vpack.c.bf16 %v876_v7, %v876_v7 }
 0x353   : > { %v898_v9 = vpack.c.bf16 %v879_v8, %v879_v8  ;;  %8492 = vmatprep.subr.bf16.mxu1 %v9854_v1 }
 0x354   : > { %v1002_v16 = vsel %vm905_vm3, %v897_v11, 0 }
 0x355   : > { %v1048_v12 = vsel %vm905_vm3, %v898_v9, 0  ;;  %v866_v18 = vpop.permute.xlu1 %865 }
 0x356   : > { %8499 = vmatpush3.bf16.xpose.msra.mxu0 %v1048_v12  ;;  %v869_v14 = vpop.permute.xlu0 %868  ;;  %v893_v20 = vpack.c.bf16 %v866_v18, %v866_v18 }
 0x357   : > { %8510 = vmatprep.subr.bf16.mxu0 %v9854_v1  ;;  %v894_v17 = vpack.c.bf16 %v869_v14, %v869_v14 }
 0x359   : > { %8489 = vmatmul.mubr.msk.bf16.vlgmr.msra.gmra.mrb[8].mxu1 %vm905_vm3, %v892_v13 }
 0x35a   : > { %8493 = vmatpush3.bf16.xpose.msra.mxu1 %v1002_v16  ;;  %8494 = vmatprep.mubr.msk.bf16.mxu1 %vm9855_vm0, %v9854_v1 }
 0x35b   : > { %8504 = vmatprep.subr.bf16.mxu1 %v9854_v1 }
 0x35d   : > { %8501 = vmatmul.mubr.msk.bf16.vlgmr.msra.gmra.mrb[8].mxu0 %vm905_vm3, %v894_v17 }
 0x35e   : > { %8512 = vmatprep.mubr.msk.bf16.mxu0 %vm9855_vm0, %v9854_v1 }
 0x361   : > { %8495 = vmatmul.mubr.msk.bf16.vlgmr.msra.gmra.mrb[12].mxu1 %vm905_vm3, %v893_v20 }
 0x362   : > { %8505 = vmatpush3.bf16.msra.mxu1 %v1148_v21  ;;  %8506 = vmatprep.mubr.msk.bf16.mxu1 %vm9855_vm0, %v9854_v1 }
 0x363   : > { %8516 = vmatprep.subr.bf16.mxu1 %v9854_v1 }
 0x3b9   : > { %v946_v23 = vpop.f32.mrb[4].mxu1 }
 0x3ba   : > { %v947_v25 = vadd.f32 %v10191_v22, %v946_v23  ;;  %v8484_v26 = vpop.f32.mrb[5].mxu1 }
 0x3bb   : > { %v949_v27 = vpop.f32.mrb[6].mxu1 }
 0x3bc   : > { %v8485_v28 = vpop.f32.mrb[7].mxu1  ;;  %v1091_v29 = vsel %vm1090_vm5, %v947_v25, -inf }
 0x3bd   : > { %1092 = vmax.xlane.f32.xlu1 %v1091_v29 }
 0x42c   : > { %v992_v30 = vpop.f32.mrb[8].mxu1 }
 0x42d   : > { %v993_v31 = vadd.f32 %v10191_v22, %v992_v30  ;;  %v8490_v32 = vpop.f32.mrb[9].mxu1 }
 0x42e   : > { %v995_v33 = vpop.f32.mrb[10].mxu1 }
 0x42f   : > { %v8491_v34 = vpop.f32.mrb[11].mxu1  ;;  %v1094_v35 = vsel %vm1090_vm5, %v993_v31, -inf }
 0x430   : > { %v1084_v36 = vpop.f32.mrb[8].mxu0  ;;  %1095 = vmax.xlane.f32.xlu0 %v1094_v35 }
 0x431   : > { %v1085_v37 = vadd.f32 %v10191_v22, %v1084_v36  ;;  %v8502_v38 = vpop.f32.mrb[9].mxu0 }
 0x432   : > { %v1087_v39 = vpop.f32.mrb[10].mxu0 }
 0x433   : > { %v8503_v41 = vpop.f32.mrb[11].mxu0  ;;  %v1100_v42 = vsel %vm1090_vm5, %v1085_v37, -inf }
 0x434   : > { %v1038_v43 = vpop.f32.mrb[12].mxu1  ;;  %1101 = vmax.xlane.f32.xlu1 %v1100_v42  ;;  %v9144_v41 = vld [vmem:[#allocation7 + $0xc] ss:$132 sps:$4 sm:$0xff]  }
 0x435   : > { %v1039_v44 = vadd.f32 %v10191_v22, %v1038_v43  ;;  %v8496_v48 = vpop.f32.mrb[13].mxu1 }
 0x436   : > { %v1041_v49 = vpop.f32.mrb[14].mxu1  ;;  %v9146_v48 = vld [vmem:[#allocation7 + $0x21c] ss:$132 sps:$4 sm:$0xff]  }
 0x437   : > { %v8497_v50 = vpop.f32.mrb[15].mxu1  ;;  %v1097_v51 = vsel %vm1090_vm5, %v1039_v44, -inf  ;;  %v9147_v49 = vld [vmem:[#allocation7 + $0x324] ss:$132 sps:$4 sm:$0xff]  }
 0x438   : > { %1098 = vmax.xlane.f32.xlu0 %v1097_v51  ;;  %v9148_v50 = vld [vmem:[#allocation7 + $0x42c] ss:$132 sps:$4 sm:$0xff]   ;;  %v9149_v51 = vld [vmem:[#allocation7 + $0x534] ss:$132 sps:$4 sm:$0xff]  }
 0x44a   : > { %v1093_v52 = vpop.xlane.xlu1 %1092 }
 0x44b   : > { %v1103_v53 = vsub.f32 %v947_v25, %v1093_v52  ;;  %v9150_v52 = vld [vmem:[#allocation7 + $0x63c] ss:$132 sps:$4 sm:$0xff]  }
 0x44d   : > { %v1107_v54 = vmul.f32 1.442695, %v1103_v53  ;;  %v9151_v53 = vld [vmem:[#allocation7 + $0x744] ss:$132 sps:$4 sm:$0xff]  }
 0x44f   : > { %9525 = vpow2.f32 %v1107_v54 }
 0x459   : > { %v9526_v55 = vpop.eup %9525 }
 0x45a   : > { %v1115_v56 = vsel %vm1090_vm5, %v9526_v55, 0.0 }
 0x45b   : > { %1116 = vadd.xlane.f32.xlu0 %v1115_v56 }
 0x4bd   : > { %v1096_v57 = vpop.xlane.xlu0 %1095 }
 0x4be   : > { %v1104_v58 = vsub.f32 %v993_v31, %v1096_v57 }
 0x4c0   : > { %v1109_v59 = vmul.f32 1.442695, %v1104_v58 }
 0x4c1   : > { %v1102_v60 = vpop.xlane.xlu1 %1101 }
 0x4c2   : > { %9527 = vpow2.f32 %v1109_v59  ;;  %v1106_v61 = vsub.f32 %v1085_v37, %v1102_v60 }
 0x4c4   : > { %v1113_v62 = vmul.f32 1.442695, %v1106_v61 }
 0x4c5   : > { %v1099_v63 = vpop.xlane.xlu0 %1098 }
 0x4c6   : > { %9529 = vpow2.f32 %v1113_v62  ;;  %v1105_v2 = vsub.f32 %v1039_v44, %v1099_v63  ;;  %v9145_v44 = vld [vmem:[#allocation7 + $0x114] ss:$132 sps:$4 sm:$0xff]  }
 0x4c8   : > { %v1111_v3 = vmul.f32 1.442695, %v1105_v2 }
 0x4ca   : > { %9531 = vpow2.f32 %v1111_v3 }
 0x4cc   : > { %v9528_v4 = vpop.eup %9527 }
 0x4cd   : > { %v1118_v6 = vsel %vm1090_vm5, %v9528_v4, 0.0 }
 0x4ce   : > { %1119 = vadd.xlane.f32.xlu1 %v1118_v6 }
 0x4d0   : > { %v9530_v7 = vpop.eup %9529 }
 0x4d1   : > { %v1124_v8 = vsel %vm1090_vm5, %v9530_v7, 0.0 }
 0x4d2   : > { %1125 = vadd.xlane.f32.xlu1 %v1124_v8 }
 0x4d4   : > { %v9532_v9 = vpop.eup %9531 }
 0x4d5   : > { %v1121_v10 = vsel %vm1090_vm5, %v9532_v9, 0.0 }
 0x4d6   : > { %1122 = vadd.xlane.f32.xlu0 %v1121_v10 }
 0x4e3   : > { %885 = vrot.lane.b32.xlu1 %v10167_v15, %s9857_s18 }
 0x4e7   : > { %888 = vrot.lane.b32.xlu1 %v10167_v15, %s9858_s12 }
 0x4e8   : > { %v1117_v11 = vpop.xlane.xlu0 %1116 }
 0x4e9   : > { %9533 = vrcp.f32 %v1117_v11 }
 0x4ec   : > { %882 = vrot.lane.b32.xlu0 %v10167_v15, %s9856_s11 }
 0x4f3   : > { %v9534_v12 = vpop.eup %9533 }
 0x4f4   : > { %v1128_v13 = vmul.f32 %v9534_v12, %v9526_v55  ;;  %v7741_v12 = vld [vmem:[#allocation10 + $0x3] ss:$0 sm:$0xff] }
 0x4f6   : > { %v1135_v14 = vpack.c.bf16 %v1128_v13, %v1128_v13 }
 0x4f8   : > { %8507 = vmatmul.mubr.msk.bf16.vlgmr.msra.gmra.mrb[16].mxu1 %vm1090_vm5, %v1135_v14 }
 0x4f9   : > { %8518 = vmatprep.mubr.msk.bf16.mxu1 %vm9855_vm0, %v9854_v1 }
 0x55b   : > { %v1120_v16 = vpop.xlane.xlu1 %1119 }
 0x55c   : > { %9535 = vrcp.f32 %v1120_v16 }
 0x55f   : > { %v1126_v17 = vpop.xlane.xlu1 %1125 }
 0x560   : > { %9537 = vrcp.f32 %v1126_v17 }
 0x563   : > { %v1123_v18 = vpop.xlane.xlu0 %1122  ;;  %v886_v19 = vpop.permute.xlu1 %885 }
 0x564   : > { %9539 = vrcp.f32 %v1123_v18  ;;  %v1141_v20 = vpack.c.bf16 %v886_v19, %v886_v19 }
 0x566   : > { %v9536_v21 = vpop.eup %9535  ;;  %v1240_v23 = vsel %vm1146_vm4, %v1141_v20, 0  ;;  %v9152_v20 = vld [vmem:[#allocation7 + $0x10] ss:$132 sps:$4 sm:$0xff]  }
 0x567   : > { %v883_v15 = vpop.permute.xlu0 %882  ;;  %8517 = vmatpush3.bf16.msra.mxu1 %v1240_v23  ;;  %v889_v25 = vpop.permute.xlu1 %888  ;;  %v1130_v27 = vmul.f32 %v9536_v21, %v9528_v4  ;;  %v9154_v21 = vld [vmem:[#allocation7 + $0x14] ss:$132 sps:$4 sm:$0xff]   ;;  %v9157_v23 = vld [vmem:[#allocation7 + $0x11c] ss:$132 sps:$4 sm:$0xff]  }
 0x568   : > { %v1140_v26 = vpack.c.bf16 %v883_v15, %v883_v15  ;;  %8528 = vmatprep.subr.bf16.mxu1 %v9854_v1  ;;  %v1142_v28 = vpack.c.bf16 %v889_v25, %v889_v25  ;;  %v9155_v15 = vld [vmem:[#allocation7 + $0x118] ss:$132 sps:$4 sm:$0xff]   ;;  %v9160_v25 = vld [vmem:[#allocation7 + $0x224] ss:$132 sps:$4 sm:$0xff]  }
 0x569   : > { %v1136_v30 = vpack.c.bf16 %v1130_v27, %v1130_v27 }
 0x56a   : > { %v1194_v29 = vsel %vm1146_vm4, %v1140_v26, 0  ;;  %v9538_v31 = vpop.eup %9537  ;;  %v1286_v33 = vsel %vm1146_vm4, %v1142_v28, 0  ;;  %v9158_v26 = vld [vmem:[#allocation7 + $0x220] ss:$132 sps:$4 sm:$0xff]  }
 0x56b   : > { %8511 = vmatpush3.bf16.msra.mxu0 %v1194_v29  ;;  %v1134_v35 = vmul.f32 %v9538_v31, %v9530_v7  ;;  %v9163_v31 = vld [vmem:[#allocation7 + $0x32c] ss:$132 sps:$4 sm:$0xff]  }
 0x56c   : > { %8522 = vmatprep.subr.bf16.mxu0 %v9854_v1 }
 0x56d   : > { %v1138_v37 = vpack.c.bf16 %v1134_v35, %v1134_v35  ;;  %v9167_v35 = vld [vmem:[#allocation7 + $0x538] ss:$132 sps:$4 sm:$0xff]  }
 0x56e   : > { %v9540_v32 = vpop.eup %9539  ;;  %8513 = vmatmul.mubr.msk.bf16.vlgmr.msra.gmra.mrb[12].mxu0 %vm1090_vm5, %v1136_v30 }
 0x56f   : > { %8523 = vmatpush3.bf16.msra.mxu0 %v1286_v33  ;;  %v1132_v34 = vmul.f32 %v9540_v32, %v9532_v9  ;;  %8524 = vmatprep.mubr.msk.bf16.mxu0 %vm9855_vm0, %v9854_v1  ;;  %v9164_v32 = vld [vmem:[#allocation7 + $0x430] ss:$132 sps:$4 sm:$0xff]  }
 0x570   : > { %1594 = vmatprep.subr.bf16.mxu0 %v9154_v21  ;;  %v9166_v33 = vld [vmem:[#allocation7 + $0x434] ss:$132 sps:$4 sm:$0xff]  }
 0x571   : > { %v1137_v36 = vpack.c.bf16 %v1132_v34, %v1132_v34  ;;  %v9169_v34 = vld [vmem:[#allocation7 + $0x53c] ss:$132 sps:$4 sm:$0xff]  }
 0x573   : > { %8519 = vmatmul.mubr.msk.bf16.vlgmr.msra.gmra.mrb[20].mxu1 %vm1090_vm5, %v1137_v36  ;;  %v9172_v36 = vld [vmem:[#allocation7 + $0x644] ss:$132 sps:$4 sm:$0xff]  }
 0x574   : > { %8544 = vmatprep.mubr.msk.bf16.mxu1 %vm9855_vm0, %v9854_v1  ;;  %8529 = vmatpush3.bf16.msra.mxu1 %v9144_v41  ;;  %v9176_v41 = vld [vmem:[#allocation9 + $0x100] ss:$16 sps:$4 sm:$0xff]  }
 0x575   : > { %8530 = vmatprep.subr.bf16.mxu1 %v9854_v1 }
 0x576   : > { %8525 = vmatmul.mubr.msk.bf16.vlgmr.msra.gmra.mrb[16].mxu0 %vm1090_vm5, %v1138_v37  ;;  %v9170_v37 = vld [vmem:[#allocation7 + $0x640] ss:$132 sps:$4 sm:$0xff]  }
 0x577   : > { %1626 = vmatprep.mubr.bf16.mxu0 %v9853_v0  ;;  %1595 = vmatpush1.bf16.msra.mxu0 %v9152_v20 }
 0x578   : > { %8531 = vmatpush3.bf16.msra.mxu1 %v9145_v44  ;;  %1596 = vmatprep.subr.bf16.mxu0 %v9157_v23  ;;  %v9179_v44 = vld [vmem:[#allocation9 + $0x20] ss:$16 sps:$4 sm:$0xff]  }
 0x579   : > { %8532 = vmatprep.subr.bf16.mxu1 %v9854_v1 }
 0x57b   : > { %1597 = vmatpush1.bf16.msra.mxu0 %v9155_v15 }
 0x57c   : > { %8533 = vmatpush3.bf16.msra.mxu1 %v9146_v48  ;;  %1598 = vmatprep.subr.bf16.mxu0 %v9160_v25  ;;  %v9180_v48 = vld [vmem:[#allocation9 + $0x140] ss:$16 sps:$4 sm:$0xff]   ;;  %v7768_v25 = vld [vmem:[#allocation10 + $0x6] ss:$0 sm:$0xff] }
 0x57d   : > { %8534 = vmatprep.subr.bf16.mxu1 %v9854_v1 }
 0x57f   : > { %1599 = vmatpush1.bf16.msra.mxu0 %v9158_v26 }
 0x580   : > { %8535 = vmatpush3.bf16.msra.mxu1 %v9147_v49  ;;  %1600 = vmatprep.subr.bf16.mxu0 %v9163_v31  ;;  %v9181_v49 = vld [vmem:[#allocation9 + $0x40] ss:$16 sps:$4 sm:$0xff]  }
 0x581   : > { %8536 = vmatprep.subr.bf16.mxu1 %v9854_v1 }
 0x584   : > { %8537 = vmatpush3.bf16.msra.mxu1 %v9148_v50  ;;  %v9182_v50 = vld [vmem:[#allocation9 + $0x160] ss:$16 sps:$4 sm:$0xff]  }
 0x585   : > { %8538 = vmatprep.subr.bf16.mxu1 %v9854_v1 }
 0x588   : > { %8539 = vmatpush3.bf16.msra.mxu1 %v9149_v51  ;;  %v9183_v51 = vld [vmem:[#allocation9 + $0x60] ss:$16 sps:$4 sm:$0xff]  }
 0x589   : > { %8540 = vmatprep.subr.bf16.mxu1 %v9854_v1 }
 0x58c   : > { %8541 = vmatpush3.bf16.msra.mxu1 %v9150_v52  ;;  %v9184_v52 = vld [vmem:[#allocation9 + $0x180] ss:$16 sps:$4 sm:$0xff]  }
 0x58d   : > { %8542 = vmatprep.subr.bf16.mxu1 %v9854_v1 }
 0x590   : > { %8543 = vmatpush3.bf16.msra.mxu1 %v9151_v53  ;;  %v9185_v53 = vld [vmem:[#allocation9 + $0x80] ss:$16 sps:$4 sm:$0xff]  }
 0x591   : > { %8171 = vmatprep.subr.bf16.mxu1 %v9176_v41 }
 0x5cb   : > { %v1184_v38 = vpop.f32.mrb[16].mxu1 }
 0x5cc   : > { %v8508_v39 = vpop.f32.mrb[17].mxu1 }
 0x5cd   : > { %v1187_v42 = vpop.f32.mrb[18].mxu1  ;;  %v9173_v39 = vld [vmem:[#allocation7 + $0x748] ss:$132 sps:$4 sm:$0xff]  }
 0x5ce   : > { %v8509_v43 = vpop.f32.mrb[19].mxu1  ;;  %v9177_v42 = vld [vmem:[#allocation9] ss:$16 sps:$4 sm:$0xff]  }
 0x5cf   : > { %v9178_v43 = vld [vmem:[#allocation9 + $0x120] ss:$16 sps:$4 sm:$0xff]  }
 0x641   : > { %v1230_v54 = vpop.f32.mrb[12].mxu0 }
 0x642   : > { %1329 = vrot.lane.b32.xlu0 %v1230_v54, %s9858_s12  ;;  %v8514_v55 = vpop.f32.mrb[13].mxu0  ;;  %v9186_v54 = vld [vmem:[#allocation9 + $0x1a0] ss:$16 sps:$4 sm:$0xff]  }
 0x643   : > { %v1233_v56 = vpop.f32.mrb[14].mxu0  ;;  %v9187_v55 = vld [vmem:[#allocation9 + $0xa0] ss:$16 sps:$4 sm:$0xff]  }
 0x644   : > { %v8515_v57 = vpop.f32.mrb[15].mxu0 }
 0x646   : > { %v1276_v58 = vpop.f32.mrb[20].mxu1 }
 0x647   : > { %1333 = vrot.lane.b32.xlu1 %v1276_v58, %s9857_s18  ;;  %v8520_v59 = vpop.f32.mrb[21].mxu1 }
 0x648   : > { %v1279_v60 = vpop.f32.mrb[22].mxu1 }
 0x649   : > { %v8521_v61 = vpop.f32.mrb[23].mxu1  ;;  %v1322_v62 = vpop.f32.mrb[16].mxu0  ;;  %v7750_v60 = vld [vmem:[#allocation10 + $0x7] ss:$0 sm:$0xff] }
 0x64a   : > { %1337 = vrot.lane.b32.xlu0 %v1322_v62, %s9856_s11  ;;  %v8526_v63 = vpop.f32.mrb[17].mxu0  ;;  %v7751_v62 = vld [vmem:[#allocation10 + $0x8] ss:$0 sm:$0xff] }
 0x64b   : > { %v1325_v2 = vpop.f32.mrb[18].mxu0 }
 0x64c   : > { %v8527_v3 = vpop.f32.mrb[19].mxu0 }
 0x6b4   : > { %v1330_v4 = vpop.permute.xlu0 %1329 }
 0x6b5   : > { %v1340_v7 = vsel %vm905_vm3, %v1184_v38, %v1330_v4  ;;  %v9175_v38 = vld [vmem:[#allocation7 + $0x74c] ss:$132 sps:$4 sm:$0xff]  }
 0x6b6   : > { %v9188_v4 = vld [vmem:[#allocation9 + $0x1c0] ss:$16 sps:$4 sm:$0xff]  }
 0x6b9   : > { %v1334_v6 = vpop.permute.xlu1 %1333 }
 0x6ba   : > { %v1342_v8 = vsel %vm1341_vm6, %v1340_v7, %v1334_v6  ;;  %v9189_v6 = vld [vmem:[#allocation9 + $0xc0] ss:$16 sps:$4 sm:$0xff]  }
 0x6bb   : > { %v9190_v7 = vld [vmem:[#allocation9 + $0x1e0] ss:$16 sps:$4 sm:$0xff]  }
 0x6bc   : > { %v1338_v9 = vpop.permute.xlu0 %1337 }
 0x6bd   : > { %v1343_v10 = vsel %vm558_vm2, %v1342_v8, %v1338_v9  ;;  %v9191_v8 = vld [vmem:[#allocation9 + $0xe0] ss:$16 sps:$4 sm:$0xff]   ;;  %v1502_v9 = vld [vmem:[#allocation10 + $0x4] sm:$0x3] }
 0x6be   : > { %v1360_v11 = vpack.c.bf16 %v1343_v10, %v1343_v10  ;;  %v1507_v10 = vrot.slane %v1502_v9, %v10141_v46 }
 0x6c0   : > { %8545 = vmatmul.mubr.bf16.vlgmr.msra.gmra.mrb[24].mxu1 %v1360_v11  ;;  %v1511_v11 = vrot.slane %v1502_v9, %v10144_v47 }
 0x6c1   : > { %8172 = vmatpush3.bf16.msra.mxu1 %v9177_v42 }
 0x6c2   : > { %8173 = vmatprep.subr.bf16.mxu1 %v9178_v43 }
 0x6c5   : > { %8174 = vmatpush3.bf16.msra.mxu1 %v9179_v44  ;;  %v9203_v44 = vld [vmem:[#allocation7 + $0x230] ss:$132 sps:$4 sm:$0xff]  }
 0x6c6   : > { %8175 = vmatprep.subr.bf16.mxu1 %v9180_v48  ;;  %v9206_v48 = vld [vmem:[#allocation7 + $0x334] ss:$132 sps:$4 sm:$0xff]  }
 0x6c9   : > { %8176 = vmatpush3.bf16.msra.mxu1 %v9181_v49  ;;  %v9204_v49 = vld [vmem:[#allocation7 + $0x330] ss:$132 sps:$4 sm:$0xff]  }
 0x6ca   : > { %8177 = vmatprep.subr.bf16.mxu1 %v9182_v50  ;;  %v9207_v50 = vld [vmem:[#allocation7 + $0x338] ss:$132 sps:$4 sm:$0xff]  }
 0x6cd   : > { %8178 = vmatpush3.bf16.msra.mxu1 %v9183_v51  ;;  %v9208_v51 = vld [vmem:[#allocation7 + $0x438] ss:$132 sps:$4 sm:$0xff]  }
 0x6ce   : > { %8179 = vmatprep.subr.bf16.mxu1 %v9184_v52  ;;  %v9210_v52 = vld [vmem:[#allocation7 + $0x43c] ss:$132 sps:$4 sm:$0xff]  }
 0x6d1   : > { %8180 = vmatpush3.bf16.msra.mxu1 %v9185_v53  ;;  %v9211_v53 = vld [vmem:[#allocation7 + $0x440] ss:$132 sps:$4 sm:$0xff]  }
 0x6d2   : > { %8181 = vmatprep.subr.bf16.mxu1 %v9186_v54  ;;  %v9214_v54 = vld [vmem:[#allocation7 + $0x544] ss:$132 sps:$4 sm:$0xff]  }
 0x6d5   : > { %8182 = vmatpush3.bf16.msra.mxu1 %v9187_v55  ;;  %v9212_v55 = vld [vmem:[#allocation7 + $0x540] ss:$132 sps:$4 sm:$0xff]  }
 0x6d6   : > { %8183 = vmatprep.subr.bf16.mxu1 %v9188_v4 }
 0x6d9   : > { %8184 = vmatpush3.bf16.msra.mxu1 %v9189_v6  ;;  %v7785_v6 = vld [vmem:[#allocation10 + $0x9] ss:$0 sm:$0xff] }
 0x6da   : > { %8185 = vmatprep.subr.bf16.mxu1 %v9190_v7 }
 0x6dd   : > { %8186 = vmatpush3.bf16.msra.mxu1 %v9191_v8  ;;  %v7786_v8 = vld [vmem:[#allocation10 + $0xa] ss:$0 sm:$0xff] }
 0x6de   : > { %8548 = vmatprep.subr.bf16.mxu1 %v9854_v1 }
 0x793   : > { %v1450_v13 = vpop.f32.mrb[24].mxu1 }
 0x794   : > { %v1451_v14 = vadd.f32 %v7741_v12, %v1450_v13  ;;  %v8546_v16 = vpop.f32.mrb[25].mxu1 }
 0x795   : > { %v1453_v17 = vpop.f32.mrb[26].mxu1 }
 0x796   : > { %v8547_v18 = vpop.f32.mrb[27].mxu1  ;;  %v1456_v19 = vadd.f32 %v1451_v14, %v10130_v40  ;;  %v9161_v40 = vld [vmem:[#allocation7 + $0x328] ss:$132 sps:$4 sm:$0xff]  }
 0x797   : > { %1601 = vmatpush1.bf16.msra.mxu0 %v9161_v40  ;;  %v9192_v40 = vld [vmem:[#allocation7 + $0x18] ss:$132 sps:$4 sm:$0xff]  }
 0x798   : > { %1459 = vadd.xlane.f32.xlu1 %v1456_v19  ;;  %1602 = vmatprep.subr.bf16.mxu0 %v9166_v33  ;;  %v9195_v33 = vld [vmem:[#allocation7 + $0x20] ss:$132 sps:$4 sm:$0xff]  }
 0x79b   : > { %1603 = vmatpush1.bf16.msra.mxu0 %v9164_v32  ;;  %v9194_v32 = vld [vmem:[#allocation7 + $0x1c] ss:$132 sps:$4 sm:$0xff]  }
 0x79c   : > { %1604 = vmatprep.subr.bf16.mxu0 %v9169_v34  ;;  %v9198_v34 = vld [vmem:[#allocation7 + $0x124] ss:$132 sps:$4 sm:$0xff]  }
 0x79f   : > { %1605 = vmatpush1.bf16.msra.mxu0 %v9167_v35  ;;  %v9199_v35 = vld [vmem:[#allocation7 + $0x128] ss:$132 sps:$4 sm:$0xff]  }
 0x7a0   : > { %1606 = vmatprep.subr.bf16.mxu0 %v9172_v36  ;;  %v9196_v36 = vld [vmem:[#allocation7 + $0x120] ss:$132 sps:$4 sm:$0xff]  }
 0x7a3   : > { %1607 = vmatpush1.bf16.msra.mxu0 %v9170_v37  ;;  %v9202_v37 = vld [vmem:[#allocation7 + $0x22c] ss:$132 sps:$4 sm:$0xff]  }
 0x7a4   : > { %1608 = vmatprep.subr.bf16.mxu0 %v9175_v38  ;;  %v9200_v38 = vld [vmem:[#allocation7 + $0x228] ss:$132 sps:$4 sm:$0xff]  }
 0x7a7   : > { %1609 = vmatpush1.bf16.msra.mxu0 %v9173_v39 }
 0x7a8   : > { %2020 = vmatprep.subr.bf16.mxu0 %v9194_v32 }
 0x825   : > { %v1460_v27 = vpop.xlane.xlu1 %1459 }
 0x826   : > { %v1462_v28 = vmul.f32 0.0078125, %v1460_v27 }
 0x828   : > { %v1463_v29 = vsub.f32 %v1456_v19, %v1462_v28 }
 0x82a   : > { %v1464_v30 = vmul.f32 %v1463_v29, %v1463_v29 }
 0x82c   : > { %1465 = vadd.xlane.f32.xlu0 %v1464_v30 }
 0x8b9   : > { %v1466_v56 = vpop.xlane.xlu0 %1465 }
 0x8ba   : > { %v1467_v57 = vmul.f32 0.0078125, %v1466_v56  ;;  %v9215_v56 = vld [vmem:[#allocation7 + $0x548] ss:$132 sps:$4 sm:$0xff]  }
 0x8bc   : > { %v1468_v58 = vadd.f32 1e-05, %v1467_v57  ;;  %v9218_v57 = vld [vmem:[#allocation7 + $0x64c] ss:$132 sps:$4 sm:$0xff]  }
 0x8be   : > { %9541 = vrsqrt.f32 %v1468_v58  ;;  %v9216_v58 = vld [vmem:[#allocation7 + $0x648] ss:$132 sps:$4 sm:$0xff]  }
 0x8c8   : > { %v9542_v59 = vpop.eup %9541 }
 0x8c9   : > { %v1470_v61 = vmul.f32 %v9542_v59, %v1463_v29  ;;  %v9219_v59 = vld [vmem:[#allocation7 + $0x650] ss:$132 sps:$4 sm:$0xff]  }
 0x8cb   : > { %v1477_v63 = vmul.f32 %v7750_v60, %v1470_v61  ;;  %v9222_v60 = vld [vmem:[#allocation7 + $0x754] ss:$132 sps:$4 sm:$0xff]  }
 0x8cc   : > { %v9220_v61 = vld [vmem:[#allocation7 + $0x750] ss:$132 sps:$4 sm:$0xff]  }
 0x8cd   : > { %v1484_v2 = vadd.f32 %v7751_v62, %v1477_v63  ;;  %v9223_v62 = vld [vmem:[#allocation7 + $0x758] ss:$132 sps:$4 sm:$0xff]  }
 0x8cf   : > { %v1501_v3 = vpack.c.bf16 %v1484_v2, %v1484_v2 }
 0x8d1   : > { %1627 = vmatmul.mubr.bf16.vlgmr.msra.gmra.mrb[20].mxu0 %v1501_v3 }
 0x8d2   : > { %2052 = vmatprep.mubr.bf16.mxu0 %v9853_v0  ;;  %2021 = vmatpush1.bf16.msra.mxu0 %v9192_v40 }
 0x8d3   : > { %2022 = vmatprep.subr.bf16.mxu0 %v9198_v34 }
 0x8d6   : > { %2023 = vmatpush1.bf16.msra.mxu0 %v9196_v36 }
 0x8d7   : > { %2024 = vmatprep.subr.bf16.mxu0 %v9202_v37 }
 0x8da   : > { %2025 = vmatpush1.bf16.msra.mxu0 %v9200_v38 }
 0x8db   : > { %2026 = vmatprep.subr.bf16.mxu0 %v9206_v48 }
 0x8de   : > { %2027 = vmatpush1.bf16.msra.mxu0 %v9204_v49 }
 0x8df   : > { %2028 = vmatprep.subr.bf16.mxu0 %v9210_v52 }
 0x8e2   : > { %2029 = vmatpush1.bf16.msra.mxu0 %v9208_v51 }
 0x8e3   : > { %2030 = vmatprep.subr.bf16.mxu0 %v9214_v54 }
 0x8e6   : > { %2031 = vmatpush1.bf16.msra.mxu0 %v9212_v55 }
 0x8e7   : > { %2032 = vmatprep.subr.bf16.mxu0 %v9218_v57 }
 0x8ea   : > { %2033 = vmatpush1.bf16.msra.mxu0 %v9216_v58 }
 0x8eb   : > { %2034 = vmatprep.subr.bf16.mxu0 %v9222_v60 }
 0x8ee   : > { %2035 = vmatpush1.bf16.msra.mxu0 %v9220_v61 }
 0x8ef   : > { %8568 = vmatprep.subr.bf16.mxu0 %v9854_v1 }
 0x9a4   : > { %v1628_v12 = vpop.f32.mrb[20].mxu0 }
 0x9a5   : > { %v1629_v13 = vadd.f32 %v1628_v12, %v1507_v10  ;;  %v1630_v14 = vpop.f32.mrb[21].mxu0  ;;  %v1875_v12 = vld [vmem:[#allocation10 + $0xb] sm:$0x7] }
 0x9a6   : > { %v1631_v16 = vadd.f32 %v1630_v14, %v1511_v11  ;;  %v1632_v17 = vpop.f32.mrb[22].mxu0  ;;  %v1888_v14 = vrot.slane %v1875_v12, %v10160_v5 }
 0x9a7   : > { %v1635_v18 = vmax.f32 %v1629_v13, 0.0  ;;  %v1633_v19 = vpop.f32.mrb[23].mxu0  ;;  %v1880_v13 = vrot.slane %v1875_v12, %v10141_v46 }
 0x9a8   : > { %v1636_v20 = vmax.f32 %v1631_v16, 0.0  ;;  %v1884_v16 = vrot.slane %v1875_v12, %v10144_v47 }
 0x9a9   : > { %v1669_v23 = vpack.c.bf16 %v1635_v18, %v1635_v18 }
 0x9aa   : > { %v1670_v21 = vpack.c.bf16 %v1636_v20, %v1636_v20 }
 0x9ac   : > { %1806 = vmatprep.mubr.bf16.mxu1 %v1670_v21 }
 0x9ad   : > { %1807 = vmatmul.mubr.bf16.vlgmr.msra.gmra.mrb[28].mxu1 %v1669_v23 }
 0x9ae   : > { %8564 = vmatprep.mubr.msk.bf16.mxu1 %vm9855_vm0, %v9854_v1  ;;  %8549 = vmatpush3.bf16.msra.mxu1 %v9195_v33 }
 0x9af   : > { %8550 = vmatprep.subr.bf16.mxu1 %v9854_v1 }
 0x9b2   : > { %8551 = vmatpush3.bf16.msra.mxu1 %v9199_v35 }
 0x9b3   : > { %8552 = vmatprep.subr.bf16.mxu1 %v9854_v1 }
 0x9b6   : > { %8553 = vmatpush3.bf16.msra.mxu1 %v9203_v44 }
 0x9b7   : > { %8554 = vmatprep.subr.bf16.mxu1 %v9854_v1 }
 0x9ba   : > { %8555 = vmatpush3.bf16.msra.mxu1 %v9207_v50 }
 0x9bb   : > { %8556 = vmatprep.subr.bf16.mxu1 %v9854_v1 }
 0x9be   : > { %8557 = vmatpush3.bf16.msra.mxu1 %v9211_v53 }
 0x9bf   : > { %8558 = vmatprep.subr.bf16.mxu1 %v9854_v1 }
 0x9c2   : > { %8559 = vmatpush3.bf16.msra.mxu1 %v9215_v56 }
 0x9c3   : > { %8560 = vmatprep.subr.bf16.mxu1 %v9854_v1 }
 0x9c6   : > { %8561 = vmatpush3.bf16.msra.mxu1 %v9219_v59 }
 0x9c7   : > { %8562 = vmatprep.subr.bf16.mxu1 %v9854_v1 }
 0x9ca   : > { %8563 = vmatpush3.bf16.msra.mxu1 %v9223_v62 }
 0x9cb   : > { %8592 = vmatprep.subr.bf16.mxu1 %v9854_v1 }
 0xa80   : > { %v8187_v15 = vpop.f32.mrb[28].mxu1 }
 0xa81   : > { %v8188_v26 = vpop.f32.mrb[29].mxu1 }
 0xa82   : > { %v8189_v27 = vadd.f32 %v8188_v26, %v8187_v15  ;;  %v8190_v28 = vpop.f32.mrb[30].mxu1 }
 0xa83   : > { %v8191_v29 = vpop.f32.mrb[31].mxu1 }
 0xa84   : > { %v1809_v30 = vadd.f32 %v8189_v27, %v7768_v25 }
 0xa86   : > { %v1814_v31 = vadd.f32 %v1809_v30, %v1484_v2 }
 0xa88   : > { %1817 = vadd.xlane.f32.xlu0 %v1814_v31 }
 0xb15   : > { %v1818_v39 = vpop.xlane.xlu0 %1817 }
 0xb16   : > { %v1819_v41 = vmul.f32 0.0078125, %v1818_v39 }
 0xb18   : > { %v1820_v42 = vsub.f32 %v1814_v31, %v1819_v41 }
 0xb1a   : > { %v1821_v43 = vmul.f32 %v1820_v42, %v1820_v42 }
 0xb1c   : > { %1822 = vadd.xlane.f32.xlu1 %v1821_v43 }
 0xba9   : > { %v1823_v63 = vpop.xlane.xlu1 %1822 }
 0xbaa   : > { %v1824_v2 = vmul.f32 0.0078125, %v1823_v63 }
 0xbac   : > { %v1825_v3 = vadd.f32 1e-05, %v1824_v2 }
 0xbae   : > { %9543 = vrsqrt.f32 %v1825_v3 }
 0xbb8   : > { %v9544_v4 = vpop.eup %9543 }
 0xbb9   : > { %v1827_v7 = vmul.f32 %v9544_v4, %v1820_v42 }
 0xbbb   : > { %v1834_v9 = vmul.f32 %v7785_v6, %v1827_v7 }
 0xbbd   : > { %v10256_v10 = vadd.f32 %v7786_v8, %v1834_v9 }
 0xbbf   : > { %v1874_v11 = vpack.c.bf16 %v10256_v10, %v10256_v10 }
 0xbc1   : > { %2053 = vmatmul.mubr.bf16.vlgmr.msra.gmra.mrb[24].mxu0 %v1874_v11  ;;  %8565 = vmatmul.mubr.bf16.vlgmr.msra.gmra.mrb[32].mxu1 %v1874_v11 }
 0xbc2   : > { %8570 = vmatprep.mubr.msk.bf16.mxu0 %vm9855_vm0, %v9854_v1  ;;  %8594 = vmatprep.mubr.msk.bf16.mxu1 %vm9855_vm0, %v9854_v1 }
 0xc94   : > { %v2054_v17 = vpop.f32.mrb[24].mxu0  ;;  %v2095_v18 = vpop.f32.mrb[32].mxu1 }
 0xc95   : > { %v2055_v19 = vadd.f32 %v2054_v17, %v1880_v13  ;;  %v10267_v20 = vadd.f32 %v2095_v18, %v1888_v14  ;;  %v2056_v21 = vpop.f32.mrb[25].mxu0  ;;  %v8566_v23 = vpop.f32.mrb[33].mxu1 }
 0xc96   : > { %v2057_v15 = vadd.f32 %v2056_v21, %v1884_v16  ;;  %v2058_v25 = vpop.f32.mrb[26].mxu0  ;;  %v2098_v26 = vpop.f32.mrb[34].mxu1 }
 0xc97   : > { %v2059_v27 = vpop.f32.mrb[27].mxu0  ;;  %v8567_v28 = vpop.f32.mrb[35].mxu1  ;;  %2102 = vrot.lane.b32.xlu1 %v2055_v19, %s9856_s11  ;;  %v2371_v29 = vpack.c.bf16 %v10267_v20, %v10267_v20  ;;  %v2131_v32 = vpack.c.bf16 %v2055_v19, %v2055_v19 }
 0xc98   : > { %2112 = vrot.lane.b32.xlu0 %v2057_v15, %s9856_s11  ;;  %v2135_v30 = vpack.c.bf16 %v2057_v15, %v2057_v15 }
 0xc99   : > { %v2379_v31 = vsel %vm1146_vm4, %v2371_v29, 0 }
 0xc9a   : > { %8593 = vmatpush3.bf16.msra.mxu1 %v2379_v31  ;;  %v2143_v40 = vsel %vm905_vm3, %v2135_v30, 0 }
 0xc9b   : > { %8569 = vmatpush3.bf16.xpose.msra.mxu0 %v2143_v40  ;;  %2115 = vrot.lane.b32.xlu1 %v2057_v15, %s9857_s18 }
 0xc9c   : > { %2105 = vrot.lane.b32.xlu0 %v2055_v19, %s9857_s18  ;;  %8574 = vmatprep.subr.bf16.mxu0 %v9854_v1 }
 0xc9d   : > { %8604 = vmatprep.subr.bf16.mxu1 %v9854_v1 }
 0xc9f   : > { %2118 = vrot.lane.b32.xlu1 %v2057_v15, %s9858_s12 }
 0xca0   : > { %2108 = vrot.lane.b32.xlu0 %v2055_v19, %s9858_s12 }
 0xca2   : > { %8571 = vmatmul.mubr.msk.bf16.vlgmr.msra.gmra.mrb[28].mxu0 %vm905_vm3, %v2131_v32 }
 0xca3   : > { %8576 = vmatprep.mubr.msk.bf16.mxu0 %vm9855_vm0, %v9854_v1 }
 0xd09   : > { %v2103_v33 = vpop.permute.xlu1 %2102 }
 0xd0a   : > { %v2113_v34 = vpop.permute.xlu0 %2112  ;;  %v2132_v39 = vpack.c.bf16 %v2103_v33, %v2103_v33 }
 0xd0b   : > { %v2136_v35 = vpack.c.bf16 %v2113_v34, %v2113_v34 }
 0xd0d   : > { %v2189_v36 = vsel %vm905_vm3, %v2136_v35, 0  ;;  %v2116_v37 = vpop.permute.xlu1 %2115 }
 0xd0e   : > { %8575 = vmatpush3.bf16.xpose.msra.mxu0 %v2189_v36  ;;  %v2137_v38 = vpack.c.bf16 %v2116_v37, %v2116_v37  ;;  %v2106_v43 = vpop.permute.xlu0 %2105 }
 0xd0f   : > { %8580 = vmatprep.subr.bf16.mxu0 %v9854_v1  ;;  %v2133_v48 = vpack.c.bf16 %v2106_v43, %v2106_v43 }
 0xd10   : > { %v2235_v41 = vsel %vm905_vm3, %v2137_v38, 0 }
 0xd11   : > { %v2119_v42 = vpop.permute.xlu1 %2118 }
 0xd12   : > { %v2138_v44 = vpack.c.bf16 %v2119_v42, %v2119_v42  ;;  %v2109_v50 = vpop.permute.xlu0 %2108 }
 0xd13   : > { %v2134_v51 = vpack.c.bf16 %v2109_v50, %v2109_v50 }
 0xd14   : > { %v2281_v49 = vsel %vm905_vm3, %v2138_v44, 0 }
 0xd15   : > { %8577 = vmatmul.mubr.msk.bf16.vlgmr.msra.gmra.mrb[32].mxu0 %vm905_vm3, %v2132_v39 }
 0xd16   : > { %8581 = vmatpush3.bf16.xpose.msra.mxu0 %v2235_v41  ;;  %8582 = vmatprep.mubr.msk.bf16.mxu0 %vm9855_vm0, %v9854_v1 }
 0xd17   : > { %8586 = vmatprep.subr.bf16.mxu0 %v9854_v1 }
 0xd1d   : > { %8583 = vmatmul.mubr.msk.bf16.vlgmr.msra.gmra.mrb[36].mxu0 %vm905_vm3, %v2133_v48 }
 0xd1e   : > { %8587 = vmatpush3.bf16.xpose.msra.mxu0 %v2281_v49  ;;  %8588 = vmatprep.mubr.msk.bf16.mxu0 %vm9855_vm0, %v9854_v1 }
 0xd1f   : > { %8598 = vmatprep.subr.bf16.mxu0 %v9854_v1 }
 0xd25   : > { %8589 = vmatmul.mubr.msk.bf16.vlgmr.msra.gmra.mrb[40].mxu0 %vm905_vm3, %v2134_v51 }
 0xd26   : > { %8600 = vmatprep.mubr.msk.bf16.mxu0 %vm9855_vm0, %v9854_v1 }
 0xd75   : > { %v2179_v52 = vpop.f32.mrb[28].mxu0 }
 0xd76   : > { %v2180_v53 = vadd.f32 %v10191_v22, %v2179_v52  ;;  %v8572_v54 = vpop.f32.mrb[29].mxu0 }
 0xd77   : > { %v2182_v55 = vpop.f32.mrb[30].mxu0 }
 0xd78   : > { %v8573_v56 = vpop.f32.mrb[31].mxu0  ;;  %v2323_v57 = vsel %vm1090_vm5, %v2180_v53, -inf }
 0xd79   : > { %2324 = vmax.xlane.f32.xlu1 %v2323_v57 }
 0xde8   : > { %v2225_v58 = vpop.f32.mrb[32].mxu0 }
 0xde9   : > { %v2226_v59 = vadd.f32 %v10191_v22, %v2225_v58  ;;  %v8578_v60 = vpop.f32.mrb[33].mxu0 }
 0xdea   : > { %v2228_v61 = vpop.f32.mrb[34].mxu0 }
 0xdeb   : > { %v8579_v62 = vpop.f32.mrb[35].mxu0  ;;  %v2326_v63 = vsel %vm1090_vm5, %v2226_v59, -inf }
 0xdec   : > { %2327 = vmax.xlane.f32.xlu0 %v2326_v63 }
 0xdf0   : > { %v2271_v2 = vpop.f32.mrb[36].mxu0 }
 0xdf1   : > { %v2272_v3 = vadd.f32 %v10191_v22, %v2271_v2  ;;  %v8584_v4 = vpop.f32.mrb[37].mxu0 }
 0xdf2   : > { %v2274_v6 = vpop.f32.mrb[38].mxu0 }
 0xdf3   : > { %v8585_v7 = vpop.f32.mrb[39].mxu0  ;;  %v2329_v8 = vsel %vm1090_vm5, %v2272_v3, -inf }
 0xdf4   : > { %2330 = vmax.xlane.f32.xlu0 %v2329_v8  ;;  %v9224_v8 = vld [vmem:[#allocation7 + $0x24] ss:$132 sps:$4 sm:$0xff]  }
 0xdf8   : > { %v2317_v9 = vpop.f32.mrb[40].mxu0 }
 0xdf9   : > { %v2318_v11 = vadd.f32 %v10191_v22, %v2317_v9  ;;  %v8590_v12 = vpop.f32.mrb[41].mxu0  ;;  %v9225_v9 = vld [vmem:[#allocation7 + $0x12c] ss:$132 sps:$4 sm:$0xff]  }
 0xdfa   : > { %v2320_v13 = vpop.f32.mrb[42].mxu0 }
 0xdfb   : > { %v8591_v14 = vpop.f32.mrb[43].mxu0  ;;  %v2332_v16 = vsel %vm1090_vm5, %v2318_v11, -inf }
 0xdfc   : > { %2333 = vmax.xlane.f32.xlu1 %v2332_v16 }
 0xe06   : > { %v2325_v17 = vpop.xlane.xlu1 %2324 }
 0xe07   : > { %v2335_v18 = vsub.f32 %v2180_v53, %v2325_v17  ;;  %v9227_v17 = vld [vmem:[#allocation7 + $0x33c] ss:$132 sps:$4 sm:$0xff]  }
 0xe09   : > { %v2339_v19 = vmul.f32 1.442695, %v2335_v18 }
 0xe0b   : > { %9545 = vpow2.f32 %v2339_v19 }
 0xe15   : > { %v9546_v21 = vpop.eup %9545 }
 0xe16   : > { %v2347_v23 = vsel %vm1090_vm5, %v9546_v21, 0.0 }
 0xe17   : > { %2348 = vadd.xlane.f32.xlu0 %v2347_v23  ;;  %v9228_v23 = vld [vmem:[#allocation7 + $0x444] ss:$132 sps:$4 sm:$0xff]  }
 0xe79   : > { %v2328_v15 = vpop.xlane.xlu0 %2327 }
 0xe7a   : > { %v2336_v25 = vsub.f32 %v2226_v59, %v2328_v15 }
 0xe7c   : > { %v2341_v26 = vmul.f32 1.442695, %v2336_v25  ;;  %v9229_v25 = vld [vmem:[#allocation7 + $0x54c] ss:$132 sps:$4 sm:$0xff]  }
 0xe7e   : > { %9547 = vpow2.f32 %v2341_v26  ;;  %v9230_v26 = vld [vmem:[#allocation7 + $0x654] ss:$132 sps:$4 sm:$0xff]  }
 0xe81   : > { %v2331_v27 = vpop.xlane.xlu0 %2330 }
 0xe82   : > { %v2337_v22 = vsub.f32 %v2272_v3, %v2331_v27  ;;  %v9231_v27 = vld [vmem:[#allocation7 + $0x75c] ss:$132 sps:$4 sm:$0xff]  }
 0xe84   : > { %v2343_v28 = vmul.f32 1.442695, %v2337_v22 }
 0xe86   : > { %9549 = vpow2.f32 %v2343_v28 }
 0xe88   : > { %v9548_v29 = vpop.eup %9547 }
 0xe89   : > { %v2350_v30 = vsel %vm1090_vm5, %v9548_v29, 0.0  ;;  %v2334_v33 = vpop.xlane.xlu1 %2333 }
 0xe8a   : > { %2351 = vadd.xlane.f32.xlu1 %v2350_v30  ;;  %v2338_v34 = vsub.f32 %v2318_v11, %v2334_v33  ;;  %v9226_v11 = vld [vmem:[#allocation7 + $0x234] ss:$132 sps:$4 sm:$0xff]  }
 0xe8c   : > { %v2345_v35 = vmul.f32 1.442695, %v2338_v34 }
 0xe90   : > { %v9550_v31 = vpop.eup %9549 }
 0xe91   : > { %v2353_v40 = vsel %vm1090_vm5, %v9550_v31, 0.0 }
 0xe92   : > { %2354 = vadd.xlane.f32.xlu0 %v2353_v40 }
 0xe9b   : > { %2125 = vrot.lane.b32.xlu1 %v10267_v20, %s9857_s18 }
 0xea4   : > { %v2349_v32 = vpop.xlane.xlu0 %2348 }
 0xea5   : > { %9551 = vrcp.f32 %v2349_v32 }
 0xea6   : > { %9553 = vpow2.f32 %v2345_v35 }
 0xea8   : > { %2122 = vrot.lane.b32.xlu0 %v10267_v20, %s9856_s11 }
 0xeaf   : > { %v9552_v36 = vpop.eup %9551 }
 0xeb0   : > { %v2360_v37 = vmul.f32 %v9552_v36, %v9546_v21  ;;  %v9554_v39 = vpop.eup %9553 }
 0xeb1   : > { %v2356_v41 = vsel %vm1090_vm5, %v9554_v39, 0.0 }
 0xeb2   : > { %v2367_v38 = vpack.c.bf16 %v2360_v37, %v2360_v37  ;;  %v7819_v37 = vld [vmem:[#allocation10 + $0xe] ss:$0 sm:$0xff] }
 0xeb4   : > { %8595 = vmatmul.mubr.msk.bf16.vlgmr.msra.gmra.mrb[36].mxu1 %vm1090_vm5, %v2367_v38 }
 0xeb5   : > { %8606 = vmatprep.mubr.msk.bf16.mxu1 %vm9855_vm0, %v9854_v1 }
 0xebf   : > { %2357 = vadd.xlane.f32.xlu1 %v2356_v41 }
 0xed0   : > { %2128 = vrot.lane.b32.xlu1 %v10267_v20, %s9858_s12 }
 0xf17   : > { %v2352_v42 = vpop.xlane.xlu1 %2351 }
 0xf18   : > { %9555 = vrcp.f32 %v2352_v42 }
 0xf1b   : > { %v2126_v43 = vpop.permute.xlu1 %2125 }
 0xf1c   : > { %v2373_v44 = vpack.c.bf16 %v2126_v43, %v2126_v43 }
 0xf1e   : > { %v2471_v48 = vsel %vm1146_vm4, %v2373_v44, 0 }
 0xf1f   : > { %v2355_v49 = vpop.xlane.xlu0 %2354  ;;  %8605 = vmatpush3.bf16.msra.mxu1 %v2471_v48  ;;  %v9232_v48 = vld [vmem:[#allocation7 + $0x28] ss:$132 sps:$4 sm:$0xff]  }
 0xf20   : > { %9557 = vrcp.f32 %v2355_v49  ;;  %8616 = vmatprep.subr.bf16.mxu1 %v9854_v1  ;;  %v9234_v49 = vld [vmem:[#allocation7 + $0x2c] ss:$132 sps:$4 sm:$0xff]  }
 0xf22   : > { %v9556_v50 = vpop.eup %9555 }
 0xf23   : > { %v2123_v51 = vpop.permute.xlu0 %2122  ;;  %v2362_v53 = vmul.f32 %v9556_v50, %v9548_v29  ;;  %v9237_v50 = vld [vmem:[#allocation7 + $0x134] ss:$132 sps:$4 sm:$0xff]  }
 0xf24   : > { %v2372_v52 = vpack.c.bf16 %v2123_v51, %v2123_v51  ;;  %v9235_v51 = vld [vmem:[#allocation7 + $0x130] ss:$132 sps:$4 sm:$0xff]  }
 0xf25   : > { %v2368_v55 = vpack.c.bf16 %v2362_v53, %v2362_v53  ;;  %v9238_v53 = vld [vmem:[#allocation7 + $0x238] ss:$132 sps:$4 sm:$0xff]  }
 0xf26   : > { %v2425_v54 = vsel %vm1146_vm4, %v2372_v52, 0  ;;  %v9240_v52 = vld [vmem:[#allocation7 + $0x23c] ss:$132 sps:$4 sm:$0xff]  }
 0xf27   : > { %8599 = vmatpush3.bf16.msra.mxu0 %v2425_v54 }
 0xf28   : > { %8610 = vmatprep.subr.bf16.mxu0 %v9854_v1 }
 0xf2a   : > { %v9558_v20 = vpop.eup %9557  ;;  %8601 = vmatmul.mubr.msk.bf16.vlgmr.msra.gmra.mrb[44].mxu0 %vm1090_vm5, %v2368_v55 }
 0xf2b   : > { %v2364_v56 = vmul.f32 %v9558_v20, %v9550_v31  ;;  %8612 = vmatprep.mubr.msk.bf16.mxu0 %vm9855_vm0, %v9854_v1 }
 0xf2d   : > { %v2369_v57 = vpack.c.bf16 %v2364_v56, %v2364_v56 }
 0xf2f   : > { %8607 = vmatmul.mubr.msk.bf16.vlgmr.msra.gmra.mrb[40].mxu1 %vm1090_vm5, %v2369_v57  ;;  %v9241_v57 = vld [vmem:[#allocation7 + $0x340] ss:$132 sps:$4 sm:$0xff]  }
 0xf30   : > { %8632 = vmatprep.mubr.msk.bf16.mxu1 %vm9855_vm0, %v9854_v1  ;;  %8617 = vmatpush3.bf16.msra.mxu1 %v9224_v8  ;;  %v9263_v8 = vld [vmem:[#allocation9 + $0x124] ss:$16 sps:$4 sm:$0xff]  }
 0xf31   : > { %8618 = vmatprep.subr.bf16.mxu1 %v9854_v1 }
 0xf34   : > { %8619 = vmatpush3.bf16.msra.mxu1 %v9225_v9  ;;  %v9264_v9 = vld [vmem:[#allocation9 + $0x24] ss:$16 sps:$4 sm:$0xff]  }
 0xf35   : > { %8620 = vmatprep.subr.bf16.mxu1 %v9854_v1 }
 0xf38   : > { %8621 = vmatpush3.bf16.msra.mxu1 %v9226_v11  ;;  %v9265_v11 = vld [vmem:[#allocation9 + $0x144] ss:$16 sps:$4 sm:$0xff]  }
 0xf39   : > { %8622 = vmatprep.subr.bf16.mxu1 %v9854_v1 }
 0xf3c   : > { %8623 = vmatpush3.bf16.msra.mxu1 %v9227_v17  ;;  %v9273_v17 = vld [vmem:[#allocation9 + $0x84] ss:$16 sps:$4 sm:$0xff]  }
 0xf3d   : > { %8624 = vmatprep.subr.bf16.mxu1 %v9854_v1 }
 0xf40   : > { %8625 = vmatpush3.bf16.msra.mxu1 %v9228_v23 }
 0xf41   : > { %8626 = vmatprep.subr.bf16.mxu1 %v9854_v1 }
 0xf44   : > { %8627 = vmatpush3.bf16.msra.mxu1 %v9229_v25 }
 0xf45   : > { %8628 = vmatprep.subr.bf16.mxu1 %v9854_v1 }
 0xf48   : > { %8629 = vmatpush3.bf16.msra.mxu1 %v9230_v26  ;;  %v7828_v26 = vld [vmem:[#allocation10 + $0x12] ss:$0 sm:$0xff] }
 0xf49   : > { %8630 = vmatprep.subr.bf16.mxu1 %v9854_v1 }
 0xf4c   : > { %v2358_v58 = vpop.xlane.xlu1 %2357  ;;  %8631 = vmatpush3.bf16.msra.mxu1 %v9231_v27 }
 0xf4d   : > { %9559 = vrcp.f32 %v2358_v58  ;;  %v9244_v58 = vld [vmem:[#allocation7 + $0x448] ss:$132 sps:$4 sm:$0xff]  }
 0xf50   : > { %v2129_v59 = vpop.permute.xlu1 %2128 }
 0xf51   : > { %v2374_v60 = vpack.c.bf16 %v2129_v59, %v2129_v59  ;;  %v9246_v59 = vld [vmem:[#allocation7 + $0x44c] ss:$132 sps:$4 sm:$0xff]  }
 0xf53   : > { %v2517_v61 = vsel %vm1146_vm4, %v2374_v60, 0  ;;  %v3098_v60 = vld [vmem:[%s475_s29] sm:$0xff] }
 0xf54   : > { %8611 = vmatpush3.bf16.msra.mxu0 %v2517_v61  ;;  %v9249_v61 = vld [vmem:[#allocation7 + $0x554] ss:$132 sps:$4 sm:$0xff]  }
 0xf55   : > { %2823 = vmatprep.subr.bf16.mxu0 %v9234_v49  ;;  %v9283_v49 = vld [vmem:[#allocation9 + $0xc4] ss:$16 sps:$4 sm:$0xff]  }
 0xf57   : > { %v9560_v62 = vpop.eup %9559 }
 0xf58   : > { %v2366_v63 = vmul.f32 %v9560_v62, %v9554_v39  ;;  %v9247_v62 = vld [vmem:[#allocation7 + $0x550] ss:$132 sps:$4 sm:$0xff]  }
 0xf5a   : > { %v2370_v2 = vpack.c.bf16 %v2366_v63, %v2366_v63  ;;  %v9252_v63 = vld [vmem:[#allocation7 + $0x65c] ss:$132 sps:$4 sm:$0xff]  }
 0xf5c   : > { %8613 = vmatmul.mubr.msk.bf16.vlgmr.msra.gmra.mrb[48].mxu0 %vm1090_vm5, %v2370_v2  ;;  %v9250_v2 = vld [vmem:[#allocation7 + $0x658] ss:$132 sps:$4 sm:$0xff]  }
 0xf5d   : > { %2855 = vmatprep.mubr.bf16.mxu0 %v9853_v0  ;;  %2824 = vmatpush1.bf16.msra.mxu0 %v9232_v48  ;;  %v9280_v48 = vld [vmem:[#allocation7 + $0x240] ss:$132 sps:$4 sm:$0xff]  }
 0xf5e   : > { %2825 = vmatprep.subr.bf16.mxu0 %v9237_v50  ;;  %v9284_v50 = vld [vmem:[#allocation9 + $0x1e4] ss:$16 sps:$4 sm:$0xff]  }
 0xf61   : > { %2826 = vmatpush1.bf16.msra.mxu0 %v9235_v51  ;;  %v9287_v51 = vld [vmem:[#allocation7 + $0x34c] ss:$132 sps:$4 sm:$0xff]  }
 0xf62   : > { %2827 = vmatprep.subr.bf16.mxu0 %v9240_v52  ;;  %v9285_v52 = vld [vmem:[#allocation7 + $0x348] ss:$132 sps:$4 sm:$0xff]  }
 0xf65   : > { %2828 = vmatpush1.bf16.msra.mxu0 %v9238_v53  ;;  %v9288_v53 = vld [vmem:[#allocation9 + $0xe4] ss:$16 sps:$4 sm:$0xff]  }
 0xf87   : > { %v2415_v3 = vpop.f32.mrb[36].mxu1 }
 0xf88   : > { %v8596_v4 = vpop.f32.mrb[37].mxu1 }
 0xf89   : > { %v2418_v6 = vpop.f32.mrb[38].mxu1  ;;  %v9253_v4 = vld [vmem:[#allocation7 + $0x760] ss:$132 sps:$4 sm:$0xff]  }
 0xf8a   : > { %v8597_v7 = vpop.f32.mrb[39].mxu1  ;;  %v9261_v6 = vld [vmem:[#allocation9 + $0x104] ss:$16 sps:$4 sm:$0xff]  }
 0xf8b   : > { %v9262_v7 = vld [vmem:[#allocation9 + $0x4] ss:$16 sps:$4 sm:$0xff]   ;;  %8227 = vmatprep.subr.bf16.mxu1 %v9261_v6 }
 0xffd   : > { %v2461_v12 = vpop.f32.mrb[44].mxu0 }
 0xffe   : > { %2560 = vrot.lane.b32.xlu0 %v2461_v12, %s9858_s12  ;;  %v8602_v13 = vpop.f32.mrb[45].mxu0  ;;  %v9266_v12 = vld [vmem:[#allocation9 + $0x44] ss:$16 sps:$4 sm:$0xff]  }
 0xfff   : > { %v2464_v14 = vpop.f32.mrb[46].mxu0  ;;  %v9267_v13 = vld [vmem:[#allocation9 + $0x164] ss:$16 sps:$4 sm:$0xff]  }
0x1000   : > { %v8603_v16 = vpop.f32.mrb[47].mxu0  ;;  %v9268_v14 = vld [vmem:[#allocation9 + $0x64] ss:$16 sps:$4 sm:$0xff]  }
0x1001   : > { %v9269_v16 = vld [vmem:[#allocation9 + $0x184] ss:$16 sps:$4 sm:$0xff]  }
0x1002   : > { %v2507_v18 = vpop.f32.mrb[40].mxu1 }
0x1003   : > { %2564 = vrot.lane.b32.xlu1 %v2507_v18, %s9857_s18  ;;  %v8608_v19 = vpop.f32.mrb[41].mxu1  ;;  %v9274_v18 = vld [vmem:[#allocation9 + $0x1a4] ss:$16 sps:$4 sm:$0xff]  }
0x1004   : > { %v2510_v21 = vpop.f32.mrb[42].mxu1  ;;  %v9278_v19 = vld [vmem:[#allocation9 + $0xa4] ss:$16 sps:$4 sm:$0xff]  }
0x1005   : > { %v8609_v15 = vpop.f32.mrb[43].mxu1 }
0x102f   : > { %v2553_v22 = vpop.f32.mrb[48].mxu0 }
0x1030   : > { %2568 = vrot.lane.b32.xlu0 %v2553_v22, %s9856_s11  ;;  %v8614_v28 = vpop.f32.mrb[49].mxu0  ;;  %v7829_v22 = vld [vmem:[#allocation10 + $0x13] ss:$0 sm:$0xff] }
0x1031   : > { %v2556_v29 = vpop.f32.mrb[50].mxu0 }
0x1032   : > { %v8615_v30 = vpop.f32.mrb[51].mxu0 }
0x1033   : > { %v9256_v30 = vld [vmem:[#allocation4] sm:$0xff]  }
0x1070   : > { %v2561_v31 = vpop.permute.xlu0 %2560 }
0x1071   : > { %v2571_v32 = vsel %vm905_vm3, %v2415_v3, %v2561_v31  ;;  %v9255_v3 = vld [vmem:[#allocation7 + $0x764] ss:$132 sps:$4 sm:$0xff]  }
0x1075   : > { %v2565_v40 = vpop.permute.xlu1 %2564 }
0x1076   : > { %v2572_v33 = vsel %vm1341_vm6, %v2571_v32, %v2565_v40  ;;  %v9257_v40 = vld [vmem:[#allocation4 + $0x8] sm:$0xff]   ;;  %v9258_v32 = vld [vmem:[#allocation4 + $0x10] sm:$0xff]  }
0x10a2   : > { %v2569_v34 = vpop.permute.xlu0 %2568 }
0x10a3   : > { %v2573_v35 = vsel %vm558_vm2, %v2572_v33, %v2569_v34  ;;  %v9259_v34 = vld [vmem:[#allocation4 + $0x18] sm:$0xff]  }
0x10a4   : > { %v2590_v36 = vpack.c.bf16 %v2573_v35, %v2573_v35  ;;  %v9260_v35 = vld [vmem:[#allocation4 + $0x20] sm:$0xff]  }
0x10a6   : > { %8633 = vmatmul.mubr.bf16.vlgmr.msra.gmra.mrb[44].mxu1 %v2590_v36  ;;  %v9272_v36 = vld [vmem:[#allocation7 + $0x34] ss:$132 sps:$4 sm:$0xff]  }
0x10a7   : > { %8228 = vmatpush3.bf16.msra.mxu1 %v9262_v7 }
0x10a8   : > { %8229 = vmatprep.subr.bf16.mxu1 %v9263_v8 }
0x10ab   : > { %8230 = vmatpush3.bf16.msra.mxu1 %v9264_v9 }
0x10ac   : > { %8231 = vmatprep.subr.bf16.mxu1 %v9265_v11 }
0x10af   : > { %8232 = vmatpush3.bf16.msra.mxu1 %v9266_v12  ;;  %v9292_v12 = vld [vmem:[#allocation7 + $0x38] ss:$132 sps:$4 sm:$0xff]  }
0x10b0   : > { %8233 = vmatprep.subr.bf16.mxu1 %v9267_v13 }
0x10b3   : > { %8234 = vmatpush3.bf16.msra.mxu1 %v9268_v14  ;;  %v9296_v14 = vld [vmem:[#allocation7 + $0x140] ss:$132 sps:$4 sm:$0xff]  }
0x10b4   : > { %8235 = vmatprep.subr.bf16.mxu1 %v9269_v16  ;;  %v9300_v16 = vld [vmem:[#allocation7 + $0x248] ss:$132 sps:$4 sm:$0xff]  }
0x10b7   : > { %8236 = vmatpush3.bf16.msra.mxu1 %v9273_v17  ;;  %v3115_v17 = vld [vmem:[#allocation6] sm:$0xff] }
0x10b8   : > { %8237 = vmatprep.subr.bf16.mxu1 %v9274_v18  ;;  %v9304_v18 = vld [vmem:[#allocation7 + $0x350] ss:$132 sps:$4 sm:$0xff]  }
0x10bb   : > { %8238 = vmatpush3.bf16.msra.mxu1 %v9278_v19 }
0x1179   : > { %v2680_v38 = vpop.f32.mrb[44].mxu1 }
0x117a   : > { %v2681_v39 = vadd.f32 %v7819_v37, %v2680_v38  ;;  %v8634_v41 = vpop.f32.mrb[45].mxu1  ;;  %v9270_v38 = vld [vmem:[#allocation7 + $0x30] ss:$132 sps:$4 sm:$0xff]  }
0x117b   : > { %v2683_v42 = vpop.f32.mrb[46].mxu1  ;;  %v9277_v41 = vld [vmem:[#allocation7 + $0x13c] ss:$132 sps:$4 sm:$0xff]  }
0x117c   : > { %v8635_v43 = vpop.f32.mrb[47].mxu1  ;;  %v2686_v44 = vadd.f32 %v2681_v39, %v10256_v10  ;;  %v9243_v10 = vld [vmem:[#allocation7 + $0x344] ss:$132 sps:$4 sm:$0xff]   ;;  %v9275_v42 = vld [vmem:[#allocation7 + $0x138] ss:$132 sps:$4 sm:$0xff]  }
0x117d   : > { %2829 = vmatprep.subr.bf16.mxu0 %v9243_v10  ;;  %v9279_v43 = vld [vmem:[#allocation9 + $0x1c4] ss:$16 sps:$4 sm:$0xff]  }
0x117e   : > { %2689 = vadd.xlane.f32.xlu1 %v2686_v44  ;;  %2830 = vmatpush1.bf16.msra.mxu0 %v9241_v57  ;;  %v9297_v10 = vld [vmem:[#allocation7 + $0x660] ss:$132 sps:$4 sm:$0xff]  }
0x117f   : > { %2831 = vmatprep.subr.bf16.mxu0 %v9246_v59  ;;  %8239 = vmatprep.subr.bf16.mxu1 %v9279_v43  ;;  %v9299_v57 = vld [vmem:[#allocation7 + $0x664] ss:$132 sps:$4 sm:$0xff]  }
0x1180   : > { %8240 = vmatpush3.bf16.msra.mxu1 %v9283_v49  ;;  %v9301_v59 = vld [vmem:[#allocation7 + $0x768] ss:$132 sps:$4 sm:$0xff]  }
0x1181   : > { %8241 = vmatprep.subr.bf16.mxu1 %v9284_v50 }
0x1182   : > { %2832 = vmatpush1.bf16.msra.mxu0 %v9244_v58  ;;  %v9303_v58 = vld [vmem:[#allocation7 + $0x76c] ss:$132 sps:$4 sm:$0xff]  }
0x1183   : > { %2833 = vmatprep.subr.bf16.mxu0 %v9249_v61 }
0x1184   : > { %8242 = vmatpush3.bf16.msra.mxu1 %v9288_v53 }
0x1185   : > { %8650 = vmatprep.subr.bf16.mxu1 %v9854_v1 }
0x1186   : > { %2834 = vmatpush1.bf16.msra.mxu0 %v9247_v62 }
0x1187   : > { %2835 = vmatprep.subr.bf16.mxu0 %v9252_v63 }
0x118a   : > { %2836 = vmatpush1.bf16.msra.mxu0 %v9250_v2 }
0x118b   : > { %2837 = vmatprep.subr.bf16.mxu0 %v9255_v3 }
0x118e   : > { %2838 = vmatpush1.bf16.msra.mxu0 %v9253_v4 }
0x118f   : > { %8636 = vmatprep.subr.bf16.mxu0 %v9854_v1 }
0x120b   : > { %v2690_v54 = vpop.xlane.xlu1 %2689 }
0x120c   : > { %v2691_v55 = vmul.f32 0.0078125, %v2690_v54  ;;  %v9291_v54 = vld [vmem:[#allocation7 + $0x454] ss:$132 sps:$4 sm:$0xff]  }
0x120e   : > { %v2692_v20 = vsub.f32 %v2686_v44, %v2691_v55  ;;  %v9282_v44 = vld [vmem:[#allocation7 + $0x244] ss:$132 sps:$4 sm:$0xff]   ;;  %v9289_v55 = vld [vmem:[#allocation7 + $0x450] ss:$132 sps:$4 sm:$0xff]  }
0x1210   : > { %v2693_v56 = vmul.f32 %v2692_v20, %v2692_v20 }
0x1212   : > { %2694 = vadd.xlane.f32.xlu0 %v2693_v56  ;;  %v9295_v56 = vld [vmem:[#allocation7 + $0x55c] ss:$132 sps:$4 sm:$0xff]  }
0x1228   : > { %3100 = vperm.xlu0 %9105, %v3098_v60   ;;  %v2731_v60 = vld [vmem:[#allocation10 + $0xf] sm:$0x3] }
0x1229   : > { %v2736_v61 = vrot.slane %v2731_v60, %v10141_v46  ;;  %v2740_v62 = vrot.slane %v2731_v60, %v10144_v47 }
0x129f   : > { %v2695_v21 = vpop.xlane.xlu0 %2694 }
0x12a0   : > { %v2696_v23 = vmul.f32 0.0078125, %v2695_v21 }
0x12a2   : > { %v2697_v15 = vadd.f32 1e-05, %v2696_v23 }
0x12a4   : > { %9561 = vrsqrt.f32 %v2697_v15 }
0x12a7   : > { %v3101_v33 = vpop.permute.xlu0 %3100 }
0x12a8   : > { %vm3102_vm7 = vcmp.eq.s32.totalorder %v10114_v24, %v3101_v33 }
0x12a9   : > { %v3103_v37 = vsel %vm3102_vm7, 1.0, %v9854_v1 }
0x12aa   : > { %v3104_v39 = vpack.c.bf16 %v3103_v37, %v3103_v37 }
0x12ae   : > { %v9562_v25 = vpop.eup %9561 }
0x12af   : > { %v2699_v27 = vmul.f32 %v9562_v25, %v2692_v20  ;;  %v9293_v20 = vld [vmem:[#allocation7 + $0x558] ss:$132 sps:$4 sm:$0xff]  }
0x12b0   : > { %v9305_v25 = vld [vmem:[#allocation7 + $0x458] ss:$132 sps:$4 sm:$0xff]  }
0x12b1   : > { %v2706_v28 = vmul.f32 %v7828_v26, %v2699_v27 }
0x12b3   : > { %v10352_v29 = vadd.f32 %v7829_v22, %v2706_v28  ;;  %v9306_v22 = vld [vmem:[#allocation7 + $0x560] ss:$132 sps:$4 sm:$0xff]   ;;  %v9307_v28 = vld [vmem:[#allocation7 + $0x668] ss:$132 sps:$4 sm:$0xff]  }
0x12b5   : > { %v2730_v31 = vpack.c.bf16 %v10352_v29, %v10352_v29 }
0x12b7   : > { %2856 = vmatmul.mubr.bf16.vlgmr.msra.gmra.mrb[52].mxu0 %v2730_v31 }
0x12b8   : > { %8637 = vmatpush3.bf16.msra.mxu0 %v9256_v30  ;;  %8646 = vmatprep.mubr.msk.bf16.mxu0 %vm9855_vm0, %v9854_v1  ;;  %v9308_v30 = vld [vmem:[#allocation7 + $0x770] ss:$132 sps:$4 sm:$0xff]  }
0x12b9   : > { %8638 = vmatprep.subr.bf16.mxu0 %v9854_v1 }
0x12bc   : > { %8639 = vmatpush3.bf16.msra.mxu0 %v9257_v40 }
0x12bd   : > { %8640 = vmatprep.subr.bf16.mxu0 %v9854_v1 }
0x12c0   : > { %8641 = vmatpush3.bf16.msra.mxu0 %v9258_v32 }
0x12c1   : > { %8642 = vmatprep.subr.bf16.mxu0 %v9854_v1 }
0x12c4   : > { %8643 = vmatpush3.bf16.msra.mxu0 %v9259_v34 }
0x12c5   : > { %8644 = vmatprep.subr.bf16.mxu0 %v9854_v1 }
0x12c8   : > { %8645 = vmatpush3.bf16.msra.mxu0 %v9260_v35  ;;  %v3223_v35 = vld [vmem:[#allocation10 + $0x16] sm:$0x7] }
0x12c9   : > { %3368 = vmatprep.subr.bf16.mxu0 %v9272_v36  ;;  %v3228_v36 = vrot.slane %v3223_v35, %v10141_v46  ;;  %v3232_v37 = vrot.slane %v3223_v35, %v10144_v47 }
0x12cb   : > { %8647 = vmatmul.mubr.msk.bf16.vlgmr.msra.gmra.mrb[56].mxu0 %vm3146_vm8, %v3104_v39 }
0x12cc   : > { %3369 = vmatpush1.bf16.msra.mxu0 %v9270_v38  ;;  %3400 = vmatprep.mubr.bf16.mxu0 %v9853_v0 }
0x12cd   : > { %3370 = vmatprep.subr.bf16.mxu0 %v9277_v41 }
0x12d0   : > { %3371 = vmatpush1.bf16.msra.mxu0 %v9275_v42 }
0x12d1   : > { %3372 = vmatprep.subr.bf16.mxu0 %v9282_v44 }
0x12d4   : > { %3373 = vmatpush1.bf16.msra.mxu0 %v9280_v48 }
0x12d5   : > { %3374 = vmatprep.subr.bf16.mxu0 %v9287_v51  ;;  %v3236_v51 = vrot.slane %v3223_v35, %v10160_v5 }
0x12d8   : > { %3375 = vmatpush1.bf16.msra.mxu0 %v9285_v52 }
0x12d9   : > { %3376 = vmatprep.subr.bf16.mxu0 %v9291_v54 }
0x12dc   : > { %3377 = vmatpush1.bf16.msra.mxu0 %v9289_v55 }
0x12dd   : > { %3378 = vmatprep.subr.bf16.mxu0 %v9295_v56 }
0x12e0   : > { %3379 = vmatpush1.bf16.msra.mxu0 %v9293_v20 }
0x12e1   : > { %3380 = vmatprep.subr.bf16.mxu0 %v9299_v57 }
0x12e4   : > { %3381 = vmatpush1.bf16.msra.mxu0 %v9297_v10 }
0x12e5   : > { %3382 = vmatprep.subr.bf16.mxu0 %v9303_v58 }
0x12e8   : > { %3383 = vmatpush1.bf16.msra.mxu0 %v9301_v59 }
0x12e9   : > { %8670 = vmatprep.subr.bf16.mxu0 %v9854_v1 }
0x138a   : > { %v2857_v63 = vpop.f32.mrb[52].mxu0 }
0x138b   : > { %v2858_v2 = vadd.f32 %v2857_v63, %v2736_v61  ;;  %v2859_v3 = vpop.f32.mrb[53].mxu0 }
0x138c   : > { %v2860_v4 = vadd.f32 %v2859_v3, %v2740_v62  ;;  %v2861_v6 = vpop.f32.mrb[54].mxu0 }
0x138d   : > { %v2864_v7 = vmax.f32 %v2858_v2, 0.0  ;;  %v2862_v8 = vpop.f32.mrb[55].mxu0 }
0x138e   : > { %v2865_v9 = vmax.f32 %v2860_v4, 0.0 }
0x138f   : > { %v2898_v13 = vpack.c.bf16 %v2864_v7, %v2864_v7 }
0x1390   : > { %v2899_v11 = vpack.c.bf16 %v2865_v9, %v2865_v9 }
0x1392   : > { %3035 = vmatprep.mubr.bf16.mxu1 %v2899_v11 }
0x1393   : > { %3036 = vmatmul.mubr.bf16.vlgmr.msra.gmra.mrb[48].mxu1 %v2898_v13  ;;  %v7700_v13 = vld [vmem:[%s481_s25] ss:$0 sm:$0xff] }
0x1394   : > { %8651 = vmatpush3.bf16.msra.mxu1 %v9292_v12  ;;  %8666 = vmatprep.mubr.msk.bf16.mxu1 %vm9855_vm0, %v9854_v1  ;;  %v494_v12 = vsel %vm493_vm9, -inf, %v9854_v1 }
0x1395   : > { %8652 = vmatprep.subr.bf16.mxu1 %v9854_v1 }
0x1398   : > { %8653 = vmatpush3.bf16.msra.mxu1 %v9296_v14  ;;  %v10431_v14 = vadd.f32 %v7700_v13, %v494_v12 }
0x1399   : > { %8654 = vmatprep.subr.bf16.mxu1 %v9854_v1 }
0x139c   : > { %8655 = vmatpush3.bf16.msra.mxu1 %v9300_v16 }
0x139d   : > { %8656 = vmatprep.subr.bf16.mxu1 %v9854_v1 }
0x139e   : > { %v3184_v19 = vpop.f32.mrb[56].mxu0 }
0x139f   : > { %v10374_v21 = vadd.f32 %v3184_v19, %v3115_v17  ;;  %v8648_v23 = vpop.f32.mrb[57].mxu0 }
0x13a0   : > { %v3187_v15 = vpop.f32.mrb[58].mxu0  ;;  %8657 = vmatpush3.bf16.msra.mxu1 %v9304_v18 }
0x13a1   : > { %v3222_v26 = vpack.c.bf16 %v10374_v21, %v10374_v21  ;;  %v8649_v27 = vpop.f32.mrb[59].mxu0  ;;  %8658 = vmatprep.subr.bf16.mxu1 %v9854_v1 }
0x13a3   : > { %3401 = vmatmul.mubr.bf16.vlgmr.msra.gmra.mrb[60].mxu0 %v3222_v26 }
0x13a4   : > { %8659 = vmatpush3.bf16.msra.mxu1 %v9305_v25  ;;  %8672 = vmatprep.mubr.msk.bf16.mxu0 %vm9855_vm0, %v9854_v1 }
0x13a5   : > { %8660 = vmatprep.subr.bf16.mxu1 %v9854_v1 }
0x13a8   : > { %8661 = vmatpush3.bf16.msra.mxu1 %v9306_v22 }
0x13a9   : > { %8662 = vmatprep.subr.bf16.mxu1 %v9854_v1 }
0x13ac   : > { %8663 = vmatpush3.bf16.msra.mxu1 %v9307_v28 }
0x13ad   : > { %8664 = vmatprep.subr.bf16.mxu1 %v9854_v1 }
0x13b0   : > { %8665 = vmatpush3.bf16.msra.mxu1 %v9308_v30 }
0x13b1   : > { %8676 = vmatprep.subr.bf16.mxu1 %v9854_v1 }
0x13b3   : > { %8667 = vmatmul.mubr.bf16.vlgmr.msra.gmra.mrb[52].mxu1 %v3222_v26 }
0x13b4   : > { %8678 = vmatprep.mubr.msk.bf16.mxu1 %vm9855_vm0, %v9854_v1 }
0x1466   : > { %v8243_v31 = vpop.f32.mrb[48].mxu1 }
0x1467   : > { %v8244_v40 = vpop.f32.mrb[49].mxu1 }
0x1468   : > { %v10387_v32 = vadd.f32 %v8244_v40, %v8243_v31  ;;  %v8246_v33 = vpop.f32.mrb[50].mxu1 }
0x1469   : > { %v8247_v34 = vpop.f32.mrb[51].mxu1 }
0x1476   : > { %v3402_v38 = vpop.f32.mrb[60].mxu0 }
0x1477   : > { %v3403_v39 = vadd.f32 %v3402_v38, %v3228_v36  ;;  %v3404_v41 = vpop.f32.mrb[61].mxu0 }
0x1478   : > { %v3405_v42 = vadd.f32 %v3404_v41, %v3232_v37  ;;  %v3406_v43 = vpop.f32.mrb[62].mxu0 }
0x1479   : > { %v3407_v44 = vpop.f32.mrb[63].mxu0  ;;  %3450 = vrot.lane.b32.xlu0 %v3403_v39, %s9856_s11  ;;  %v3479_v50 = vpack.c.bf16 %v3403_v39, %v3403_v39 }
0x147a   : > { %3460 = vrot.lane.b32.xlu1 %v3405_v42, %s9856_s11  ;;  %v3483_v48 = vpack.c.bf16 %v3405_v42, %v3405_v42 }
0x147c   : > { %v3491_v49 = vsel %vm905_vm3, %v3483_v48, 0 }
0x147d   : > { %8671 = vmatpush3.bf16.xpose.msra.mxu0 %v3491_v49  ;;  %3453 = vrot.lane.b32.xlu0 %v3403_v39, %s9857_s18 }
0x147e   : > { %3463 = vrot.lane.b32.xlu1 %v3405_v42, %s9857_s18  ;;  %8682 = vmatprep.subr.bf16.mxu0 %v9854_v1 }
0x1482   : > { %3466 = vrot.lane.b32.xlu1 %v3405_v42, %s9858_s12 }
0x1484   : > { %8673 = vmatmul.mubr.msk.bf16.vlgmr.msra.gmra.mrb[64].mxu0 %vm905_vm3, %v3479_v50 }
0x1485   : > { %8684 = vmatprep.mubr.msk.bf16.mxu0 %vm9855_vm0, %v9854_v1 }
0x1486   : > { %3456 = vrot.lane.b32.xlu1 %v3403_v39, %s9858_s12  ;;  %v3443_v52 = vpop.f32.mrb[52].mxu1 }
0x1487   : > { %v10403_v53 = vadd.f32 %v3443_v52, %v3236_v51  ;;  %v8668_v54 = vpop.f32.mrb[53].mxu1 }
0x1488   : > { %v3446_v55 = vpop.f32.mrb[54].mxu1 }
0x1489   : > { %v8669_v20 = vpop.f32.mrb[55].mxu1  ;;  %v3719_v6 = vpack.c.bf16 %v10403_v53, %v10403_v53 }
0x148b   : > { %v3727_v9 = vsel %vm1146_vm4, %v3719_v6, 0 }
0x14eb   : > { %v3451_v58 = vpop.permute.xlu0 %3450 }
0x14ec   : > { %v3461_v56 = vpop.permute.xlu1 %3460  ;;  %v3480_v63 = vpack.c.bf16 %v3451_v58, %v3451_v58 }
0x14ed   : > { %v3484_v10 = vpack.c.bf16 %v3461_v56, %v3461_v56 }
0x14ef   : > { %v3537_v57 = vsel %vm905_vm3, %v3484_v10, 0  ;;  %v3454_v3 = vpop.permute.xlu0 %3453 }
0x14f0   : > { %v3464_v59 = vpop.permute.xlu1 %3463  ;;  %8677 = vmatpush3.bf16.xpose.msra.mxu1 %v3537_v57  ;;  %v3481_v7 = vpack.c.bf16 %v3454_v3, %v3454_v3 }
0x14f1   : > { %v3485_v60 = vpack.c.bf16 %v3464_v59, %v3464_v59  ;;  %8688 = vmatprep.subr.bf16.mxu1 %v9854_v1 }
0x14f3   : > { %v3583_v61 = vsel %vm905_vm3, %v3485_v60, 0 }
0x14f4   : > { %v3467_v62 = vpop.permute.xlu1 %3466  ;;  %8683 = vmatpush3.bf16.xpose.msra.mxu0 %v3583_v61 }
0x14f5   : > { %v3486_v2 = vpack.c.bf16 %v3467_v62, %v3467_v62  ;;  %8694 = vmatprep.subr.bf16.mxu0 %v9854_v1 }
0x14f7   : > { %v3629_v4 = vsel %vm905_vm3, %v3486_v2, 0  ;;  %8679 = vmatmul.mubr.msk.bf16.vlgmr.msra.gmra.mrb[56].mxu1 %vm905_vm3, %v3480_v63 }
0x14f8   : > { %8689 = vmatpush3.bf16.xpose.msra.mxu1 %v3629_v4  ;;  %8690 = vmatprep.mubr.msk.bf16.mxu1 %vm9855_vm0, %v9854_v1  ;;  %v3457_v8 = vpop.permute.xlu1 %3456 }
0x14f9   : > { %8700 = vmatprep.subr.bf16.mxu1 %v9854_v1  ;;  %v3482_v11 = vpack.c.bf16 %v3457_v8, %v3457_v8 }
0x14fb   : > { %8685 = vmatmul.mubr.msk.bf16.vlgmr.msra.gmra.mrb[68].mxu0 %vm905_vm3, %v3481_v7 }
0x14fc   : > { %8695 = vmatpush3.bf16.msra.mxu0 %v3727_v9  ;;  %8696 = vmatprep.mubr.msk.bf16.mxu0 %vm9855_vm0, %v9854_v1 }
0x14fd   : > { %8706 = vmatprep.subr.bf16.mxu0 %v9854_v1 }
0x14ff   : > { %8691 = vmatmul.mubr.msk.bf16.vlgmr.msra.gmra.mrb[60].mxu1 %vm905_vm3, %v3482_v11 }
0x1500   : > { %8702 = vmatprep.mubr.msk.bf16.mxu1 %vm9855_vm0, %v9854_v1 }
0x1557   : > { %v3527_v16 = vpop.f32.mrb[64].mxu0 }
0x1558   : > { %v3528_v17 = vadd.f32 %v3527_v16, %v10431_v14  ;;  %v8674_v18 = vpop.f32.mrb[65].mxu0 }
0x1559   : > { %v3530_v19 = vpop.f32.mrb[66].mxu0 }
0x155a   : > { %v8675_v23 = vpop.f32.mrb[67].mxu0  ;;  %v3671_v15 = vsel %vm1090_vm5, %v3528_v17, -inf }
0x155b   : > { %3672 = vmax.xlane.f32.xlu0 %v3671_v15 }
0x15ca   : > { %v3573_v25 = vpop.f32.mrb[56].mxu1 }
0x15cb   : > { %v3574_v26 = vadd.f32 %v3573_v25, %v10431_v14  ;;  %v8680_v27 = vpop.f32.mrb[57].mxu1 }
0x15cc   : > { %v3576_v22 = vpop.f32.mrb[58].mxu1 }
0x15cd   : > { %v8681_v24 = vpop.f32.mrb[59].mxu1  ;;  %v3674_v45 = vsel %vm1090_vm5, %v3574_v26, -inf }
0x15ce   : > { %v3619_v28 = vpop.f32.mrb[68].mxu0  ;;  %3675 = vmax.xlane.f32.xlu1 %v3674_v45 }
0x15cf   : > { %v3620_v30 = vadd.f32 %v3619_v28, %v10431_v14  ;;  %v8686_v31 = vpop.f32.mrb[69].mxu0 }
0x15d0   : > { %v3622_v40 = vpop.f32.mrb[70].mxu0 }
0x15d1   : > { %v8687_v33 = vpop.f32.mrb[71].mxu0  ;;  %v3677_v34 = vsel %vm1090_vm5, %v3620_v30, -inf }
0x15d2   : > { %3678 = vmax.xlane.f32.xlu0 %v3677_v34  ;;  %v3665_v35 = vpop.f32.mrb[60].mxu1 }
0x15d3   : > { %v3666_v36 = vadd.f32 %v3665_v35, %v10431_v14  ;;  %v8692_v37 = vpop.f32.mrb[61].mxu1  ;;  %v9309_v35 = vld [vmem:[#allocation7 + $0x3c] ss:$132 sps:$4 sm:$0xff]  }
0x15d4   : > { %v3668_v38 = vpop.f32.mrb[62].mxu1  ;;  %v9311_v37 = vld [vmem:[#allocation7 + $0x24c] ss:$132 sps:$4 sm:$0xff]  }
0x15d5   : > { %v8693_v39 = vpop.f32.mrb[63].mxu1  ;;  %v3680_v41 = vsel %vm1090_vm5, %v3666_v36, -inf  ;;  %v9312_v38 = vld [vmem:[#allocation7 + $0x354] ss:$132 sps:$4 sm:$0xff]  }
0x15d6   : > { %3681 = vmax.xlane.f32.xlu0 %v3680_v41  ;;  %v9313_v39 = vld [vmem:[#allocation7 + $0x45c] ss:$132 sps:$4 sm:$0xff]   ;;  %v9314_v41 = vld [vmem:[#allocation7 + $0x564] ss:$132 sps:$4 sm:$0xff]  }
0x15df   : > { %3470 = vrot.lane.b32.xlu1 %v10403_v53, %s9856_s11 }
0x15e8   : > { %v3673_v42 = vpop.xlane.xlu0 %3672 }
0x15e9   : > { %v3683_v43 = vsub.f32 %v3528_v17, %v3673_v42  ;;  %v9315_v42 = vld [vmem:[#allocation7 + $0x66c] ss:$132 sps:$4 sm:$0xff]  }
0x15eb   : > { %v3687_v44 = vmul.f32 1.442695, %v3683_v43  ;;  %v9316_v43 = vld [vmem:[#allocation7 + $0x774] ss:$132 sps:$4 sm:$0xff]  }
0x15ed   : > { %9563 = vpow2.f32 %v3687_v44 }
0x15f7   : > { %v9564_v48 = vpop.eup %9563 }
0x15f8   : > { %v3695_v49 = vsel %vm1090_vm5, %v9564_v48, 0.0 }
0x1603   : > { %3696 = vadd.xlane.f32.xlu1 %v3695_v49 }
0x165b   : > { %v3676_v50 = vpop.xlane.xlu1 %3675 }
0x165c   : > { %v3684_v51 = vsub.f32 %v3574_v26, %v3676_v50 }
0x165e   : > { %v3689_v52 = vmul.f32 1.442695, %v3684_v51 }
0x165f   : > { %v3679_v54 = vpop.xlane.xlu0 %3678  ;;  %v3471_v55 = vpop.permute.xlu1 %3470 }
0x1660   : > { %9565 = vpow2.f32 %v3689_v52  ;;  %v3685_v20 = vsub.f32 %v3620_v30, %v3679_v54  ;;  %v3720_v56 = vpack.c.bf16 %v3471_v55, %v3471_v55 }
0x1662   : > { %v3691_v10 = vmul.f32 1.442695, %v3685_v20  ;;  %v3773_v57 = vsel %vm1146_vm4, %v3720_v56, 0 }
0x1663   : > { %8701 = vmatpush3.bf16.msra.mxu1 %v3773_v57  ;;  %v3682_v58 = vpop.xlane.xlu0 %3681 }
0x1664   : > { %9567 = vpow2.f32 %v3691_v10  ;;  %v3686_v59 = vsub.f32 %v3666_v36, %v3682_v58  ;;  %8712 = vmatprep.subr.bf16.mxu1 %v9854_v1  ;;  %v9310_v36 = vld [vmem:[#allocation7 + $0x144] ss:$132 sps:$4 sm:$0xff]   ;;  %v7846_v58 = vld [vmem:[#allocation10 + $0x11] ss:$0 sm:$0xff] }
0x1666   : > { %v3693_v60 = vmul.f32 1.442695, %v3686_v59  ;;  %v3038_v59 = vadd.f32 %v10387_v32, %v7846_v58  ;;  %v9346_v58 = vld [vmem:[#allocation7 + $0x780] ss:$132 sps:$4 sm:$0xff]  }
0x1668   : > { %9569 = vpow2.f32 %v3693_v60  ;;  %v3043_v60 = vadd.f32 %v3038_v59, %v10352_v29  ;;  %v9344_v59 = vld [vmem:[#allocation7 + $0x77c] ss:$132 sps:$4 sm:$0xff]  }
0x166a   : > { %v9566_v61 = vpop.eup %9565 }
0x166b   : > { %v3698_v62 = vsel %vm1090_vm5, %v9566_v61, 0.0 }
0x166c   : > { %3699 = vadd.xlane.f32.xlu0 %v3698_v62 }
0x166e   : > { %v9568_v63 = vpop.eup %9567 }
0x166f   : > { %v3701_v2 = vsel %vm1090_vm5, %v9568_v63, 0.0 }
0x1670   : > { %3702 = vadd.xlane.f32.xlu1 %v3701_v2 }
0x1672   : > { %v9570_v3 = vpop.eup %9569 }
0x1673   : > { %v3704_v4 = vsel %vm1090_vm5, %v9570_v3, 0.0 }
0x1674   : > { %3705 = vadd.xlane.f32.xlu0 %v3704_v4 }
0x1681   : > { %3476 = vrot.lane.b32.xlu1 %v10403_v53, %s9858_s12 }
0x168a   : > { %3473 = vrot.lane.b32.xlu0 %v10403_v53, %s9857_s18 }
0x1690   : > { %v3697_v6 = vpop.xlane.xlu1 %3696 }
0x1691   : > { %9571 = vrcp.f32 %v3697_v6 }
0x169b   : > { %v9572_v7 = vpop.eup %9571 }
0x169c   : > { %v3708_v8 = vmul.f32 %v9572_v7, %v9564_v48 }
0x169e   : > { %v3715_v9 = vpack.c.bf16 %v3708_v8, %v3708_v8 }
0x16a0   : > { %8697 = vmatmul.mubr.msk.bf16.vlgmr.msra.gmra.mrb[72].mxu0 %vm1090_vm5, %v3715_v9 }
0x16a1   : > { %8708 = vmatprep.mubr.msk.bf16.mxu0 %vm9855_vm0, %v9854_v1 }
0x16f9   : > { %v3700_v11 = vpop.xlane.xlu0 %3699 }
0x16fa   : > { %9573 = vrcp.f32 %v3700_v11 }
0x16fd   : > { %v3703_v12 = vpop.xlane.xlu1 %3702 }
0x16fe   : > { %9575 = vrcp.f32 %v3703_v12 }
0x1701   : > { %v3706_v13 = vpop.xlane.xlu0 %3705  ;;  %v3477_v16 = vpop.permute.xlu1 %3476 }
0x1702   : > { %9577 = vrcp.f32 %v3706_v13  ;;  %v3722_v53 = vpack.c.bf16 %v3477_v16, %v3477_v16 }
0x1704   : > { %v9574_v17 = vpop.eup %9573  ;;  %v3865_v22 = vsel %vm1146_vm4, %v3722_v53, 0  ;;  %v7863_v53 = vld [vmem:[#allocation10 + $0x14] ss:$0 sm:$0xff] }
0x1705   : > { %v3710_v18 = vmul.f32 %v9574_v17, %v9566_v61  ;;  %v3474_v19 = vpop.permute.xlu0 %3473 }
0x1706   : > { %v3721_v23 = vpack.c.bf16 %v3474_v19, %v3474_v19 }
0x1707   : > { %v3716_v15 = vpack.c.bf16 %v3710_v18, %v3710_v18 }
0x1708   : > { %v9576_v25 = vpop.eup %9575  ;;  %v3819_v26 = vsel %vm1146_vm4, %v3721_v23, 0 }
0x1709   : > { %v3712_v27 = vmul.f32 %v9576_v25, %v9568_v63  ;;  %8703 = vmatmul.mubr.msk.bf16.vlgmr.msra.gmra.mrb[64].mxu1 %vm1090_vm5, %v3716_v15  ;;  %8707 = vmatpush3.bf16.msra.mxu0 %v3819_v26  ;;  %v7905_v15 = vld [vmem:[#allocation10 + $0x19] ss:$0 sm:$0xff]  ;;  %v7864_v25 = vld [vmem:[#allocation10 + $0x15] ss:$0 sm:$0xff] }
0x170a   : > { %8713 = vmatpush3.bf16.msra.mxu1 %v3865_v22  ;;  %8714 = vmatprep.mubr.msk.bf16.mxu1 %vm9855_vm0, %v9854_v1 }
0x170b   : > { %v3717_v24 = vpack.c.bf16 %v3712_v27, %v3712_v27  ;;  %8718 = vmatprep.subr.bf16.mxu0 %v9854_v1  ;;  %8738 = vmatprep.subr.bf16.mxu1 %v9854_v1 }
0x170c   : > { %v9578_v45 = vpop.eup %9577 }
0x170d   : > { %v3714_v28 = vmul.f32 %v9578_v45, %v9570_v3  ;;  %8709 = vmatmul.mubr.msk.bf16.vlgmr.msra.gmra.mrb[76].mxu0 %vm1090_vm5, %v3717_v24  ;;  %v9317_v45 = vld [vmem:[#allocation7 + $0x44] ss:$132 sps:$4 sm:$0xff]  }
0x170e   : > { %8734 = vmatprep.mubr.msk.bf16.mxu0 %vm9855_vm0, %v9854_v1  ;;  %8719 = vmatpush3.bf16.msra.mxu0 %v9309_v35 }
0x170f   : > { %v3718_v30 = vpack.c.bf16 %v3714_v28, %v3714_v28  ;;  %8720 = vmatprep.subr.bf16.mxu0 %v9854_v1  ;;  %v9319_v28 = vld [vmem:[#allocation7 + $0x48] ss:$132 sps:$4 sm:$0xff]  }
0x1711   : > { %8715 = vmatmul.mubr.msk.bf16.vlgmr.msra.gmra.mrb[68].mxu1 %vm1090_vm5, %v3718_v30  ;;  %v9322_v30 = vld [vmem:[#allocation7 + $0x150] ss:$132 sps:$4 sm:$0xff]  }
0x1712   : > { %8754 = vmatprep.mubr.msk.bf16.mxu1 %vm9855_vm0, %v9854_v1  ;;  %8721 = vmatpush3.bf16.msra.mxu0 %v9310_v36 }
0x1713   : > { %8722 = vmatprep.subr.bf16.mxu0 %v9854_v1 }
0x1716   : > { %8723 = vmatpush3.bf16.msra.mxu0 %v9311_v37 }
0x1717   : > { %8724 = vmatprep.subr.bf16.mxu0 %v9854_v1 }
0x171a   : > { %8725 = vmatpush3.bf16.msra.mxu0 %v9312_v38 }
0x171b   : > { %8726 = vmatprep.subr.bf16.mxu0 %v9854_v1 }
0x171e   : > { %8727 = vmatpush3.bf16.msra.mxu0 %v9313_v39 }
0x171f   : > { %8728 = vmatprep.subr.bf16.mxu0 %v9854_v1 }
0x1722   : > { %8729 = vmatpush3.bf16.msra.mxu0 %v9314_v41 }
0x1723   : > { %8730 = vmatprep.subr.bf16.mxu0 %v9854_v1 }
0x1726   : > { %8731 = vmatpush3.bf16.msra.mxu0 %v9315_v42 }
0x1727   : > { %8732 = vmatprep.subr.bf16.mxu0 %v9854_v1 }
0x172a   : > { %8733 = vmatpush3.bf16.msra.mxu0 %v9316_v43  ;;  %v9327_v43 = vld [vmem:[#allocation7 + $0x148] ss:$132 sps:$4 sm:$0xff]  }
0x172b   : > { %4283 = vmatprep.subr.bf16.mxu0 %v9319_v28 }
0x1773   : > { %v3763_v31 = vpop.f32.mrb[72].mxu0 }
0x1774   : > { %v8698_v40 = vpop.f32.mrb[73].mxu0 }
0x1775   : > { %v3766_v33 = vpop.f32.mrb[74].mxu0  ;;  %v9320_v40 = vld [vmem:[#allocation7 + $0x14c] ss:$132 sps:$4 sm:$0xff]  }
0x1776   : > { %v8699_v34 = vpop.f32.mrb[75].mxu0  ;;  %v9326_v33 = vld [vmem:[#allocation7 + $0x258] ss:$132 sps:$4 sm:$0xff]  }
0x1777   : > { %v9324_v34 = vld [vmem:[#allocation7 + $0x254] ss:$132 sps:$4 sm:$0xff]  }
0x17dc   : > { %v3809_v44 = vpop.f32.mrb[64].mxu1 }
0x17dd   : > { %3908 = vrot.lane.b32.xlu1 %v3809_v44, %s9858_s12  ;;  %v8704_v48 = vpop.f32.mrb[65].mxu1  ;;  %v9330_v44 = vld [vmem:[#allocation7 + $0x360] ss:$132 sps:$4 sm:$0xff]  }
0x17de   : > { %v3812_v49 = vpop.f32.mrb[66].mxu1  ;;  %v9328_v48 = vld [vmem:[#allocation7 + $0x35c] ss:$132 sps:$4 sm:$0xff]  }
0x17df   : > { %v8705_v50 = vpop.f32.mrb[67].mxu1  ;;  %v9331_v49 = vld [vmem:[#allocation7 + $0x250] ss:$132 sps:$4 sm:$0xff]  }
0x17e0   : > { %v3855_v51 = vpop.f32.mrb[76].mxu0  ;;  %v9334_v50 = vld [vmem:[#allocation7 + $0x468] ss:$132 sps:$4 sm:$0xff]  }
0x17e1   : > { %3912 = vrot.lane.b32.xlu0 %v3855_v51, %s9857_s18  ;;  %v8710_v52 = vpop.f32.mrb[77].mxu0  ;;  %v9332_v51 = vld [vmem:[#allocation7 + $0x464] ss:$132 sps:$4 sm:$0xff]  }
0x17e2   : > { %v3858_v54 = vpop.f32.mrb[78].mxu0  ;;  %v9335_v52 = vld [vmem:[#allocation7 + $0x358] ss:$132 sps:$4 sm:$0xff]  }
0x17e3   : > { %v8711_v55 = vpop.f32.mrb[79].mxu0  ;;  %v9338_v54 = vld [vmem:[#allocation7 + $0x570] ss:$132 sps:$4 sm:$0xff]  }
0x17e4   : > { %v3901_v20 = vpop.f32.mrb[68].mxu1  ;;  %v9336_v55 = vld [vmem:[#allocation7 + $0x56c] ss:$132 sps:$4 sm:$0xff]  }
0x17e5   : > { %3916 = vrot.lane.b32.xlu1 %v3901_v20, %s9856_s11  ;;  %v8716_v56 = vpop.f32.mrb[69].mxu1  ;;  %v9339_v20 = vld [vmem:[#allocation7 + $0x460] ss:$132 sps:$4 sm:$0xff]  }
0x17e6   : > { %v3904_v10 = vpop.f32.mrb[70].mxu1  ;;  %v9342_v56 = vld [vmem:[#allocation7 + $0x678] ss:$132 sps:$4 sm:$0xff]  }
0x17e7   : > { %v8717_v57 = vpop.f32.mrb[71].mxu1  ;;  %v9340_v10 = vld [vmem:[#allocation7 + $0x674] ss:$132 sps:$4 sm:$0xff]  }
0x17e8   : > { %v9343_v57 = vld [vmem:[#allocation7 + $0x568] ss:$132 sps:$4 sm:$0xff]  }
0x1800   : > { %3046 = vadd.xlane.f32.xlu0 %v3043_v60 }
0x184f   : > { %v3909_v61 = vpop.permute.xlu1 %3908 }
0x1850   : > { %v3919_v63 = vsel %vm905_vm3, %v3763_v31, %v3909_v61  ;;  %v9323_v31 = vld [vmem:[#allocation7 + $0x40] ss:$132 sps:$4 sm:$0xff]   ;;  %v9348_v61 = vld [vmem:[#allocation7 + $0x778] ss:$132 sps:$4 sm:$0xff]  }
0x1851   : > { %8739 = vmatpush3.bf16.msra.mxu1 %v9323_v31 }
0x1852   : > { %8740 = vmatprep.subr.bf16.mxu1 %v9854_v1 }
0x1853   : > { %v3913_v62 = vpop.permute.xlu0 %3912 }
0x1854   : > { %v3920_v2 = vsel %vm1341_vm6, %v3919_v63, %v3913_v62 }
0x1855   : > { %8741 = vmatpush3.bf16.msra.mxu1 %v9327_v43 }
0x1856   : > { %8742 = vmatprep.subr.bf16.mxu1 %v9854_v1 }
0x1857   : > { %v3917_v3 = vpop.permute.xlu1 %3916 }
0x1858   : > { %v3921_v4 = vsel %vm558_vm2, %v3920_v2, %v3917_v3 }
0x1859   : > { %v3938_v6 = vpack.c.bf16 %v3921_v4, %v3921_v4  ;;  %8743 = vmatpush3.bf16.msra.mxu1 %v9331_v49 }
0x185a   : > { %8744 = vmatprep.subr.bf16.mxu1 %v9854_v1 }
0x185b   : > { %8735 = vmatmul.mubr.bf16.vlgmr.msra.gmra.mrb[80].mxu0 %v3938_v6 }
0x185c   : > { %4315 = vmatprep.mubr.bf16.mxu0 %v9853_v0  ;;  %4284 = vmatpush1.bf16.msra.mxu0 %v9317_v45 }
0x185d   : > { %4285 = vmatprep.subr.bf16.mxu0 %v9322_v30  ;;  %8745 = vmatpush3.bf16.msra.mxu1 %v9335_v52  ;;  %v7916_v30 = vld [vmem:[#allocation10 + $0x1a] ss:$0 sm:$0xff] }
0x185e   : > { %8746 = vmatprep.subr.bf16.mxu1 %v9854_v1 }
0x1860   : > { %4286 = vmatpush1.bf16.msra.mxu0 %v9320_v40 }
0x1861   : > { %4287 = vmatprep.subr.bf16.mxu0 %v9326_v33  ;;  %8747 = vmatpush3.bf16.msra.mxu1 %v9339_v20 }
0x1862   : > { %8748 = vmatprep.subr.bf16.mxu1 %v9854_v1 }
0x1864   : > { %4288 = vmatpush1.bf16.msra.mxu0 %v9324_v34 }
0x1865   : > { %4289 = vmatprep.subr.bf16.mxu0 %v9330_v44  ;;  %8749 = vmatpush3.bf16.msra.mxu1 %v9343_v57 }
0x1866   : > { %8750 = vmatprep.subr.bf16.mxu1 %v9854_v1 }
0x1868   : > { %4290 = vmatpush1.bf16.msra.mxu0 %v9328_v48 }
0x1869   : > { %4291 = vmatprep.subr.bf16.mxu0 %v9334_v50 }
0x186c   : > { %4292 = vmatpush1.bf16.msra.mxu0 %v9332_v51 }
0x186d   : > { %4293 = vmatprep.subr.bf16.mxu0 %v9338_v54 }
0x1870   : > { %4294 = vmatpush1.bf16.msra.mxu0 %v9336_v55 }
0x1871   : > { %4295 = vmatprep.subr.bf16.mxu0 %v9342_v56 }
0x1874   : > { %4296 = vmatpush1.bf16.msra.mxu0 %v9340_v10 }
0x1875   : > { %4297 = vmatprep.subr.bf16.mxu0 %v9346_v58 }
0x1878   : > { %4298 = vmatpush1.bf16.msra.mxu0 %v9344_v59 }
0x1879   : > { %8782 = vmatprep.subr.bf16.mxu0 %v9854_v1 }
0x188d   : > { %v3047_v7 = vpop.xlane.xlu0 %3046 }
0x188e   : > { %v3048_v8 = vmul.f32 0.0078125, %v3047_v7 }
0x1890   : > { %v3049_v9 = vsub.f32 %v3043_v60, %v3048_v8  ;;  %v9347_v60 = vld [vmem:[#allocation7 + $0x670] ss:$132 sps:$4 sm:$0xff]   ;;  %v7865_v8 = vld [vmem:[#allocation10 + $0x38] ss:$0 sm:$0xff] }
0x1891   : > { %8751 = vmatpush3.bf16.msra.mxu1 %v9347_v60  ;;  %v9645_v60 = vld [vmem:[%s10188_s24] ss:$0 sm:$0xff] }
0x1892   : > { %v3050_v32 = vmul.f32 %v3049_v9, %v3049_v9  ;;  %8752 = vmatprep.subr.bf16.mxu1 %v9854_v1 }
0x1894   : > { %3051 = vadd.xlane.f32.xlu1 %v3050_v32  ;;  %v7866_v32 = vld [vmem:[#allocation10 + $0x39] ss:$0 sm:$0xff] }
0x1895   : > { %8753 = vmatpush3.bf16.msra.mxu1 %v9348_v61 }
0x1896   : > { %8758 = vmatprep.subr.bf16.mxu1 %v9854_v1 }
0x1921   : > { %v3052_v29 = vpop.xlane.xlu1 %3051 }
0x1922   : > { %v3053_v11 = vmul.f32 0.0078125, %v3052_v29 }
0x1924   : > { %v3054_v12 = vadd.f32 1e-05, %v3053_v11 }
0x1926   : > { %9579 = vrsqrt.f32 %v3054_v12  ;;  %v7914_v12 = vld [vmem:[#allocation10 + $0x21] ss:$0 sm:$0xff] }
0x192e   : > { %v4028_v13 = vpop.f32.mrb[80].mxu0 }
0x192f   : > { %v8736_v16 = vpop.f32.mrb[81].mxu0  ;;  %v4029_v27 = vadd.f32 %v7905_v15, %v4028_v13  ;;  %v4191_v15 = vld [vmem:[#allocation10 + $0x1b] sm:$0x3] }
0x1930   : > { %v9580_v17 = vpop.eup %9579  ;;  %v4031_v18 = vpop.f32.mrb[82].mxu0 }
0x1931   : > { %v8737_v19 = vpop.f32.mrb[83].mxu0  ;;  %v3056_v23 = vmul.f32 %v9580_v17, %v3049_v9  ;;  %v4034_v24 = vadd.f32 %v4029_v27, %v10374_v21  ;;  %v7915_v17 = vld [vmem:[#allocation10 + $0x22] ss:$0 sm:$0xff] }
0x1933   : > { %v3063_v26 = vmul.f32 %v7863_v53, %v3056_v23 }
0x1935   : > { %v3070_v22 = vadd.f32 %v7864_v25, %v3063_v26  ;;  %v4196_v25 = vrot.slane %v4191_v15, %v10141_v46  ;;  %v4200_v26 = vrot.slane %v4191_v15, %v10144_v47 }
0x1937   : > { %3073 = vadd.xlane.f32.xlu0 %v3070_v22 }
0x193b   : > { %4037 = vadd.xlane.f32.xlu0 %v4034_v24 }
0x19c4   : > { %v3074_v35 = vpop.xlane.xlu0 %3073 }
0x19c5   : > { %v3075_v36 = vmul.f32 0.0078125, %v3074_v35 }
0x19c7   : > { %v3076_v21 = vsub.f32 %v3070_v22, %v3075_v36 }
0x19c8   : > { %v4038_v37 = vpop.xlane.xlu0 %4037 }
0x19c9   : > { %v4039_v38 = vmul.f32 0.0078125, %v4038_v37  ;;  %v3077_v39 = vmul.f32 %v3076_v21, %v3076_v21 }
0x19cb   : > { %v4040_v41 = vsub.f32 %v4034_v24, %v4039_v38  ;;  %3078 = vadd.xlane.f32.xlu1 %v3077_v39 }
0x19cd   : > { %v4041_v42 = vmul.f32 %v4040_v41, %v4040_v41 }
0x19cf   : > { %4042 = vadd.xlane.f32.xlu0 %v4041_v42 }
0x1a58   : > { %v3079_v62 = vpop.xlane.xlu1 %3078 }
0x1a59   : > { %v3080_v63 = vmul.f32 0.0078125, %v3079_v62 }
0x1a5b   : > { %v3081_v2 = vadd.f32 1e-05, %v3080_v63 }
0x1a5c   : > { %v4043_v3 = vpop.xlane.xlu0 %4042 }
0x1a5d   : > { %9581 = vrsqrt.f32 %v3081_v2  ;;  %v4044_v4 = vmul.f32 0.0078125, %v4043_v3 }
0x1a5f   : > { %v4045_v6 = vadd.f32 1e-05, %v4044_v4 }
0x1a61   : > { %9583 = vrsqrt.f32 %v4045_v6 }
0x1a67   : > { %v9582_v7 = vpop.eup %9581 }
0x1a68   : > { %v3083_v9 = vmul.f32 %v9582_v7, %v3076_v21 }
0x1a6a   : > { %v3090_v29 = vmul.f32 %v7865_v8, %v3083_v9 }
0x1a6b   : > { %v9584_v11 = vpop.eup %9583 }
0x1a6c   : > { %v4047_v13 = vmul.f32 %v9584_v11, %v4040_v41  ;;  %v3097_v16 = vadd.f32 %v7866_v32, %v3090_v29 }
0x1a6e   : > { %v10495_v18 = vpack.c.bf16 %v3097_v16, %v3097_v16  ;;  %v4054_v53 = vmul.f32 %v7914_v12, %v4047_v13 }
0x1a70   : > { %4316 = vmatmul.mubr.bf16.vlgmr.msra.gmra.mrb[84].mxu0 %v10495_v18  ;;  %v10498_v19 = vadd.f32 %v7915_v17, %v4054_v53 }
0x1a71   : > { %8784 = vmatprep.mubr.msk.bf16.mxu0 %vm9855_vm0, %v9854_v1 }
0x1a72   : > { %v4078_v23 = vpack.c.bf16 %v10498_v19, %v10498_v19 }
0x1a74   : > { %8755 = vmatmul.mubr.bf16.vlgmr.msra.gmra.mrb[72].mxu1 %v4078_v23 }
0x1a75   : > { %8760 = vmatprep.mubr.msk.bf16.mxu1 %vm9855_vm0, %v9854_v1 }
0x1b43   : > { %v4317_v27 = vpop.f32.mrb[84].mxu0 }
0x1b44   : > { %v4318_v22 = vadd.f32 %v4317_v27, %v4196_v25  ;;  %v4319_v24 = vpop.f32.mrb[85].mxu0 }
0x1b45   : > { %v10508_v45 = vadd.f32 %v4319_v24, %v4200_v26  ;;  %v4321_v28 = vpop.f32.mrb[86].mxu0 }
0x1b46   : > { %v4322_v31 = vpop.f32.mrb[87].mxu0  ;;  %4335 = vrot.lane.b32.xlu1 %v4318_v22, %s9856_s11  ;;  %v4358_v40 = vpack.c.bf16 %v4318_v22, %v4318_v22 }
0x1b47   : > { %v4168_v33 = vpop.f32.mrb[72].mxu1  ;;  %v4594_v34 = vpack.c.bf16 %v10508_v45, %v10508_v45 }
0x1b48   : > { %v4169_v35 = vadd.f32 %v7916_v30, %v4168_v33  ;;  %v8756_v36 = vpop.f32.mrb[73].mxu1  ;;  %v4366_v21 = vsel %vm905_vm3, %v4358_v40, 0 }
0x1b49   : > { %v4171_v37 = vpop.f32.mrb[74].mxu1  ;;  %8759 = vmatpush3.bf16.xpose.msra.mxu1 %v4366_v21  ;;  %v4602_v38 = vsel %vm1146_vm4, %v4594_v34, 0 }
0x1b4a   : > { %8783 = vmatpush3.bf16.msra.mxu0 %v4602_v38  ;;  %4338 = vrot.lane.b32.xlu1 %v4318_v22, %s9857_s18  ;;  %v8757_v39 = vpop.f32.mrb[75].mxu1  ;;  %v4354_v41 = vpack.c.bf16 %v4169_v35, %v4169_v35 }
0x1b4b   : > { %4325 = vrot.lane.b32.xlu0 %v4169_v35, %s9856_s11  ;;  %8764 = vmatprep.subr.bf16.mxu1 %v9854_v1 }
0x1b4c   : > { %8794 = vmatprep.subr.bf16.mxu0 %v9854_v1 }
0x1b4e   : > { %4328 = vrot.lane.b32.xlu1 %v4169_v35, %s9857_s18 }
0x1b4f   : > { %4341 = vrot.lane.b32.xlu0 %v4318_v22, %s9858_s12 }
0x1b50   : > { %8761 = vmatmul.mubr.msk.bf16.vlgmr.msra.gmra.mrb[76].mxu1 %vm905_vm3, %v4354_v41 }
0x1b51   : > { %8766 = vmatprep.mubr.msk.bf16.mxu1 %vm9855_vm0, %v9854_v1 }
0x1b52   : > { %4331 = vrot.lane.b32.xlu1 %v4169_v35, %s9858_s12 }
0x1bb8   : > { %v4336_v42 = vpop.permute.xlu1 %4335 }
0x1bb9   : > { %v4359_v43 = vpack.c.bf16 %v4336_v42, %v4336_v42 }
0x1bbb   : > { %v4412_v44 = vsel %vm905_vm3, %v4359_v43, 0 }
0x1bbc   : > { %v4339_v48 = vpop.permute.xlu1 %4338  ;;  %8765 = vmatpush3.bf16.xpose.msra.mxu1 %v4412_v44 }
0x1bbd   : > { %8770 = vmatprep.subr.bf16.mxu1 %v9854_v1  ;;  %v4326_v49 = vpop.permute.xlu0 %4325  ;;  %v4360_v50 = vpack.c.bf16 %v4339_v48, %v4339_v48 }
0x1bbe   : > { %v4355_v51 = vpack.c.bf16 %v4326_v49, %v4326_v49 }
0x1bbf   : > { %v4458_v52 = vsel %vm905_vm3, %v4360_v50, 0 }
0x1bc0   : > { %v4329_v55 = vpop.permute.xlu1 %4328 }
0x1bc1   : > { %v4342_v54 = vpop.permute.xlu0 %4341  ;;  %v4356_v56 = vpack.c.bf16 %v4329_v55, %v4329_v55 }
0x1bc2   : > { %v4361_v20 = vpack.c.bf16 %v4342_v54, %v4342_v54 }
0x1bc3   : > { %8767 = vmatmul.mubr.msk.bf16.vlgmr.msra.gmra.mrb[80].mxu1 %vm905_vm3, %v4355_v51 }
0x1bc4   : > { %8771 = vmatpush3.bf16.xpose.msra.mxu1 %v4458_v52  ;;  %8772 = vmatprep.mubr.msk.bf16.mxu1 %vm9855_vm0, %v9854_v1  ;;  %v4504_v10 = vsel %vm905_vm3, %v4361_v20, 0  ;;  %v4332_v57 = vpop.permute.xlu1 %4331 }
0x1bc5   : > { %8776 = vmatprep.subr.bf16.mxu1 %v9854_v1  ;;  %v4357_v58 = vpack.c.bf16 %v4332_v57, %v4332_v57 }
0x1bcb   : > { %8773 = vmatmul.mubr.msk.bf16.vlgmr.msra.gmra.mrb[84].mxu1 %vm905_vm3, %v4356_v56 }
0x1bcc   : > { %8777 = vmatpush3.bf16.xpose.msra.mxu1 %v4504_v10  ;;  %8778 = vmatprep.mubr.msk.bf16.mxu1 %vm9855_vm0, %v9854_v1 }
0x1bcd   : > { %8788 = vmatprep.subr.bf16.mxu1 %v9854_v1 }
0x1bd3   : > { %8779 = vmatmul.mubr.msk.bf16.vlgmr.msra.gmra.mrb[88].mxu1 %vm905_vm3, %v4357_v58 }
0x1bd4   : > { %8790 = vmatprep.mubr.msk.bf16.mxu1 %vm9855_vm0, %v9854_v1 }
0x1c23   : > { %v4402_v59 = vpop.f32.mrb[76].mxu1 }
0x1c24   : > { %v4403_v61 = vadd.f32 %v9645_v60, %v4402_v59  ;;  %v8762_v62 = vpop.f32.mrb[77].mxu1 }
0x1c25   : > { %v4405_v63 = vpop.f32.mrb[78].mxu1 }
0x1c26   : > { %v8763_v2 = vpop.f32.mrb[79].mxu1  ;;  %v4546_v3 = vsel %vm1090_vm5, %v4403_v61, -inf }
0x1c27   : > { %4547 = vmax.xlane.f32.xlu0 %v4546_v3 }
0x1c96   : > { %v4448_v4 = vpop.f32.mrb[80].mxu1 }
0x1c97   : > { %v4449_v6 = vadd.f32 %v9645_v60, %v4448_v4  ;;  %v8768_v7 = vpop.f32.mrb[81].mxu1 }
0x1c98   : > { %v4451_v8 = vpop.f32.mrb[82].mxu1 }
0x1c99   : > { %v8769_v9 = vpop.f32.mrb[83].mxu1  ;;  %v4549_v32 = vsel %vm1090_vm5, %v4449_v6, -inf }
0x1c9a   : > { %4550 = vmax.xlane.f32.xlu1 %v4549_v32 }
0x1c9e   : > { %v4494_v29 = vpop.f32.mrb[84].mxu1 }
0x1c9f   : > { %v4495_v11 = vadd.f32 %v9645_v60, %v4494_v29  ;;  %v8774_v12 = vpop.f32.mrb[85].mxu1 }
0x1ca0   : > { %v4497_v13 = vpop.f32.mrb[86].mxu1  ;;  %v9350_v12 = vld [vmem:[#allocation7 + $0x154] ss:$132 sps:$4 sm:$0xff]  }
0x1ca1   : > { %v8775_v16 = vpop.f32.mrb[87].mxu1  ;;  %v4552_v17 = vsel %vm1090_vm5, %v4495_v11, -inf }
0x1ca2   : > { %4553 = vmax.xlane.f32.xlu0 %v4552_v17 }
0x1ca6   : > { %v4540_v53 = vpop.f32.mrb[88].mxu1 }
0x1ca7   : > { %v4541_v23 = vadd.f32 %v9645_v60, %v4540_v53  ;;  %v8780_v15 = vpop.f32.mrb[89].mxu1  ;;  %v9351_v53 = vld [vmem:[#allocation7 + $0x25c] ss:$132 sps:$4 sm:$0xff]  }
0x1ca8   : > { %v4543_v25 = vpop.f32.mrb[90].mxu1  ;;  %v9352_v15 = vld [vmem:[#allocation7 + $0x364] ss:$132 sps:$4 sm:$0xff]  }
0x1ca9   : > { %v8781_v26 = vpop.f32.mrb[91].mxu1  ;;  %v4555_v27 = vsel %vm1090_vm5, %v4541_v23, -inf  ;;  %v9353_v25 = vld [vmem:[#allocation7 + $0x46c] ss:$132 sps:$4 sm:$0xff]  }
0x1caa   : > { %4556 = vmax.xlane.f32.xlu0 %v4555_v27  ;;  %v9354_v26 = vld [vmem:[#allocation7 + $0x574] ss:$132 sps:$4 sm:$0xff]   ;;  %v9355_v27 = vld [vmem:[#allocation7 + $0x67c] ss:$132 sps:$4 sm:$0xff]  }
0x1cab   : > { %4345 = vrot.lane.b32.xlu1 %v10508_v45, %s9856_s11 }
0x1cb4   : > { %v4548_v22 = vpop.xlane.xlu0 %4547 }
0x1cb5   : > { %v4558_v24 = vsub.f32 %v4403_v61, %v4548_v22 }
0x1cb7   : > { %v4562_v28 = vmul.f32 1.442695, %v4558_v24 }
0x1cb9   : > { %9585 = vpow2.f32 %v4562_v28 }
0x1cc3   : > { %v9586_v30 = vpop.eup %9585 }
0x1cc4   : > { %v4570_v31 = vsel %vm1090_vm5, %v9586_v30, 0.0 }
0x1ccf   : > { %4571 = vadd.xlane.f32.xlu1 %v4570_v31  ;;  %v9356_v31 = vld [vmem:[#allocation7 + $0x784] ss:$132 sps:$4 sm:$0xff]  }
0x1d27   : > { %v4551_v40 = vpop.xlane.xlu1 %4550 }
0x1d28   : > { %v4559_v33 = vsub.f32 %v4449_v6, %v4551_v40 }
0x1d2a   : > { %v4564_v34 = vmul.f32 1.442695, %v4559_v33 }
0x1d2b   : > { %v4346_v35 = vpop.permute.xlu1 %4345 }
0x1d2c   : > { %9587 = vpow2.f32 %v4564_v34  ;;  %v4595_v36 = vpack.c.bf16 %v4346_v35, %v4346_v35 }
0x1d2e   : > { %v4648_v21 = vsel %vm1146_vm4, %v4595_v36, 0 }
0x1d2f   : > { %8789 = vmatpush3.bf16.msra.mxu1 %v4648_v21  ;;  %v4554_v37 = vpop.xlane.xlu0 %4553 }
0x1d30   : > { %v4560_v38 = vsub.f32 %v4495_v11, %v4554_v37  ;;  %8800 = vmatprep.subr.bf16.mxu1 %v9854_v1  ;;  %v9349_v11 = vld [vmem:[#allocation7 + $0x4c] ss:$132 sps:$4 sm:$0xff]  }
0x1d32   : > { %v4566_v39 = vmul.f32 1.442695, %v4560_v38 }
0x1d34   : > { %9589 = vpow2.f32 %v4566_v39 }
0x1d36   : > { %v9588_v41 = vpop.eup %9587 }
0x1d37   : > { %v4557_v42 = vpop.xlane.xlu0 %4556  ;;  %v4573_v43 = vsel %vm1090_vm5, %v9588_v41, 0.0 }
0x1d38   : > { %v4561_v44 = vsub.f32 %v4541_v23, %v4557_v42  ;;  %4574 = vadd.xlane.f32.xlu0 %v4573_v43 }
0x1d3a   : > { %v4568_v48 = vmul.f32 1.442695, %v4561_v44 }
0x1d3c   : > { %9591 = vpow2.f32 %v4568_v48 }
0x1d3e   : > { %v9590_v49 = vpop.eup %9589 }
0x1d3f   : > { %v4576_v50 = vsel %vm1090_vm5, %v9590_v49, 0.0 }
0x1d40   : > { %4577 = vadd.xlane.f32.xlu1 %v4576_v50  ;;  %v7949_v50 = vld [vmem:[#allocation10 + $0x1d] ss:$0 sm:$0xff] }
0x1d46   : > { %v9592_v51 = vpop.eup %9591 }
0x1d47   : > { %v4579_v52 = vsel %vm1090_vm5, %v9592_v51, 0.0 }
0x1d48   : > { %4580 = vadd.xlane.f32.xlu0 %v4579_v52 }
0x1d51   : > { %4351 = vrot.lane.b32.xlu1 %v10508_v45, %s9858_s12 }
0x1d5c   : > { %v4572_v54 = vpop.xlane.xlu1 %4571 }
0x1d5d   : > { %9593 = vrcp.f32 %v4572_v54 }
0x1d5e   : > { %4348 = vrot.lane.b32.xlu0 %v10508_v45, %s9857_s18 }
0x1d67   : > { %v9594_v55 = vpop.eup %9593 }
0x1d68   : > { %v4583_v20 = vmul.f32 %v9594_v55, %v9586_v30 }
0x1d6a   : > { %v4590_v56 = vpack.c.bf16 %v4583_v20, %v4583_v20 }
0x1d6c   : > { %8785 = vmatmul.mubr.msk.bf16.vlgmr.msra.gmra.mrb[88].mxu0 %vm1090_vm5, %v4590_v56 }
0x1d6d   : > { %8796 = vmatprep.mubr.msk.bf16.mxu0 %vm9855_vm0, %v9854_v1 }
0x1dc5   : > { %v4575_v10 = vpop.xlane.xlu0 %4574 }
0x1dc6   : > { %9595 = vrcp.f32 %v4575_v10  ;;  %v9357_v10 = vld [vmem:[#allocation7 + $0x50] ss:$132 sps:$4 sm:$0xff]  }
0x1dcd   : > { %v4578_v57 = vpop.xlane.xlu1 %4577 }
0x1dce   : > { %9597 = vrcp.f32 %v4578_v57  ;;  %v9359_v57 = vld [vmem:[#allocation7 + $0x54] ss:$132 sps:$4 sm:$0xff]  }
0x1dd0   : > { %v9596_v58 = vpop.eup %9595 }
0x1dd1   : > { %v4585_v59 = vmul.f32 %v9596_v58, %v9588_v41  ;;  %v4352_v60 = vpop.permute.xlu1 %4351  ;;  %v9362_v58 = vld [vmem:[#allocation7 + $0x15c] ss:$132 sps:$4 sm:$0xff]  }
0x1dd2   : > { %v4597_v61 = vpack.c.bf16 %v4352_v60, %v4352_v60  ;;  %v9365_v60 = vld [vmem:[#allocation7 + $0x264] ss:$132 sps:$4 sm:$0xff]  }
0x1dd3   : > { %v4591_v62 = vpack.c.bf16 %v4585_v59, %v4585_v59  ;;  %v9360_v59 = vld [vmem:[#allocation7 + $0x158] ss:$132 sps:$4 sm:$0xff]  }
0x1dd4   : > { %v4740_v63 = vsel %vm1146_vm4, %v4597_v61, 0  ;;  %v9363_v61 = vld [vmem:[#allocation7 + $0x260] ss:$132 sps:$4 sm:$0xff]  }
0x1dd5   : > { %8791 = vmatmul.mubr.msk.bf16.vlgmr.msra.gmra.mrb[92].mxu1 %vm1090_vm5, %v4591_v62  ;;  %v4581_v45 = vpop.xlane.xlu0 %4580 }
0x1dd6   : > { %8801 = vmatpush3.bf16.msra.mxu1 %v4740_v63  ;;  %9599 = vrcp.f32 %v4581_v45  ;;  %8802 = vmatprep.mubr.msk.bf16.mxu1 %vm9855_vm0, %v9854_v1 }
0x1dd7   : > { %5046 = vmatprep.subr.bf16.mxu1 %v9359_v57 }
0x1dd8   : > { %v9598_v2 = vpop.eup %9597 }
0x1dd9   : > { %v4349_v3 = vpop.permute.xlu0 %4348  ;;  %v4587_v4 = vmul.f32 %v9598_v2, %v9590_v49 }
0x1dda   : > { %v4596_v6 = vpack.c.bf16 %v4349_v3, %v4349_v3  ;;  %v9368_v3 = vld [vmem:[#allocation7 + $0x36c] ss:$132 sps:$4 sm:$0xff]  }
0x1ddb   : > { %v4592_v8 = vpack.c.bf16 %v4587_v4, %v4587_v4  ;;  %v9371_v4 = vld [vmem:[#allocation7 + $0x474] ss:$132 sps:$4 sm:$0xff]  }
0x1ddc   : > { %v4694_v7 = vsel %vm1146_vm4, %v4596_v6, 0  ;;  %v9369_v6 = vld [vmem:[#allocation7 + $0x470] ss:$132 sps:$4 sm:$0xff]  }
0x1ddd   : > { %8795 = vmatpush3.bf16.msra.mxu0 %v4694_v7  ;;  %v9374_v7 = vld [vmem:[#allocation7 + $0x57c] ss:$132 sps:$4 sm:$0xff]  }
0x1dde   : > { %8806 = vmatprep.subr.bf16.mxu0 %v9854_v1 }
0x1de0   : > { %v9600_v9 = vpop.eup %9599  ;;  %8797 = vmatmul.mubr.msk.bf16.vlgmr.msra.gmra.mrb[92].mxu0 %vm1090_vm5, %v4592_v8  ;;  %v9372_v8 = vld [vmem:[#allocation7 + $0x578] ss:$132 sps:$4 sm:$0xff]  }
0x1de1   : > { %v4589_v32 = vmul.f32 %v9600_v9, %v9592_v51  ;;  %8822 = vmatprep.mubr.msk.bf16.mxu0 %vm9855_vm0, %v9854_v1  ;;  %8807 = vmatpush3.bf16.msra.mxu0 %v9349_v11  ;;  %v9377_v9 = vld [vmem:[#allocation7 + $0x684] ss:$132 sps:$4 sm:$0xff]  }
0x1de2   : > { %8808 = vmatprep.subr.bf16.mxu0 %v9854_v1  ;;  %v9378_v11 = vld [vmem:[#allocation7 + $0x788] ss:$132 sps:$4 sm:$0xff]  }
0x1de3   : > { %v4593_v29 = vpack.c.bf16 %v4589_v32, %v4589_v32  ;;  %v9375_v32 = vld [vmem:[#allocation7 + $0x680] ss:$132 sps:$4 sm:$0xff]  }
0x1de5   : > { %8803 = vmatmul.mubr.msk.bf16.vlgmr.msra.gmra.mrb[96].mxu1 %vm1090_vm5, %v4593_v29  ;;  %8809 = vmatpush3.bf16.msra.mxu0 %v9350_v12  ;;  %v9380_v29 = vld [vmem:[#allocation7 + $0x78c] ss:$132 sps:$4 sm:$0xff]   ;;  %v9381_v12 = vld [vmem:[#allocation9 + $0x108] ss:$16 sps:$4 sm:$0xff]  }
0x1de6   : > { %5078 = vmatprep.mubr.bf16.mxu1 %v9853_v0  ;;  %8810 = vmatprep.subr.bf16.mxu0 %v9854_v1 }
0x1de7   : > { %5047 = vmatpush1.bf16.msra.mxu1 %v9357_v10 }
0x1de8   : > { %5048 = vmatprep.subr.bf16.mxu1 %v9362_v58 }
0x1de9   : > { %8811 = vmatpush3.bf16.msra.mxu0 %v9351_v53  ;;  %v9385_v53 = vld [vmem:[#allocation9 + $0x148] ss:$16 sps:$4 sm:$0xff]  }
0x1dea   : > { %8812 = vmatprep.subr.bf16.mxu0 %v9854_v1 }
0x1deb   : > { %5049 = vmatpush1.bf16.msra.mxu1 %v9360_v59  ;;  %v7976_v59 = vld [vmem:[#allocation10 + $0x20] ss:$0 sm:$0xff] }
0x1dec   : > { %5050 = vmatprep.subr.bf16.mxu1 %v9365_v60 }
0x1ded   : > { %8813 = vmatpush3.bf16.msra.mxu0 %v9352_v15  ;;  %v9387_v15 = vld [vmem:[#allocation9 + $0x168] ss:$16 sps:$4 sm:$0xff]  }
0x1dee   : > { %8814 = vmatprep.subr.bf16.mxu0 %v9854_v1 }
0x1def   : > { %5051 = vmatpush1.bf16.msra.mxu1 %v9363_v61 }
0x1df0   : > { %5052 = vmatprep.subr.bf16.mxu1 %v9368_v3  ;;  %v9397_v3 = vld [vmem:[#allocation7 + $0x58] ss:$132 sps:$4 sm:$0xff]  }
0x1df1   : > { %8815 = vmatpush3.bf16.msra.mxu0 %v9353_v25  ;;  %v9388_v25 = vld [vmem:[#allocation9 + $0x68] ss:$16 sps:$4 sm:$0xff]  }
0x1df2   : > { %8816 = vmatprep.subr.bf16.mxu0 %v9854_v1 }
0x1df5   : > { %8817 = vmatpush3.bf16.msra.mxu0 %v9354_v26  ;;  %v9389_v26 = vld [vmem:[#allocation9 + $0x188] ss:$16 sps:$4 sm:$0xff]  }
0x1df6   : > { %8818 = vmatprep.subr.bf16.mxu0 %v9854_v1 }
0x1df9   : > { %8819 = vmatpush3.bf16.msra.mxu0 %v9355_v27  ;;  %v9390_v27 = vld [vmem:[#allocation9 + $0x88] ss:$16 sps:$4 sm:$0xff]  }
0x1dfa   : > { %8820 = vmatprep.subr.bf16.mxu0 %v9854_v1 }
0x1dfd   : > { %8821 = vmatpush3.bf16.msra.mxu0 %v9356_v31 }
0x1dfe   : > { %8323 = vmatprep.subr.bf16.mxu0 %v9381_v12 }
0x1e3f   : > { %v4638_v13 = vpop.f32.mrb[88].mxu0 }
0x1e40   : > { %v8786_v16 = vpop.f32.mrb[89].mxu0 }
0x1e41   : > { %v4641_v17 = vpop.f32.mrb[90].mxu0  ;;  %v9383_v16 = vld [vmem:[#allocation9 + $0x128] ss:$16 sps:$4 sm:$0xff]  }
0x1e42   : > { %v8787_v23 = vpop.f32.mrb[91].mxu0  ;;  %v9384_v17 = vld [vmem:[#allocation9 + $0x28] ss:$16 sps:$4 sm:$0xff]  }
0x1e43   : > { %v9386_v23 = vld [vmem:[#allocation9 + $0x48] ss:$16 sps:$4 sm:$0xff]  }
0x1ea8   : > { %v4684_v22 = vpop.f32.mrb[92].mxu1 }
0x1ea9   : > { %4783 = vrot.lane.b32.xlu1 %v4684_v22, %s9858_s12  ;;  %v8792_v24 = vpop.f32.mrb[93].mxu1  ;;  %v9391_v22 = vld [vmem:[#allocation9 + $0x1a8] ss:$16 sps:$4 sm:$0xff]  }
0x1eaa   : > { %v4687_v28 = vpop.f32.mrb[94].mxu1  ;;  %v9392_v24 = vld [vmem:[#allocation9 + $0xa8] ss:$16 sps:$4 sm:$0xff]  }
0x1eab   : > { %v8793_v30 = vpop.f32.mrb[95].mxu1 }
0x1eb3   : > { %v4730_v40 = vpop.f32.mrb[92].mxu0 }
0x1eb4   : > { %4787 = vrot.lane.b32.xlu0 %v4730_v40, %s9857_s18  ;;  %v8798_v33 = vpop.f32.mrb[93].mxu0 }
0x1eb5   : > { %v4733_v34 = vpop.f32.mrb[94].mxu0  ;;  %v7958_v33 = vld [vmem:[#allocation10 + $0x23] ss:$0 sm:$0xff] }
0x1eb6   : > { %v8799_v35 = vpop.f32.mrb[95].mxu0 }
0x1eb7   : > { %v7959_v35 = vld [vmem:[#allocation10 + $0x24] ss:$0 sm:$0xff] }
0x1eb8   : > { %v4776_v36 = vpop.f32.mrb[96].mxu1 }
0x1eb9   : > { %4791 = vrot.lane.b32.xlu1 %v4776_v36, %s9856_s11  ;;  %v8804_v21 = vpop.f32.mrb[97].mxu1 }
0x1eba   : > { %v4779_v37 = vpop.f32.mrb[98].mxu1 }
0x1ebb   : > { %v8805_v38 = vpop.f32.mrb[99].mxu1 }
0x1ebc   : > { %v9393_v38 = vld [vmem:[#allocation9 + $0x1c8] ss:$16 sps:$4 sm:$0xff]  }
0x1f1b   : > { %v4784_v39 = vpop.permute.xlu1 %4783 }
0x1f1c   : > { %v4794_v42 = vsel %vm905_vm3, %v4638_v13, %v4784_v39  ;;  %v9382_v13 = vld [vmem:[#allocation9 + $0x8] ss:$16 sps:$4 sm:$0xff]  }
0x1f1d   : > { %v9394_v39 = vld [vmem:[#allocation9 + $0xc8] ss:$16 sps:$4 sm:$0xff]  }
0x1f26   : > { %v4788_v41 = vpop.permute.xlu0 %4787 }
0x1f27   : > { %v4795_v43 = vsel %vm1341_vm6, %v4794_v42, %v4788_v41  ;;  %v9395_v41 = vld [vmem:[#allocation9 + $0x1e8] ss:$16 sps:$4 sm:$0xff]  }
0x1f28   : > { %v9396_v42 = vld [vmem:[#allocation9 + $0xe8] ss:$16 sps:$4 sm:$0xff]  }
0x1f2b   : > { %v4792_v44 = vpop.permute.xlu1 %4791 }
0x1f2c   : > { %v4796_v48 = vsel %vm558_vm2, %v4795_v43, %v4792_v44  ;;  %v4954_v43 = vld [vmem:[#allocation10 + $0x1e] sm:$0x3] }
0x1f2d   : > { %v4813_v49 = vpack.c.bf16 %v4796_v48, %v4796_v48  ;;  %v4959_v44 = vrot.slane %v4954_v43, %v10141_v46  ;;  %v4963_v48 = vrot.slane %v4954_v43, %v10144_v47 }
0x1f2f   : > { %8823 = vmatmul.mubr.bf16.vlgmr.msra.gmra.mrb[96].mxu0 %v4813_v49 }
0x1f30   : > { %8324 = vmatpush3.bf16.msra.mxu0 %v9382_v13 }
0x1f31   : > { %8325 = vmatprep.subr.bf16.mxu0 %v9383_v16  ;;  %v9408_v16 = vld [vmem:[#allocation7 + $0x270] ss:$132 sps:$4 sm:$0xff]  }
0x1f34   : > { %8326 = vmatpush3.bf16.msra.mxu0 %v9384_v17  ;;  %v9411_v17 = vld [vmem:[#allocation7 + $0x374] ss:$132 sps:$4 sm:$0xff]  }
0x1f35   : > { %8327 = vmatprep.subr.bf16.mxu0 %v9385_v53  ;;  %v9409_v53 = vld [vmem:[#allocation7 + $0x370] ss:$132 sps:$4 sm:$0xff]  }
0x1f38   : > { %8328 = vmatpush3.bf16.msra.mxu0 %v9386_v23  ;;  %v9412_v23 = vld [vmem:[#allocation7 + $0x378] ss:$132 sps:$4 sm:$0xff]  }
0x1f39   : > { %8329 = vmatprep.subr.bf16.mxu0 %v9387_v15  ;;  %v9415_v15 = vld [vmem:[#allocation7 + $0x47c] ss:$132 sps:$4 sm:$0xff]  }
0x1f3c   : > { %8330 = vmatpush3.bf16.msra.mxu0 %v9388_v25  ;;  %v9413_v25 = vld [vmem:[#allocation7 + $0x478] ss:$132 sps:$4 sm:$0xff]  }
0x1f3d   : > { %8331 = vmatprep.subr.bf16.mxu0 %v9389_v26  ;;  %v9416_v26 = vld [vmem:[#allocation7 + $0x480] ss:$132 sps:$4 sm:$0xff]  }
0x1f40   : > { %8332 = vmatpush3.bf16.msra.mxu0 %v9390_v27  ;;  %v9419_v27 = vld [vmem:[#allocation7 + $0x584] ss:$132 sps:$4 sm:$0xff]  }
0x1f41   : > { %8333 = vmatprep.subr.bf16.mxu0 %v9391_v22  ;;  %v9417_v22 = vld [vmem:[#allocation7 + $0x580] ss:$132 sps:$4 sm:$0xff]  }
0x1f44   : > { %8334 = vmatpush3.bf16.msra.mxu0 %v9392_v24  ;;  %v9420_v24 = vld [vmem:[#allocation7 + $0x588] ss:$132 sps:$4 sm:$0xff]  }
0x1f45   : > { %8335 = vmatprep.subr.bf16.mxu0 %v9393_v38  ;;  %v7993_v38 = vld [vmem:[#allocation10 + $0x25] ss:$0 sm:$0xff] }
0x1f48   : > { %8336 = vmatpush3.bf16.msra.mxu0 %v9394_v39 }
0x1f49   : > { %8337 = vmatprep.subr.bf16.mxu0 %v9395_v41  ;;  %v7994_v41 = vld [vmem:[#allocation10 + $0x26] ss:$0 sm:$0xff] }
0x1f4c   : > { %8338 = vmatpush3.bf16.msra.mxu0 %v9396_v42 }
0x1f4d   : > { %8826 = vmatprep.subr.bf16.mxu0 %v9854_v1 }
0x2002   : > { %v4903_v51 = vpop.f32.mrb[96].mxu0 }
0x2003   : > { %v4904_v52 = vadd.f32 %v7949_v50, %v4903_v51  ;;  %v8824_v54 = vpop.f32.mrb[97].mxu0 }
0x2004   : > { %v4906_v55 = vpop.f32.mrb[98].mxu0 }
0x2005   : > { %v8825_v20 = vpop.f32.mrb[99].mxu0  ;;  %v4909_v56 = vadd.f32 %v4904_v52, %v10498_v19  ;;  %v9366_v19 = vld [vmem:[#allocation7 + $0x368] ss:$132 sps:$4 sm:$0xff]  }
0x2006   : > { %5053 = vmatpush1.bf16.msra.mxu1 %v9366_v19  ;;  %v9399_v19 = vld [vmem:[#allocation7 + $0x5c] ss:$132 sps:$4 sm:$0xff]  }
0x2007   : > { %4912 = vadd.xlane.f32.xlu0 %v4909_v56  ;;  %5054 = vmatprep.subr.bf16.mxu1 %v9371_v4  ;;  %v9400_v4 = vld [vmem:[#allocation7 + $0x60] ss:$132 sps:$4 sm:$0xff]  }
0x200a   : > { %5055 = vmatpush1.bf16.msra.mxu1 %v9369_v6  ;;  %v9403_v6 = vld [vmem:[#allocation7 + $0x164] ss:$132 sps:$4 sm:$0xff]  }
0x200b   : > { %5056 = vmatprep.subr.bf16.mxu1 %v9374_v7  ;;  %v9404_v7 = vld [vmem:[#allocation7 + $0x168] ss:$132 sps:$4 sm:$0xff]  }
0x200e   : > { %5057 = vmatpush1.bf16.msra.mxu1 %v9372_v8  ;;  %v9401_v8 = vld [vmem:[#allocation7 + $0x160] ss:$132 sps:$4 sm:$0xff]  }
0x200f   : > { %5058 = vmatprep.subr.bf16.mxu1 %v9377_v9  ;;  %v9407_v9 = vld [vmem:[#allocation7 + $0x26c] ss:$132 sps:$4 sm:$0xff]  }
0x2012   : > { %5059 = vmatpush1.bf16.msra.mxu1 %v9375_v32  ;;  %v9405_v32 = vld [vmem:[#allocation7 + $0x268] ss:$132 sps:$4 sm:$0xff]  }
0x2013   : > { %5060 = vmatprep.subr.bf16.mxu1 %v9380_v29 }
0x2016   : > { %5061 = vmatpush1.bf16.msra.mxu1 %v9378_v11 }
0x2017   : > { %5472 = vmatprep.subr.bf16.mxu1 %v9399_v19 }
0x2094   : > { %v4913_v62 = vpop.xlane.xlu0 %4912 }
0x2095   : > { %v4914_v63 = vmul.f32 0.0078125, %v4913_v62 }
0x2097   : > { %v4915_v45 = vsub.f32 %v4909_v56, %v4914_v63 }
0x2099   : > { %v4916_v2 = vmul.f32 %v4915_v45, %v4915_v45 }
0x209b   : > { %4917 = vadd.xlane.f32.xlu1 %v4916_v2 }
0x2128   : > { %v4918_v28 = vpop.xlane.xlu1 %4917 }
0x2129   : > { %v4919_v30 = vmul.f32 0.0078125, %v4918_v28  ;;  %v9423_v28 = vld [vmem:[#allocation7 + $0x68c] ss:$132 sps:$4 sm:$0xff]  }
0x212b   : > { %v4920_v31 = vadd.f32 1e-05, %v4919_v30  ;;  %v9421_v30 = vld [vmem:[#allocation7 + $0x688] ss:$132 sps:$4 sm:$0xff]  }
0x212d   : > { %9601 = vrsqrt.f32 %v4920_v31  ;;  %v9424_v31 = vld [vmem:[#allocation7 + $0x690] ss:$132 sps:$4 sm:$0xff]  }
0x2137   : > { %v9602_v40 = vpop.eup %9601 }
0x2138   : > { %v4922_v34 = vmul.f32 %v9602_v40, %v4915_v45  ;;  %v9427_v40 = vld [vmem:[#allocation7 + $0x794] ss:$132 sps:$4 sm:$0xff]  }
0x213a   : > { %v4929_v36 = vmul.f32 %v7958_v33, %v4922_v34  ;;  %v9425_v33 = vld [vmem:[#allocation7 + $0x790] ss:$132 sps:$4 sm:$0xff]   ;;  %v9428_v34 = vld [vmem:[#allocation7 + $0x798] ss:$132 sps:$4 sm:$0xff]  }
0x213c   : > { %v4936_v21 = vadd.f32 %v7959_v35, %v4929_v36 }
0x213e   : > { %v4953_v37 = vpack.c.bf16 %v4936_v21, %v4936_v21 }
0x2140   : > { %5079 = vmatmul.mubr.bf16.vlgmr.msra.gmra.mrb[100].mxu1 %v4953_v37 }
0x2141   : > { %5504 = vmatprep.mubr.bf16.mxu1 %v9853_v0  ;;  %5473 = vmatpush1.bf16.msra.mxu1 %v9397_v3 }
0x2142   : > { %5474 = vmatprep.subr.bf16.mxu1 %v9403_v6 }
0x2145   : > { %5475 = vmatpush1.bf16.msra.mxu1 %v9401_v8 }
0x2146   : > { %5476 = vmatprep.subr.bf16.mxu1 %v9407_v9 }
0x2149   : > { %5477 = vmatpush1.bf16.msra.mxu1 %v9405_v32 }
0x214a   : > { %5478 = vmatprep.subr.bf16.mxu1 %v9411_v17 }
0x214d   : > { %5479 = vmatpush1.bf16.msra.mxu1 %v9409_v53 }
0x214e   : > { %5480 = vmatprep.subr.bf16.mxu1 %v9415_v15 }
0x2151   : > { %5481 = vmatpush1.bf16.msra.mxu1 %v9413_v25 }
0x2152   : > { %5482 = vmatprep.subr.bf16.mxu1 %v9419_v27 }
0x2155   : > { %5483 = vmatpush1.bf16.msra.mxu1 %v9417_v22 }
0x2156   : > { %5484 = vmatprep.subr.bf16.mxu1 %v9423_v28 }
0x2159   : > { %5485 = vmatpush1.bf16.msra.mxu1 %v9421_v30 }
0x215a   : > { %5486 = vmatprep.subr.bf16.mxu1 %v9427_v40 }
0x215d   : > { %5487 = vmatpush1.bf16.msra.mxu1 %v9425_v33 }
0x215e   : > { %8846 = vmatprep.subr.bf16.mxu1 %v9854_v1 }
0x2213   : > { %v5080_v49 = vpop.f32.mrb[100].mxu1 }
0x2214   : > { %v5081_v50 = vadd.f32 %v5080_v49, %v4959_v44  ;;  %v5082_v51 = vpop.f32.mrb[101].mxu1 }
0x2215   : > { %v5083_v52 = vadd.f32 %v5082_v51, %v4963_v48  ;;  %v5084_v54 = vpop.f32.mrb[102].mxu1  ;;  %v5327_v48 = vld [vmem:[#allocation10 + $0x27] sm:$0x7] }
0x2216   : > { %v5087_v55 = vmax.f32 %v5081_v50, 0.0  ;;  %v5085_v20 = vpop.f32.mrb[103].mxu1  ;;  %v5332_v49 = vrot.slane %v5327_v48, %v10141_v46  ;;  %v5340_v50 = vrot.slane %v5327_v48, %v10160_v5  ;;  %v5336_v51 = vrot.slane %v5327_v48, %v10144_v47 }
0x2217   : > { %v5088_v56 = vmax.f32 %v5083_v52, 0.0 }
0x2218   : > { %v5121_v57 = vpack.c.bf16 %v5087_v55, %v5087_v55 }
0x2219   : > { %v5122_v10 = vpack.c.bf16 %v5088_v56, %v5088_v56 }
0x221b   : > { %5258 = vmatprep.mubr.bf16.mxu0 %v5122_v10 }
0x221c   : > { %5259 = vmatmul.mubr.bf16.vlgmr.msra.gmra.mrb[100].mxu0 %v5121_v57 }
0x221d   : > { %8842 = vmatprep.mubr.msk.bf16.mxu0 %vm9855_vm0, %v9854_v1  ;;  %8827 = vmatpush3.bf16.msra.mxu0 %v9400_v4 }
0x221e   : > { %8828 = vmatprep.subr.bf16.mxu0 %v9854_v1 }
0x2221   : > { %8829 = vmatpush3.bf16.msra.mxu0 %v9404_v7 }
0x2222   : > { %8830 = vmatprep.subr.bf16.mxu0 %v9854_v1 }
0x2225   : > { %8831 = vmatpush3.bf16.msra.mxu0 %v9408_v16 }
0x2226   : > { %8832 = vmatprep.subr.bf16.mxu0 %v9854_v1 }
0x2229   : > { %8833 = vmatpush3.bf16.msra.mxu0 %v9412_v23 }
0x222a   : > { %8834 = vmatprep.subr.bf16.mxu0 %v9854_v1 }
0x222d   : > { %8835 = vmatpush3.bf16.msra.mxu0 %v9416_v26 }
0x222e   : > { %8836 = vmatprep.subr.bf16.mxu0 %v9854_v1 }
0x2231   : > { %8837 = vmatpush3.bf16.msra.mxu0 %v9420_v24 }
0x2232   : > { %8838 = vmatprep.subr.bf16.mxu0 %v9854_v1 }
0x2235   : > { %8839 = vmatpush3.bf16.msra.mxu0 %v9424_v31 }
0x2236   : > { %8840 = vmatprep.subr.bf16.mxu0 %v9854_v1 }
0x2239   : > { %8841 = vmatpush3.bf16.msra.mxu0 %v9428_v34 }
0x223a   : > { %8870 = vmatprep.subr.bf16.mxu0 %v9854_v1 }
0x22ef   : > { %v8339_v58 = vpop.f32.mrb[100].mxu0 }
0x22f0   : > { %v8340_v60 = vpop.f32.mrb[101].mxu0 }
0x22f1   : > { %v8341_v61 = vadd.f32 %v8340_v60, %v8339_v58  ;;  %v8342_v62 = vpop.f32.mrb[102].mxu0 }
0x22f2   : > { %v8343_v63 = vpop.f32.mrb[103].mxu0 }
0x22f3   : > { %v5261_v45 = vadd.f32 %v8341_v61, %v7976_v59 }
0x22f5   : > { %v5266_v2 = vadd.f32 %v5261_v45, %v4936_v21 }
0x22f7   : > { %5269 = vadd.xlane.f32.xlu0 %v5266_v2 }
0x2384   : > { %v5270_v29 = vpop.xlane.xlu0 %5269 }
0x2385   : > { %v5271_v11 = vmul.f32 0.0078125, %v5270_v29 }
0x2387   : > { %v5272_v12 = vsub.f32 %v5266_v2, %v5271_v11 }
0x2389   : > { %v5273_v13 = vmul.f32 %v5272_v12, %v5272_v12 }
0x238b   : > { %5274 = vadd.xlane.f32.xlu0 %v5273_v13 }
0x2418   : > { %v5275_v35 = vpop.xlane.xlu0 %5274 }
0x2419   : > { %v5276_v36 = vmul.f32 0.0078125, %v5275_v35 }
0x241b   : > { %v5277_v21 = vadd.f32 1e-05, %v5276_v36 }
0x241d   : > { %9603 = vrsqrt.f32 %v5277_v21 }
0x2427   : > { %v9604_v37 = vpop.eup %9603 }
0x2428   : > { %v5279_v39 = vmul.f32 %v9604_v37, %v5272_v12 }
0x242a   : > { %v5286_v42 = vmul.f32 %v7993_v38, %v5279_v39 }
0x242c   : > { %v10600_v43 = vadd.f32 %v7994_v41, %v5286_v42 }
0x242e   : > { %v5326_v44 = vpack.c.bf16 %v10600_v43, %v10600_v43 }
0x2430   : > { %5505 = vmatmul.mubr.bf16.vlgmr.msra.gmra.mrb[104].mxu1 %v5326_v44  ;;  %8843 = vmatmul.mubr.bf16.vlgmr.msra.gmra.mrb[104].mxu0 %v5326_v44 }
0x2431   : > { %8848 = vmatprep.mubr.msk.bf16.mxu1 %vm9855_vm0, %v9854_v1  ;;  %8872 = vmatprep.mubr.msk.bf16.mxu0 %vm9855_vm0, %v9854_v1 }
0x2503   : > { %v5506_v52 = vpop.f32.mrb[104].mxu1  ;;  %v5547_v54 = vpop.f32.mrb[104].mxu0 }
0x2504   : > { %v5507_v55 = vadd.f32 %v5506_v52, %v5332_v49  ;;  %v10611_v20 = vadd.f32 %v5547_v54, %v5340_v50  ;;  %v5508_v56 = vpop.f32.mrb[105].mxu1  ;;  %v8844_v10 = vpop.f32.mrb[105].mxu0 }
0x2505   : > { %v5509_v57 = vadd.f32 %v5508_v56, %v5336_v51  ;;  %v5510_v58 = vpop.f32.mrb[106].mxu1  ;;  %v5550_v59 = vpop.f32.mrb[106].mxu0 }
0x2506   : > { %v5511_v60 = vpop.f32.mrb[107].mxu1  ;;  %v8845_v61 = vpop.f32.mrb[107].mxu0  ;;  %5554 = vrot.lane.b32.xlu0 %v5507_v55, %s9856_s11  ;;  %v5823_v62 = vpack.c.bf16 %v10611_v20, %v10611_v20  ;;  %v5583_v2 = vpack.c.bf16 %v5507_v55, %v5507_v55 }
0x2507   : > { %5564 = vrot.lane.b32.xlu1 %v5509_v57, %s9856_s11  ;;  %v5587_v5 = vpack.c.bf16 %v5509_v57, %v5509_v57 }
0x2508   : > { %v5831_v63 = vsel %vm1146_vm4, %v5823_v62, 0 }
0x2509   : > { %8871 = vmatpush3.bf16.msra.mxu0 %v5831_v63  ;;  %v5595_v45 = vsel %vm905_vm3, %v5587_v5, 0 }
0x250a   : > { %8847 = vmatpush3.bf16.xpose.msra.mxu1 %v5595_v45  ;;  %5570 = vrot.lane.b32.xlu0 %v5509_v57, %s9858_s12 }
0x250b   : > { %5567 = vrot.lane.b32.xlu1 %v5509_v57, %s9857_s18  ;;  %8852 = vmatprep.subr.bf16.mxu1 %v9854_v1 }
0x250c   : > { %8882 = vmatprep.subr.bf16.mxu0 %v9854_v1 }
0x250f   : > { %5557 = vrot.lane.b32.xlu1 %v5507_v55, %s9857_s18 }
0x2511   : > { %8849 = vmatmul.mubr.msk.bf16.vlgmr.msra.gmra.mrb[108].mxu1 %vm905_vm3, %v5583_v2 }
0x2512   : > { %8854 = vmatprep.mubr.msk.bf16.mxu1 %vm9855_vm0, %v9854_v1 }
0x2513   : > { %5560 = vrot.lane.b32.xlu1 %v5507_v55, %s9858_s12 }
0x2578   : > { %v5555_v7 = vpop.permute.xlu0 %5554 }
0x2579   : > { %v5565_v3 = vpop.permute.xlu1 %5564  ;;  %v5584_v9 = vpack.c.bf16 %v5555_v7, %v5555_v7 }
0x257a   : > { %v5588_v19 = vpack.c.bf16 %v5565_v3, %v5565_v3 }
0x257c   : > { %v5641_v4 = vsel %vm905_vm3, %v5588_v19, 0  ;;  %v5571_v29 = vpop.permute.xlu0 %5570 }
0x257d   : > { %v5568_v6 = vpop.permute.xlu1 %5567  ;;  %8853 = vmatpush3.bf16.xpose.msra.mxu1 %v5641_v4  ;;  %v5590_v12 = vpack.c.bf16 %v5571_v29, %v5571_v29 }
0x257e   : > { %8858 = vmatprep.subr.bf16.mxu1 %v9854_v1  ;;  %v5589_v8 = vpack.c.bf16 %v5568_v6, %v5568_v6 }
0x257f   : > { %v5733_v16 = vsel %vm905_vm3, %v5590_v12, 0 }
0x2580   : > { %v5687_v32 = vsel %vm905_vm3, %v5589_v8, 0 }
0x2581   : > { %v5558_v11 = vpop.permute.xlu1 %5557 }
0x2582   : > { %v5585_v13 = vpack.c.bf16 %v5558_v11, %v5558_v11 }
0x2584   : > { %8855 = vmatmul.mubr.msk.bf16.vlgmr.msra.gmra.mrb[112].mxu1 %vm905_vm3, %v5584_v9 }
0x2585   : > { %8859 = vmatpush3.bf16.xpose.msra.mxu1 %v5687_v32  ;;  %8860 = vmatprep.mubr.msk.bf16.mxu1 %vm9855_vm0, %v9854_v1  ;;  %v5561_v17 = vpop.permute.xlu1 %5560 }
0x2586   : > { %8864 = vmatprep.subr.bf16.mxu1 %v9854_v1  ;;  %v5586_v53 = vpack.c.bf16 %v5561_v17, %v5561_v17 }
0x258c   : > { %8861 = vmatmul.mubr.msk.bf16.vlgmr.msra.gmra.mrb[116].mxu1 %vm905_vm3, %v5585_v13 }
0x258d   : > { %8865 = vmatpush3.bf16.xpose.msra.mxu1 %v5733_v16  ;;  %8866 = vmatprep.mubr.msk.bf16.mxu1 %vm9855_vm0, %v9854_v1 }
0x258e   : > { %8876 = vmatprep.subr.bf16.mxu1 %v9854_v1 }
0x2594   : > { %8867 = vmatmul.mubr.msk.bf16.vlgmr.msra.gmra.mrb[120].mxu1 %vm905_vm3, %v5586_v53 }
0x2595   : > { %8878 = vmatprep.mubr.msk.bf16.mxu1 %vm9855_vm0, %v9854_v1 }
0x25e4   : > { %v5631_v23 = vpop.f32.mrb[108].mxu1 }
0x25e5   : > { %v5632_v15 = vadd.f32 %v5631_v23, %v10431_v14  ;;  %v8850_v25 = vpop.f32.mrb[109].mxu1 }
0x25e6   : > { %v5634_v26 = vpop.f32.mrb[110].mxu1 }
0x25e7   : > { %v8851_v27 = vpop.f32.mrb[111].mxu1  ;;  %v5775_v22 = vsel %vm1090_vm5, %v5632_v15, -inf }
0x25e8   : > { %5776 = vmax.xlane.f32.xlu0 %v5775_v22 }
0x2657   : > { %v5677_v24 = vpop.f32.mrb[112].mxu1 }
0x2658   : > { %v5678_v28 = vadd.f32 %v5677_v24, %v10431_v14  ;;  %v8856_v30 = vpop.f32.mrb[113].mxu1 }
0x2659   : > { %v5680_v31 = vpop.f32.mrb[114].mxu1 }
0x265a   : > { %v8857_v40 = vpop.f32.mrb[115].mxu1  ;;  %v5778_v33 = vsel %vm1090_vm5, %v5678_v28, -inf }
0x265b   : > { %5779 = vmax.xlane.f32.xlu1 %v5778_v33  ;;  %v9429_v33 = vld [vmem:[#allocation7 + $0x64] ss:$132 sps:$4 sm:$0xff]  }
0x265f   : > { %v5723_v34 = vpop.f32.mrb[116].mxu1 }
0x2660   : > { %v5724_v35 = vadd.f32 %v5723_v34, %v10431_v14  ;;  %v8862_v36 = vpop.f32.mrb[117].mxu1  ;;  %v9430_v34 = vld [vmem:[#allocation7 + $0x16c] ss:$132 sps:$4 sm:$0xff]  }
0x2661   : > { %v5726_v21 = vpop.f32.mrb[118].mxu1 }
0x2662   : > { %v8863_v37 = vpop.f32.mrb[119].mxu1  ;;  %v5781_v38 = vsel %vm1090_vm5, %v5724_v35, -inf }
0x2663   : > { %5782 = vmax.xlane.f32.xlu0 %v5781_v38  ;;  %v9431_v37 = vld [vmem:[#allocation7 + $0x274] ss:$132 sps:$4 sm:$0xff]  }
0x2667   : > { %v5769_v39 = vpop.f32.mrb[120].mxu1 }
0x2668   : > { %v5770_v41 = vadd.f32 %v5769_v39, %v10431_v14  ;;  %v8868_v42 = vpop.f32.mrb[121].mxu1  ;;  %v9432_v39 = vld [vmem:[#allocation7 + $0x37c] ss:$132 sps:$4 sm:$0xff]  }
0x2669   : > { %v5772_v44 = vpop.f32.mrb[122].mxu1  ;;  %v9434_v42 = vld [vmem:[#allocation7 + $0x58c] ss:$132 sps:$4 sm:$0xff]  }
0x266a   : > { %v8869_v48 = vpop.f32.mrb[123].mxu1  ;;  %v5784_v49 = vsel %vm1090_vm5, %v5770_v41, -inf  ;;  %v9435_v44 = vld [vmem:[#allocation7 + $0x694] ss:$132 sps:$4 sm:$0xff]  }
0x266b   : > { %5785 = vmax.xlane.f32.xlu0 %v5784_v49  ;;  %v9436_v49 = vld [vmem:[#allocation7 + $0x79c] ss:$132 sps:$4 sm:$0xff]  }
0x266c   : > { %5574 = vrot.lane.b32.xlu1 %v10611_v20, %s9856_s11 }
0x2675   : > { %v5777_v50 = vpop.xlane.xlu0 %5776 }
0x2676   : > { %v5787_v51 = vsub.f32 %v5632_v15, %v5777_v50 }
0x2678   : > { %v5791_v52 = vmul.f32 1.442695, %v5787_v51 }
0x267a   : > { %9605 = vpow2.f32 %v5791_v52 }
0x2684   : > { %v9606_v54 = vpop.eup %9605 }
0x2685   : > { %v5799_v55 = vsel %vm1090_vm5, %v9606_v54, 0.0 }
0x2690   : > { %5800 = vadd.xlane.f32.xlu1 %v5799_v55 }
0x26e8   : > { %v5780_v56 = vpop.xlane.xlu1 %5779 }
0x26e9   : > { %v5788_v10 = vsub.f32 %v5678_v28, %v5780_v56 }
0x26eb   : > { %v5793_v14 = vmul.f32 1.442695, %v5788_v10 }
0x26ec   : > { %v5575_v57 = vpop.permute.xlu1 %5574 }
0x26ed   : > { %9607 = vpow2.f32 %v5793_v14  ;;  %v5824_v58 = vpack.c.bf16 %v5575_v57, %v5575_v57 }
0x26ef   : > { %v5877_v59 = vsel %vm1146_vm4, %v5824_v58, 0 }
0x26f0   : > { %8877 = vmatpush3.bf16.msra.mxu1 %v5877_v59  ;;  %v5783_v60 = vpop.xlane.xlu0 %5782 }
0x26f1   : > { %v5789_v61 = vsub.f32 %v5724_v35, %v5783_v60  ;;  %8888 = vmatprep.subr.bf16.mxu1 %v9854_v1 }
0x26f3   : > { %v5795_v62 = vmul.f32 1.442695, %v5789_v61 }
0x26f5   : > { %9609 = vpow2.f32 %v5795_v62 }
0x26f7   : > { %v9608_v5 = vpop.eup %9607 }
0x26f8   : > { %v5786_v63 = vpop.xlane.xlu0 %5785  ;;  %v5802_v45 = vsel %vm1090_vm5, %v9608_v5, 0.0 }
0x26f9   : > { %v5790_v2 = vsub.f32 %v5770_v41, %v5786_v63  ;;  %5803 = vadd.xlane.f32.xlu0 %v5802_v45  ;;  %v9433_v41 = vld [vmem:[#allocation7 + $0x484] ss:$132 sps:$4 sm:$0xff]  }
0x26fb   : > { %v5797_v3 = vmul.f32 1.442695, %v5790_v2 }
0x26fd   : > { %9611 = vpow2.f32 %v5797_v3  ;;  %v9437_v3 = vld [vmem:[#allocation7 + $0x6c] ss:$132 sps:$4 sm:$0xff]  }
0x26ff   : > { %v9610_v19 = vpop.eup %9609 }
0x2700   : > { %v5805_v4 = vsel %vm1090_vm5, %v9610_v19, 0.0 }
0x2701   : > { %5806 = vadd.xlane.f32.xlu1 %v5805_v4  ;;  %v9442_v4 = vld [vmem:[#allocation7 + $0x178] ss:$132 sps:$4 sm:$0xff]  }
0x2707   : > { %v9612_v6 = vpop.eup %9611 }
0x2708   : > { %v5808_v7 = vsel %vm1090_vm5, %v9612_v6, 0.0 }
0x2709   : > { %5809 = vadd.xlane.f32.xlu0 %v5808_v7  ;;  %v9445_v7 = vld [vmem:[#allocation7 + $0x280] ss:$132 sps:$4 sm:$0xff]  }
0x2712   : > { %5580 = vrot.lane.b32.xlu1 %v10611_v20, %s9858_s12 }
0x271d   : > { %v5801_v8 = vpop.xlane.xlu1 %5800 }
0x271e   : > { %9613 = vrcp.f32 %v5801_v8  ;;  %v9443_v8 = vld [vmem:[#allocation7 + $0x27c] ss:$132 sps:$4 sm:$0xff]  }
0x271f   : > { %5577 = vrot.lane.b32.xlu0 %v10611_v20, %s9857_s18 }
0x2728   : > { %v9614_v9 = vpop.eup %9613 }
0x2729   : > { %v5812_v32 = vmul.f32 %v9614_v9, %v9606_v54  ;;  %v9439_v54 = vld [vmem:[#allocation7 + $0x70] ss:$132 sps:$4 sm:$0xff]   ;;  %v9448_v9 = vld [vmem:[#allocation7 + $0x388] ss:$132 sps:$4 sm:$0xff]  }
0x272b   : > { %v5819_v29 = vpack.c.bf16 %v5812_v32, %v5812_v32  ;;  %v9446_v32 = vld [vmem:[#allocation7 + $0x384] ss:$132 sps:$4 sm:$0xff]  }
0x272d   : > { %8873 = vmatmul.mubr.msk.bf16.vlgmr.msra.gmra.mrb[108].mxu0 %vm1090_vm5, %v5819_v29  ;;  %v9451_v29 = vld [vmem:[#allocation7 + $0x490] ss:$132 sps:$4 sm:$0xff]  }
0x272e   : > { %8884 = vmatprep.mubr.msk.bf16.mxu0 %vm9855_vm0, %v9854_v1 }
0x2786   : > { %v5804_v11 = vpop.xlane.xlu0 %5803 }
0x2787   : > { %9615 = vrcp.f32 %v5804_v11  ;;  %v9449_v11 = vld [vmem:[#allocation7 + $0x48c] ss:$132 sps:$4 sm:$0xff]  }
0x278e   : > { %v5807_v12 = vpop.xlane.xlu1 %5806 }
0x278f   : > { %9617 = vrcp.f32 %v5807_v12  ;;  %v9454_v12 = vld [vmem:[#allocation7 + $0x598] ss:$132 sps:$4 sm:$0xff]  }
0x2791   : > { %v9616_v13 = vpop.eup %9615 }
0x2792   : > { %v5814_v16 = vmul.f32 %v9616_v13, %v9608_v5  ;;  %v5581_v17 = vpop.permute.xlu1 %5580  ;;  %v9452_v13 = vld [vmem:[#allocation7 + $0x594] ss:$132 sps:$4 sm:$0xff]  }
0x2793   : > { %v5826_v53 = vpack.c.bf16 %v5581_v17, %v5581_v17  ;;  %v9455_v17 = vld [vmem:[#allocation7 + $0x69c] ss:$132 sps:$4 sm:$0xff]  }
0x2794   : > { %v5820_v23 = vpack.c.bf16 %v5814_v16, %v5814_v16  ;;  %v9457_v16 = vld [vmem:[#allocation7 + $0x6a0] ss:$132 sps:$4 sm:$0xff]  }
0x2795   : > { %v5969_v15 = vsel %vm1146_vm4, %v5826_v53, 0  ;;  %v9460_v53 = vld [vmem:[#allocation7 + $0x7a8] ss:$132 sps:$4 sm:$0xff]  }
0x2796   : > { %8879 = vmatmul.mubr.msk.bf16.vlgmr.msra.gmra.mrb[124].mxu1 %vm1090_vm5, %v5820_v23  ;;  %v5810_v20 = vpop.xlane.xlu0 %5809  ;;  %v9458_v23 = vld [vmem:[#allocation7 + $0x7a4] ss:$132 sps:$4 sm:$0xff]  }
0x2797   : > { %8889 = vmatpush3.bf16.msra.mxu1 %v5969_v15  ;;  %9619 = vrcp.f32 %v5810_v20  ;;  %8890 = vmatprep.mubr.msk.bf16.mxu1 %vm9855_vm0, %v9854_v1  ;;  %v8027_v15 = vld [vmem:[#allocation10 + $0x2a] ss:$0 sm:$0xff] }
0x2798   : > { %8914 = vmatprep.subr.bf16.mxu1 %v9854_v1 }
0x2799   : > { %v9618_v25 = vpop.eup %9617 }
0x279a   : > { %v5578_v26 = vpop.permute.xlu0 %5577  ;;  %v5816_v27 = vmul.f32 %v9618_v25, %v9610_v19 }
0x279b   : > { %v5825_v22 = vpack.c.bf16 %v5578_v26, %v5578_v26 }
0x279c   : > { %v5821_v28 = vpack.c.bf16 %v5816_v27, %v5816_v27 }
0x279d   : > { %v5923_v24 = vsel %vm1146_vm4, %v5825_v22, 0 }
0x279e   : > { %8883 = vmatpush3.bf16.msra.mxu0 %v5923_v24 }
0x279f   : > { %8894 = vmatprep.subr.bf16.mxu0 %v9854_v1 }
0x27a1   : > { %v9620_v30 = vpop.eup %9619  ;;  %8885 = vmatmul.mubr.msk.bf16.vlgmr.msra.gmra.mrb[112].mxu0 %vm1090_vm5, %v5821_v28  ;;  %v6294_v28 = vld [vmem:[#allocation10 + $0x2c] sm:$0x3] }
0x27a2   : > { %v5818_v31 = vmul.f32 %v9620_v30, %v9612_v6  ;;  %8910 = vmatprep.mubr.msk.bf16.mxu0 %vm9855_vm0, %v9854_v1  ;;  %8895 = vmatpush3.bf16.msra.mxu0 %v9429_v33  ;;  %v9440_v6 = vld [vmem:[#allocation7 + $0x174] ss:$132 sps:$4 sm:$0xff]   ;;  %v6299_v30 = vrot.slane %v6294_v28, %v10141_v46 }
0x27a3   : > { %8896 = vmatprep.subr.bf16.mxu0 %v9854_v1 }
0x27a4   : > { %v5822_v40 = vpack.c.bf16 %v5818_v31, %v5818_v31  ;;  %v6303_v31 = vrot.slane %v6294_v28, %v10144_v47 }
0x27a6   : > { %8891 = vmatmul.mubr.msk.bf16.vlgmr.msra.gmra.mrb[128].mxu1 %vm1090_vm5, %v5822_v40  ;;  %8897 = vmatpush3.bf16.msra.mxu0 %v9430_v34  ;;  %v9461_v34 = vld [vmem:[#allocation7 + $0x68] ss:$132 sps:$4 sm:$0xff]  }
0x27a7   : > { %8930 = vmatprep.mubr.msk.bf16.mxu1 %vm9855_vm0, %v9854_v1  ;;  %8898 = vmatprep.subr.bf16.mxu0 %v9854_v1 }
0x27a8   : > { %8915 = vmatpush3.bf16.msra.mxu1 %v9461_v34 }
0x27a9   : > { %8916 = vmatprep.subr.bf16.mxu1 %v9854_v1 }
0x27aa   : > { %8899 = vmatpush3.bf16.msra.mxu0 %v9431_v37  ;;  %v9462_v37 = vld [vmem:[#allocation7 + $0x170] ss:$132 sps:$4 sm:$0xff]  }
0x27ab   : > { %8900 = vmatprep.subr.bf16.mxu0 %v9854_v1 }
0x27ac   : > { %8917 = vmatpush3.bf16.msra.mxu1 %v9462_v37 }
0x27ad   : > { %8918 = vmatprep.subr.bf16.mxu1 %v9854_v1 }
0x27ae   : > { %8901 = vmatpush3.bf16.msra.mxu0 %v9432_v39  ;;  %v9463_v39 = vld [vmem:[#allocation7 + $0x278] ss:$132 sps:$4 sm:$0xff]  }
0x27af   : > { %8902 = vmatprep.subr.bf16.mxu0 %v9854_v1 }
0x27b0   : > { %8919 = vmatpush3.bf16.msra.mxu1 %v9463_v39 }
0x27b1   : > { %8920 = vmatprep.subr.bf16.mxu1 %v9854_v1 }
0x27b2   : > { %8903 = vmatpush3.bf16.msra.mxu0 %v9433_v41  ;;  %v9464_v41 = vld [vmem:[#allocation7 + $0x380] ss:$132 sps:$4 sm:$0xff]  }
0x27b3   : > { %8904 = vmatprep.subr.bf16.mxu0 %v9854_v1 }
0x27b4   : > { %8921 = vmatpush3.bf16.msra.mxu1 %v9464_v41 }
0x27b5   : > { %8922 = vmatprep.subr.bf16.mxu1 %v9854_v1 }
0x27b6   : > { %8905 = vmatpush3.bf16.msra.mxu0 %v9434_v42 }
0x27b7   : > { %8906 = vmatprep.subr.bf16.mxu0 %v9854_v1 }
0x27ba   : > { %8907 = vmatpush3.bf16.msra.mxu0 %v9435_v44 }
0x27bb   : > { %8908 = vmatprep.subr.bf16.mxu0 %v9854_v1 }
0x27be   : > { %8909 = vmatpush3.bf16.msra.mxu0 %v9436_v49 }
0x27bf   : > { %6386 = vmatprep.subr.bf16.mxu0 %v9439_v54  ;;  %v9468_v54 = vld [vmem:[#allocation7 + $0x7a0] ss:$132 sps:$4 sm:$0xff]  }
0x2800   : > { %v5867_v35 = vpop.f32.mrb[108].mxu0 }
0x2801   : > { %v8874_v36 = vpop.f32.mrb[109].mxu0 }
0x2802   : > { %v5870_v21 = vpop.f32.mrb[110].mxu0 }
0x2803   : > { %v8875_v38 = vpop.f32.mrb[111].mxu0 }
0x2869   : > { %v5913_v48 = vpop.f32.mrb[124].mxu1 }
0x286a   : > { %6012 = vrot.lane.b32.xlu1 %v5913_v48, %s9858_s12  ;;  %v8880_v50 = vpop.f32.mrb[125].mxu1 }
0x286b   : > { %v5916_v51 = vpop.f32.mrb[126].mxu1  ;;  %v9465_v50 = vld [vmem:[#allocation7 + $0x488] ss:$132 sps:$4 sm:$0xff]  }
0x286c   : > { %v8881_v52 = vpop.f32.mrb[127].mxu1  ;;  %8923 = vmatpush3.bf16.msra.mxu1 %v9465_v50  ;;  %v9466_v51 = vld [vmem:[#allocation7 + $0x590] ss:$132 sps:$4 sm:$0xff]  }
0x286d   : > { %8924 = vmatprep.subr.bf16.mxu1 %v9854_v1  ;;  %v9467_v52 = vld [vmem:[#allocation7 + $0x698] ss:$132 sps:$4 sm:$0xff]  }
0x2870   : > { %8925 = vmatpush3.bf16.msra.mxu1 %v9466_v51 }
0x2871   : > { %8926 = vmatprep.subr.bf16.mxu1 %v9854_v1 }
0x2874   : > { %v5959_v55 = vpop.f32.mrb[112].mxu0  ;;  %8927 = vmatpush3.bf16.msra.mxu1 %v9467_v52 }
0x2875   : > { %6016 = vrot.lane.b32.xlu0 %v5959_v55, %s9857_s18  ;;  %v8886_v56 = vpop.f32.mrb[113].mxu0  ;;  %8928 = vmatprep.subr.bf16.mxu1 %v9854_v1 }
0x2876   : > { %v5962_v10 = vpop.f32.mrb[114].mxu0 }
0x2877   : > { %v8887_v14 = vpop.f32.mrb[115].mxu0 }
0x2878   : > { %8929 = vmatpush3.bf16.msra.mxu1 %v9468_v54 }
0x2879   : > { %v6005_v57 = vpop.f32.mrb[128].mxu1  ;;  %8934 = vmatprep.subr.bf16.mxu1 %v9854_v1 }
0x287a   : > { %6020 = vrot.lane.b32.xlu1 %v6005_v57, %s9856_s11  ;;  %v8892_v58 = vpop.f32.mrb[129].mxu1  ;;  %v8036_v57 = vld [vmem:[#allocation10 + $0x32] ss:$0 sm:$0xff] }
0x287b   : > { %v6008_v59 = vpop.f32.mrb[130].mxu1 }
0x287c   : > { %v8893_v60 = vpop.f32.mrb[131].mxu1  ;;  %v8037_v59 = vld [vmem:[#allocation10 + $0x33] ss:$0 sm:$0xff] }
0x28dc   : > { %v6013_v61 = vpop.permute.xlu1 %6012 }
0x28dd   : > { %v6023_v5 = vsel %vm905_vm3, %v5867_v35, %v6013_v61 }
0x28e7   : > { %v6017_v62 = vpop.permute.xlu0 %6016 }
0x28e8   : > { %v6024_v63 = vsel %vm1341_vm6, %v6023_v5, %v6017_v62 }
0x28ec   : > { %v6021_v45 = vpop.permute.xlu1 %6020 }
0x28ed   : > { %v6025_v2 = vsel %vm558_vm2, %v6024_v63, %v6021_v45 }
0x28ee   : > { %v6042_v19 = vpack.c.bf16 %v6025_v2, %v6025_v2  ;;  %v8038_v2 = vld [vmem:[#allocation10 + $0x2b] ss:$0 sm:$0xff] }
0x28f0   : > { %8911 = vmatmul.mubr.bf16.vlgmr.msra.gmra.mrb[116].mxu0 %v6042_v19 }
0x28f1   : > { %6387 = vmatpush1.bf16.msra.mxu0 %v9437_v3  ;;  %6418 = vmatprep.mubr.bf16.mxu0 %v9853_v0 }
0x28f2   : > { %6388 = vmatprep.subr.bf16.mxu0 %v9442_v4 }
0x28f5   : > { %6389 = vmatpush1.bf16.msra.mxu0 %v9440_v6 }
0x28f6   : > { %6390 = vmatprep.subr.bf16.mxu0 %v9445_v7 }
0x28f9   : > { %6391 = vmatpush1.bf16.msra.mxu0 %v9443_v8 }
0x28fa   : > { %6392 = vmatprep.subr.bf16.mxu0 %v9448_v9 }
0x28fd   : > { %6393 = vmatpush1.bf16.msra.mxu0 %v9446_v32 }
0x28fe   : > { %6394 = vmatprep.subr.bf16.mxu0 %v9451_v29 }
0x2901   : > { %6395 = vmatpush1.bf16.msra.mxu0 %v9449_v11 }
0x2902   : > { %6396 = vmatprep.subr.bf16.mxu0 %v9454_v12 }
0x2905   : > { %6397 = vmatpush1.bf16.msra.mxu0 %v9452_v13 }
0x2906   : > { %6398 = vmatprep.subr.bf16.mxu0 %v9457_v16 }
0x2909   : > { %6399 = vmatpush1.bf16.msra.mxu0 %v9455_v17 }
0x290a   : > { %6400 = vmatprep.subr.bf16.mxu0 %v9460_v53 }
0x290d   : > { %6401 = vmatpush1.bf16.msra.mxu0 %v9458_v23 }
0x290e   : > { %8958 = vmatprep.subr.bf16.mxu0 %v9854_v1 }
0x2910   : > { %6419 = vmatmul.mubr.bf16.vlgmr.msra.gmra.mrb[120].mxu0 %v10495_v18 }
0x2911   : > { %8960 = vmatprep.mubr.msk.bf16.mxu0 %vm9855_vm0, %v9854_v1 }
0x29c3   : > { %v6132_v20 = vpop.f32.mrb[116].mxu0 }
0x29c4   : > { %v6133_v25 = vadd.f32 %v8027_v15, %v6132_v20  ;;  %v8912_v26 = vpop.f32.mrb[117].mxu0 }
0x29c5   : > { %v6135_v27 = vpop.f32.mrb[118].mxu0 }
0x29c6   : > { %v6138_v22 = vadd.f32 %v6133_v25, %v10600_v43  ;;  %v8913_v24 = vpop.f32.mrb[119].mxu0 }
0x29c8   : > { %6141 = vadd.xlane.f32.xlu0 %v6138_v22 }
0x29e3   : > { %v6420_v40 = vpop.f32.mrb[120].mxu0 }
0x29e4   : > { %v6421_v33 = vadd.f32 %v6420_v40, %v6299_v30  ;;  %v6422_v18 = vpop.f32.mrb[121].mxu0 }
0x29e5   : > { %v10700_v35 = vadd.f32 %v6422_v18, %v6303_v31  ;;  %v6424_v36 = vpop.f32.mrb[122].mxu0 }
0x29e6   : > { %v6425_v21 = vpop.f32.mrb[123].mxu0  ;;  %6438 = vrot.lane.b32.xlu0 %v6421_v33, %s9856_s11  ;;  %v6461_v62 = vpack.c.bf16 %v6421_v33, %v6421_v33 }
0x29e7   : > { %v6697_v43 = vpack.c.bf16 %v10700_v35, %v10700_v35 }
0x29e8   : > { %v6469_v63 = vsel %vm905_vm3, %v6461_v62, 0 }
0x29e9   : > { %v6705_v38 = vsel %vm1146_vm4, %v6697_v43, 0 }
0x29ea   : > { %8959 = vmatpush3.bf16.msra.mxu0 %v6705_v38  ;;  %6441 = vrot.lane.b32.xlu0 %v6421_v33, %s9857_s18 }
0x29eb   : > { %8970 = vmatprep.subr.bf16.mxu0 %v9854_v1 }
0x29ee   : > { %6444 = vrot.lane.b32.xlu0 %v6421_v33, %s9858_s12 }
0x2a55   : > { %v6142_v42 = vpop.xlane.xlu0 %6141 }
0x2a56   : > { %v6143_v44 = vmul.f32 0.0078125, %v6142_v42 }
0x2a58   : > { %v6144_v48 = vsub.f32 %v6138_v22, %v6143_v44  ;;  %v9646_v22 = vld [vmem:[%s10188_s24] ss:$0 sm:$0xff] }
0x2a59   : > { %v6439_v45 = vpop.permute.xlu0 %6438 }
0x2a5a   : > { %v6145_v49 = vmul.f32 %v6144_v48, %v6144_v48  ;;  %v6462_v19 = vpack.c.bf16 %v6439_v45, %v6439_v45 }
0x2a5c   : > { %6146 = vadd.xlane.f32.xlu1 %v6145_v49  ;;  %v6515_v32 = vsel %vm905_vm3, %v6462_v19, 0 }
0x2a5d   : > { %v6442_v29 = vpop.permute.xlu0 %6441 }
0x2a5e   : > { %v6463_v11 = vpack.c.bf16 %v6442_v29, %v6442_v29 }
0x2a60   : > { %v6561_v16 = vsel %vm905_vm3, %v6463_v11, 0 }
0x2a61   : > { %v6445_v17 = vpop.permute.xlu0 %6444 }
0x2a62   : > { %v6464_v23 = vpack.c.bf16 %v6445_v17, %v6445_v17 }
0x2a64   : > { %v6607_v20 = vsel %vm905_vm3, %v6464_v23, 0 }
0x2ae9   : > { %v6147_v55 = vpop.xlane.xlu1 %6146 }
0x2aea   : > { %v6148_v56 = vmul.f32 0.0078125, %v6147_v55 }
0x2aec   : > { %v6149_v10 = vadd.f32 1e-05, %v6148_v56 }
0x2aee   : > { %9621 = vrsqrt.f32 %v6149_v10 }
0x2af8   : > { %v9622_v14 = vpop.eup %9621 }
0x2af9   : > { %v6151_v58 = vmul.f32 %v9622_v14, %v6144_v48 }
0x2afb   : > { %v6158_v60 = vmul.f32 %v8036_v57, %v6151_v58 }
0x2afd   : > { %v10717_v61 = vadd.f32 %v8037_v59, %v6158_v60 }
0x2aff   : > { %v6182_v5 = vpack.c.bf16 %v10717_v61, %v10717_v61 }
0x2b01   : > { %8931 = vmatmul.mubr.bf16.vlgmr.msra.gmra.mrb[132].mxu1 %v6182_v5 }
0x2b02   : > { %8935 = vmatpush3.bf16.xpose.msra.mxu1 %v6469_v63  ;;  %8936 = vmatprep.mubr.msk.bf16.mxu1 %vm9855_vm0, %v9854_v1 }
0x2b03   : > { %8940 = vmatprep.subr.bf16.mxu1 %v9854_v1 }
0x2bd4   : > { %v6272_v3 = vpop.f32.mrb[132].mxu1 }
0x2bd5   : > { %v6273_v4 = vadd.f32 %v8038_v2, %v6272_v3  ;;  %v8932_v6 = vpop.f32.mrb[133].mxu1 }
0x2bd6   : > { %v6275_v7 = vpop.f32.mrb[134].mxu1 }
0x2bd7   : > { %v6457_v8 = vpack.c.bf16 %v6273_v4, %v6273_v4  ;;  %6428 = vrot.lane.b32.xlu1 %v6273_v4, %s9856_s11  ;;  %v8933_v9 = vpop.f32.mrb[135].mxu1 }
0x2bd9   : > { %8937 = vmatmul.mubr.msk.bf16.vlgmr.msra.gmra.mrb[136].mxu1 %vm905_vm3, %v6457_v8 }
0x2bda   : > { %8941 = vmatpush3.bf16.xpose.msra.mxu1 %v6515_v32  ;;  %8942 = vmatprep.mubr.msk.bf16.mxu1 %vm9855_vm0, %v9854_v1 }
0x2bdb   : > { %6431 = vrot.lane.b32.xlu1 %v6273_v4, %s9857_s18  ;;  %8946 = vmatprep.subr.bf16.mxu1 %v9854_v1 }
0x2bdf   : > { %6434 = vrot.lane.b32.xlu1 %v6273_v4, %s9858_s12 }
0x2c49   : > { %v6429_v12 = vpop.permute.xlu1 %6428 }
0x2c4a   : > { %v6458_v13 = vpack.c.bf16 %v6429_v12, %v6429_v12 }
0x2c4c   : > { %8943 = vmatmul.mubr.msk.bf16.vlgmr.msra.gmra.mrb[140].mxu1 %vm905_vm3, %v6458_v13 }
0x2c4d   : > { %8947 = vmatpush3.bf16.xpose.msra.mxu1 %v6561_v16  ;;  %8948 = vmatprep.mubr.msk.bf16.mxu1 %vm9855_vm0, %v9854_v1  ;;  %v6432_v53 = vpop.permute.xlu1 %6431 }
0x2c4e   : > { %8952 = vmatprep.subr.bf16.mxu1 %v9854_v1  ;;  %v6459_v15 = vpack.c.bf16 %v6432_v53, %v6432_v53 }
0x2c51   : > { %v6435_v25 = vpop.permute.xlu1 %6434 }
0x2c52   : > { %v6460_v26 = vpack.c.bf16 %v6435_v25, %v6435_v25 }
0x2c54   : > { %8949 = vmatmul.mubr.msk.bf16.vlgmr.msra.gmra.mrb[144].mxu1 %vm905_vm3, %v6459_v15 }
0x2c55   : > { %8953 = vmatpush3.bf16.xpose.msra.mxu1 %v6607_v20  ;;  %8954 = vmatprep.mubr.msk.bf16.mxu1 %vm9855_vm0, %v9854_v1 }
0x2c56   : > { %8964 = vmatprep.subr.bf16.mxu1 %v9854_v1 }
0x2c5c   : > { %8955 = vmatmul.mubr.msk.bf16.vlgmr.msra.gmra.mrb[148].mxu1 %vm905_vm3, %v6460_v26 }
0x2c5d   : > { %8966 = vmatprep.mubr.msk.bf16.mxu1 %vm9855_vm0, %v9854_v1 }
0x2cac   : > { %v6505_v27 = vpop.f32.mrb[136].mxu1 }
0x2cad   : > { %v6506_v24 = vadd.f32 %v9646_v22, %v6505_v27  ;;  %v8938_v28 = vpop.f32.mrb[137].mxu1 }
0x2cae   : > { %v6508_v30 = vpop.f32.mrb[138].mxu1 }
0x2caf   : > { %v8939_v31 = vpop.f32.mrb[139].mxu1  ;;  %v6649_v40 = vsel %vm1090_vm5, %v6506_v24, -inf }
0x2cb0   : > { %6650 = vmax.xlane.f32.xlu0 %v6649_v40 }
0x2d1f   : > { %v6551_v33 = vpop.f32.mrb[140].mxu1 }
0x2d20   : > { %v6552_v18 = vadd.f32 %v9646_v22, %v6551_v33  ;;  %v8944_v34 = vpop.f32.mrb[141].mxu1 }
0x2d21   : > { %v6554_v36 = vpop.f32.mrb[142].mxu1 }
0x2d22   : > { %v8945_v21 = vpop.f32.mrb[143].mxu1  ;;  %v6652_v43 = vsel %vm1090_vm5, %v6552_v18, -inf }
0x2d23   : > { %6653 = vmax.xlane.f32.xlu1 %v6652_v43  ;;  %v9469_v21 = vld [vmem:[#allocation7 + $0x74] ss:$132 sps:$4 sm:$0xff]   ;;  %v9470_v43 = vld [vmem:[#allocation7 + $0x17c] ss:$132 sps:$4 sm:$0xff]  }
0x2d27   : > { %v6597_v37 = vpop.f32.mrb[144].mxu1 }
0x2d28   : > { %v6598_v38 = vadd.f32 %v9646_v22, %v6597_v37  ;;  %v8950_v39 = vpop.f32.mrb[145].mxu1 }
0x2d29   : > { %v6600_v41 = vpop.f32.mrb[146].mxu1 }
0x2d2a   : > { %v8951_v42 = vpop.f32.mrb[147].mxu1  ;;  %v6655_v44 = vsel %vm1090_vm5, %v6598_v38, -inf  ;;  %v9471_v41 = vld [vmem:[#allocation7 + $0x284] ss:$132 sps:$4 sm:$0xff]  }
0x2d2b   : > { %6656 = vmax.xlane.f32.xlu0 %v6655_v44  ;;  %v9472_v44 = vld [vmem:[#allocation7 + $0x38c] ss:$132 sps:$4 sm:$0xff]  }
0x2d2f   : > { %v6643_v48 = vpop.f32.mrb[148].mxu1 }
0x2d30   : > { %v6644_v49 = vadd.f32 %v9646_v22, %v6643_v48  ;;  %v8956_v50 = vpop.f32.mrb[149].mxu1  ;;  %v9473_v48 = vld [vmem:[#allocation7 + $0x494] ss:$132 sps:$4 sm:$0xff]  }
0x2d31   : > { %v6646_v51 = vpop.f32.mrb[150].mxu1 }
0x2d32   : > { %v8957_v52 = vpop.f32.mrb[151].mxu1  ;;  %v6658_v54 = vsel %vm1090_vm5, %v6644_v49, -inf }
0x2d33   : > { %6659 = vmax.xlane.f32.xlu0 %v6658_v54 }
0x2d34   : > { %6448 = vrot.lane.b32.xlu1 %v10700_v35, %s9856_s11 }
0x2d3d   : > { %v6651_v55 = vpop.xlane.xlu0 %6650 }
0x2d3e   : > { %v6661_v56 = vsub.f32 %v6506_v24, %v6651_v55  ;;  %v9476_v55 = vld [vmem:[#allocation7 + $0x7ac] ss:$132 sps:$4 sm:$0xff]  }
0x2d40   : > { %v6665_v10 = vmul.f32 1.442695, %v6661_v56 }
0x2d42   : > { %9623 = vpow2.f32 %v6665_v10 }
0x2d4c   : > { %v9624_v14 = vpop.eup %9623 }
0x2d4d   : > { %v6673_v57 = vsel %vm1090_vm5, %v9624_v14, 0.0 }
0x2d58   : > { %6674 = vadd.xlane.f32.xlu1 %v6673_v57 }
0x2db0   : > { %v6654_v58 = vpop.xlane.xlu1 %6653 }
0x2db1   : > { %v6662_v59 = vsub.f32 %v6552_v18, %v6654_v58 }
0x2db3   : > { %v6667_v60 = vmul.f32 1.442695, %v6662_v59 }
0x2db4   : > { %v6449_v62 = vpop.permute.xlu1 %6448 }
0x2db5   : > { %9625 = vpow2.f32 %v6667_v60  ;;  %v6698_v5 = vpack.c.bf16 %v6449_v62, %v6449_v62 }
0x2db7   : > { %v6751_v63 = vsel %vm1146_vm4, %v6698_v5, 0 }
0x2db8   : > { %8965 = vmatpush3.bf16.msra.mxu1 %v6751_v63  ;;  %v6657_v45 = vpop.xlane.xlu0 %6656 }
0x2db9   : > { %v6663_v2 = vsub.f32 %v6598_v38, %v6657_v45  ;;  %8976 = vmatprep.subr.bf16.mxu1 %v9854_v1 }
0x2dbb   : > { %v6669_v3 = vmul.f32 1.442695, %v6663_v2 }
0x2dbd   : > { %9627 = vpow2.f32 %v6669_v3 }
0x2dbf   : > { %v9626_v19 = vpop.eup %9625 }
0x2dc0   : > { %v6660_v4 = vpop.xlane.xlu0 %6659  ;;  %v6676_v6 = vsel %vm1090_vm5, %v9626_v19, 0.0 }
0x2dc1   : > { %v6664_v7 = vsub.f32 %v6644_v49, %v6660_v4  ;;  %6677 = vadd.xlane.f32.xlu0 %v6676_v6  ;;  %v9475_v49 = vld [vmem:[#allocation7 + $0x6a4] ss:$132 sps:$4 sm:$0xff]   ;;  %v8071_v6 = vld [vmem:[#allocation10 + $0x2e] ss:$0 sm:$0xff] }
0x2dc3   : > { %v6671_v8 = vmul.f32 1.442695, %v6664_v7 }
0x2dc5   : > { %9629 = vpow2.f32 %v6671_v8 }
0x2dc7   : > { %v9628_v9 = vpop.eup %9627 }
0x2dc8   : > { %v6679_v32 = vsel %vm1090_vm5, %v9628_v9, 0.0 }
0x2dc9   : > { %6680 = vadd.xlane.f32.xlu1 %v6679_v32 }
0x2dcf   : > { %v9630_v29 = vpop.eup %9629 }
0x2dd0   : > { %v6682_v11 = vsel %vm1090_vm5, %v9630_v29, 0.0 }
0x2dd1   : > { %6683 = vadd.xlane.f32.xlu0 %v6682_v11 }
0x2dda   : > { %6454 = vrot.lane.b32.xlu1 %v10700_v35, %s9858_s12 }
0x2de5   : > { %v6675_v12 = vpop.xlane.xlu1 %6674 }
0x2de6   : > { %9631 = vrcp.f32 %v6675_v12  ;;  %v9477_v12 = vld [vmem:[#allocation7 + $0x78] ss:$132 sps:$4 sm:$0xff]  }
0x2de7   : > { %6451 = vrot.lane.b32.xlu0 %v10700_v35, %s9857_s18 }
0x2df0   : > { %v9632_v13 = vpop.eup %9631 }
0x2df1   : > { %v6686_v16 = vmul.f32 %v9632_v13, %v9624_v14  ;;  %v9479_v13 = vld [vmem:[#allocation7 + $0x7c] ss:$132 sps:$4 sm:$0xff]  }
0x2df3   : > { %v6693_v17 = vpack.c.bf16 %v6686_v16, %v6686_v16  ;;  %v9482_v16 = vld [vmem:[#allocation7 + $0x184] ss:$132 sps:$4 sm:$0xff]  }
0x2df5   : > { %8961 = vmatmul.mubr.msk.bf16.vlgmr.msra.gmra.mrb[124].mxu0 %vm1090_vm5, %v6693_v17  ;;  %v9480_v17 = vld [vmem:[#allocation7 + $0x180] ss:$132 sps:$4 sm:$0xff]  }
0x2df6   : > { %8972 = vmatprep.mubr.msk.bf16.mxu0 %vm9855_vm0, %v9854_v1 }
0x2e4e   : > { %v6678_v53 = vpop.xlane.xlu0 %6677 }
0x2e4f   : > { %9633 = vrcp.f32 %v6678_v53  ;;  %v9485_v53 = vld [vmem:[#allocation7 + $0x28c] ss:$132 sps:$4 sm:$0xff]  }
0x2e56   : > { %v6681_v23 = vpop.xlane.xlu1 %6680 }
0x2e57   : > { %9635 = vrcp.f32 %v6681_v23  ;;  %v9483_v23 = vld [vmem:[#allocation7 + $0x288] ss:$132 sps:$4 sm:$0xff]  }
0x2e59   : > { %v9634_v15 = vpop.eup %9633 }
0x2e5a   : > { %v6688_v20 = vmul.f32 %v9634_v15, %v9626_v19  ;;  %v6455_v25 = vpop.permute.xlu1 %6454 }
0x2e5b   : > { %v6700_v26 = vpack.c.bf16 %v6455_v25, %v6455_v25 }
0x2e5c   : > { %v6694_v27 = vpack.c.bf16 %v6688_v20, %v6688_v20 }
0x2e5d   : > { %v6843_v22 = vsel %vm1146_vm4, %v6700_v26, 0 }
0x2e5e   : > { %8967 = vmatmul.mubr.msk.bf16.vlgmr.msra.gmra.mrb[152].mxu1 %vm1090_vm5, %v6694_v27  ;;  %v6684_v35 = vpop.xlane.xlu0 %6683  ;;  %v9486_v27 = vld [vmem:[#allocation7 + $0x390] ss:$132 sps:$4 sm:$0xff]  }
0x2e5f   : > { %8977 = vmatpush3.bf16.msra.mxu1 %v6843_v22  ;;  %9637 = vrcp.f32 %v6684_v35  ;;  %8978 = vmatprep.mubr.msk.bf16.mxu1 %vm9855_vm0, %v9854_v1  ;;  %v9491_v22 = vld [vmem:[#allocation7 + $0x49c] ss:$132 sps:$4 sm:$0xff]  }
0x2e60   : > { %7149 = vmatprep.subr.bf16.mxu1 %v9479_v13  ;;  %v9489_v35 = vld [vmem:[#allocation7 + $0x498] ss:$132 sps:$4 sm:$0xff]  }
0x2e61   : > { %v9636_v24 = vpop.eup %9635 }
0x2e62   : > { %v6452_v28 = vpop.permute.xlu0 %6451  ;;  %v6690_v30 = vmul.f32 %v9636_v24, %v9628_v9  ;;  %v9494_v24 = vld [vmem:[#allocation7 + $0x5a4] ss:$132 sps:$4 sm:$0xff]  }
0x2e63   : > { %v6699_v31 = vpack.c.bf16 %v6452_v28, %v6452_v28  ;;  %v9492_v28 = vld [vmem:[#allocation7 + $0x5a0] ss:$132 sps:$4 sm:$0xff]  }
0x2e64   : > { %v6695_v33 = vpack.c.bf16 %v6690_v30, %v6690_v30  ;;  %v9497_v30 = vld [vmem:[#allocation7 + $0x6ac] ss:$132 sps:$4 sm:$0xff]  }
0x2e65   : > { %v6797_v40 = vsel %vm1146_vm4, %v6699_v31, 0  ;;  %v9495_v31 = vld [vmem:[#allocation7 + $0x6a8] ss:$132 sps:$4 sm:$0xff]  }
0x2e66   : > { %8971 = vmatpush3.bf16.msra.mxu0 %v6797_v40  ;;  %v9500_v40 = vld [vmem:[#allocation7 + $0x7b4] ss:$132 sps:$4 sm:$0xff]  }
0x2e67   : > { %8982 = vmatprep.subr.bf16.mxu0 %v9854_v1 }
0x2e69   : > { %v9638_v18 = vpop.eup %9637  ;;  %8973 = vmatmul.mubr.msk.bf16.vlgmr.msra.gmra.mrb[128].mxu0 %vm1090_vm5, %v6695_v33  ;;  %v9498_v33 = vld [vmem:[#allocation7 + $0x7b0] ss:$132 sps:$4 sm:$0xff]  }
0x2e6a   : > { %v6692_v34 = vmul.f32 %v9638_v18, %v9630_v29  ;;  %8998 = vmatprep.mubr.msk.bf16.mxu0 %vm9855_vm0, %v9854_v1  ;;  %8983 = vmatpush3.bf16.msra.mxu0 %v9469_v21  ;;  %v9501_v18 = vld [vmem:[#allocation9 + $0x10c] ss:$16 sps:$4 sm:$0xff]  }
0x2e6b   : > { %8984 = vmatprep.subr.bf16.mxu0 %v9854_v1  ;;  %v9504_v21 = vld [vmem:[#allocation9 + $0x2c] ss:$16 sps:$4 sm:$0xff]  }
0x2e6c   : > { %v6696_v36 = vpack.c.bf16 %v6692_v34, %v6692_v34  ;;  %v9502_v34 = vld [vmem:[#allocation9 + $0xc] ss:$16 sps:$4 sm:$0xff]  }
0x2e6e   : > { %8979 = vmatmul.mubr.msk.bf16.vlgmr.msra.gmra.mrb[156].mxu1 %vm1090_vm5, %v6696_v36  ;;  %8985 = vmatpush3.bf16.msra.mxu0 %v9470_v43  ;;  %v9503_v36 = vld [vmem:[#allocation9 + $0x12c] ss:$16 sps:$4 sm:$0xff]  }
0x2e6f   : > { %7181 = vmatprep.mubr.bf16.mxu1 %v9853_v0  ;;  %8986 = vmatprep.subr.bf16.mxu0 %v9854_v1  ;;  %v9474_v0 = vld [vmem:[#allocation7 + $0x59c] ss:$132 sps:$4 sm:$0xff]  }
0x2e70   : > { %7150 = vmatpush1.bf16.msra.mxu1 %v9477_v12  ;;  %v9505_v43 = vld [vmem:[#allocation9 + $0x14c] ss:$16 sps:$4 sm:$0xff]  }
0x2e71   : > { %7151 = vmatprep.subr.bf16.mxu1 %v9482_v16 }
0x2e72   : > { %8987 = vmatpush3.bf16.msra.mxu0 %v9471_v41  ;;  %v9509_v41 = vld [vmem:[#allocation9 + $0x18c] ss:$16 sps:$4 sm:$0xff]  }
0x2e73   : > { %8988 = vmatprep.subr.bf16.mxu0 %v9854_v1 }
0x2e74   : > { %7152 = vmatpush1.bf16.msra.mxu1 %v9480_v17 }
0x2e75   : > { %7153 = vmatprep.subr.bf16.mxu1 %v9485_v53 }
0x2e76   : > { %8989 = vmatpush3.bf16.msra.mxu0 %v9472_v44  ;;  %v9511_v44 = vld [vmem:[#allocation9 + $0x1ac] ss:$16 sps:$4 sm:$0xff]  }
0x2e77   : > { %8990 = vmatprep.subr.bf16.mxu0 %v9854_v1 }
0x2e78   : > { %7154 = vmatpush1.bf16.msra.mxu1 %v9483_v23 }
0x2e7a   : > { %8991 = vmatpush3.bf16.msra.mxu0 %v9473_v48  ;;  %v9512_v48 = vld [vmem:[#allocation9 + $0xac] ss:$16 sps:$4 sm:$0xff]  }
0x2e7b   : > { %8992 = vmatprep.subr.bf16.mxu0 %v9854_v1 }
0x2e7e   : > { %8993 = vmatpush3.bf16.msra.mxu0 %v9474_v0 }
0x2e7f   : > { %8994 = vmatprep.subr.bf16.mxu0 %v9854_v1 }
0x2e82   : > { %8995 = vmatpush3.bf16.msra.mxu0 %v9475_v49 }
0x2e83   : > { %8996 = vmatprep.subr.bf16.mxu0 %v9854_v1 }
0x2e86   : > { %8997 = vmatpush3.bf16.msra.mxu0 %v9476_v55  ;;  %v8081_v55 = vld [vmem:[#allocation10 + $0x35] ss:$0 sm:$0xff] }
0x2e87   : > { %8413 = vmatprep.subr.bf16.mxu0 %v9501_v18 }
0x2ec8   : > { %v6741_v37 = vpop.f32.mrb[124].mxu0 }
0x2ec9   : > { %v8962_v38 = vpop.f32.mrb[125].mxu0 }
0x2eca   : > { %v6744_v39 = vpop.f32.mrb[126].mxu0  ;;  %v9507_v38 = vld [vmem:[#allocation9 + $0x16c] ss:$16 sps:$4 sm:$0xff]  }
0x2ecb   : > { %v8963_v42 = vpop.f32.mrb[127].mxu0  ;;  %v9508_v39 = vld [vmem:[#allocation9 + $0x6c] ss:$16 sps:$4 sm:$0xff]  }
0x2ecc   : > { %v9510_v42 = vld [vmem:[#allocation9 + $0x8c] ss:$16 sps:$4 sm:$0xff]  }
0x2f31   : > { %v6787_v50 = vpop.f32.mrb[152].mxu1 }
0x2f32   : > { %6886 = vrot.lane.b32.xlu1 %v6787_v50, %s9858_s12  ;;  %v8968_v51 = vpop.f32.mrb[153].mxu1 }
0x2f33   : > { %v6790_v52 = vpop.f32.mrb[154].mxu1 }
0x2f34   : > { %v8969_v54 = vpop.f32.mrb[155].mxu1  ;;  %v8080_v52 = vld [vmem:[#allocation10 + $0x34] ss:$0 sm:$0xff] }
0x2f3c   : > { %v6833_v56 = vpop.f32.mrb[128].mxu0 }
0x2f3d   : > { %6890 = vrot.lane.b32.xlu0 %v6833_v56, %s9857_s18  ;;  %v8974_v10 = vpop.f32.mrb[129].mxu0 }
0x2f3e   : > { %v6836_v14 = vpop.f32.mrb[130].mxu0 }
0x2f3f   : > { %v8975_v57 = vpop.f32.mrb[131].mxu0 }
0x2f40   : > { %v9513_v57 = vld [vmem:[#allocation9 + $0x1cc] ss:$16 sps:$4 sm:$0xff]  }
0x2f41   : > { %v6879_v58 = vpop.f32.mrb[156].mxu1 }
0x2f42   : > { %6894 = vrot.lane.b32.xlu1 %v6879_v58, %s9856_s11  ;;  %v8980_v59 = vpop.f32.mrb[157].mxu1  ;;  %v9514_v58 = vld [vmem:[#allocation9 + $0xcc] ss:$16 sps:$4 sm:$0xff]  }
0x2f43   : > { %v6882_v60 = vpop.f32.mrb[158].mxu1  ;;  %v9515_v59 = vld [vmem:[#allocation9 + $0x1ec] ss:$16 sps:$4 sm:$0xff]  }
0x2f44   : > { %v8981_v62 = vpop.f32.mrb[159].mxu1  ;;  %v9516_v60 = vld [vmem:[#allocation9 + $0xec] ss:$16 sps:$4 sm:$0xff]  }
0x2f45   : > { %v7057_v62 = vld [vmem:[#allocation10 + $0x2f] sm:$0x3] }
0x2fa4   : > { %v6887_v5 = vpop.permute.xlu1 %6886 }
0x2fa5   : > { %v6897_v45 = vsel %vm905_vm3, %v6741_v37, %v6887_v5  ;;  %v9506_v37 = vld [vmem:[#allocation9 + $0x4c] ss:$16 sps:$4 sm:$0xff]   ;;  %v7062_v5 = vrot.slane %v7057_v62, %v10141_v46 }
0x2faf   : > { %v6891_v63 = vpop.permute.xlu0 %6890 }
0x2fb0   : > { %v6898_v2 = vsel %vm1341_vm6, %v6897_v45, %v6891_v63  ;;  %v7066_v63 = vrot.slane %v7057_v62, %v10144_v47 }
0x2fb4   : > { %v6895_v3 = vpop.permute.xlu1 %6894 }
0x2fb5   : > { %v6899_v19 = vsel %vm558_vm2, %v6898_v2, %v6895_v3 }
0x2fb6   : > { %v6916_v4 = vpack.c.bf16 %v6899_v19, %v6899_v19 }
0x2fb8   : > { %8999 = vmatmul.mubr.bf16.vlgmr.msra.gmra.mrb[132].mxu0 %v6916_v4 }
0x2fb9   : > { %8414 = vmatpush3.bf16.msra.mxu0 %v9502_v34 }
0x2fba   : > { %8415 = vmatprep.subr.bf16.mxu0 %v9503_v36 }
0x2fbd   : > { %8416 = vmatpush3.bf16.msra.mxu0 %v9504_v21  ;;  %v9519_v21 = vld [vmem:[#allocation7 + $0x290] ss:$132 sps:$4 sm:$0xff]  }
0x2fbe   : > { %8417 = vmatprep.subr.bf16.mxu0 %v9505_v43  ;;  %v9520_v43 = vld [vmem:[#allocation7 + $0x398] ss:$132 sps:$4 sm:$0xff]  }
0x2fc1   : > { %8418 = vmatpush3.bf16.msra.mxu0 %v9506_v37  ;;  %v9521_v37 = vld [vmem:[#allocation7 + $0x4a0] ss:$132 sps:$4 sm:$0xff]  }
0x2fc2   : > { %8419 = vmatprep.subr.bf16.mxu0 %v9507_v38  ;;  %v9522_v38 = vld [vmem:[#allocation7 + $0x5a8] ss:$132 sps:$4 sm:$0xff]  }
0x2fc5   : > { %8420 = vmatpush3.bf16.msra.mxu0 %v9508_v39  ;;  %v9523_v39 = vld [vmem:[#allocation7 + $0x6b0] ss:$132 sps:$4 sm:$0xff]  }
0x2fc6   : > { %8421 = vmatprep.subr.bf16.mxu0 %v9509_v41  ;;  %v9524_v41 = vld [vmem:[#allocation7 + $0x7b8] ss:$132 sps:$4 sm:$0xff]  }
0x2fc9   : > { %8422 = vmatpush3.bf16.msra.mxu0 %v9510_v42 }
0x2fca   : > { %8423 = vmatprep.subr.bf16.mxu0 %v9511_v44 }
0x2fcd   : > { %8424 = vmatpush3.bf16.msra.mxu0 %v9512_v48 }
0x2fce   : > { %8425 = vmatprep.subr.bf16.mxu0 %v9513_v57 }
0x2fd1   : > { %8426 = vmatpush3.bf16.msra.mxu0 %v9514_v58 }
0x2fd2   : > { %8427 = vmatprep.subr.bf16.mxu0 %v9515_v59 }
0x2fd5   : > { %8428 = vmatpush3.bf16.msra.mxu0 %v9516_v60 }
0x308b   : > { %v7006_v7 = vpop.f32.mrb[132].mxu0 }
0x308c   : > { %v7007_v8 = vadd.f32 %v8071_v6, %v7006_v7  ;;  %v9000_v9 = vpop.f32.mrb[133].mxu0 }
0x308d   : > { %v7009_v32 = vpop.f32.mrb[134].mxu0 }
0x308e   : > { %v7012_v29 = vadd.f32 %v7007_v8, %v10717_v61  ;;  %v9001_v11 = vpop.f32.mrb[135].mxu0  ;;  %v9488_v61 = vld [vmem:[#allocation7 + $0x394] ss:$132 sps:$4 sm:$0xff]  }
0x308f   : > { %7155 = vmatprep.subr.bf16.mxu1 %v9488_v61  ;;  %v8098_v11 = vld [vmem:[#allocation10 + $0x31] ss:$0 sm:$0xff] }
0x3090   : > { %7015 = vadd.xlane.f32.xlu0 %v7012_v29  ;;  %7156 = vmatpush1.bf16.msra.mxu1 %v9486_v27 }
0x3091   : > { %7157 = vmatprep.subr.bf16.mxu1 %v9491_v22  ;;  %v8115_v22 = vld [vmem:[#allocation10 + $0x36] ss:$0 sm:$0xff] }
0x3094   : > { %7158 = vmatpush1.bf16.msra.mxu1 %v9489_v35 }
0x3095   : > { %7159 = vmatprep.subr.bf16.mxu1 %v9494_v24  ;;  %v8116_v24 = vld [vmem:[#allocation10 + $0x37] ss:$0 sm:$0xff] }
0x3098   : > { %7160 = vmatpush1.bf16.msra.mxu1 %v9492_v28 }
0x3099   : > { %7161 = vmatprep.subr.bf16.mxu1 %v9497_v30 }
0x309c   : > { %7162 = vmatpush1.bf16.msra.mxu1 %v9495_v31  ;;  %v9517_v31 = vld [vmem:[#allocation7 + $0x80] ss:$132 sps:$4 sm:$0xff]  }
0x309d   : > { %7163 = vmatprep.subr.bf16.mxu1 %v9500_v40  ;;  %v9518_v40 = vld [vmem:[#allocation7 + $0x188] ss:$132 sps:$4 sm:$0xff]  }
0x30a0   : > { %7164 = vmatpush1.bf16.msra.mxu1 %v9498_v33 }
0x30a1   : > { %9002 = vmatprep.subr.bf16.mxu1 %v9854_v1 }
0x311d   : > { %v7016_v15 = vpop.xlane.xlu0 %7015 }
0x311e   : > { %v7017_v20 = vmul.f32 0.0078125, %v7016_v15 }
0x3120   : > { %v7018_v25 = vsub.f32 %v7012_v29, %v7017_v20 }
0x3122   : > { %v7019_v26 = vmul.f32 %v7018_v25, %v7018_v25 }
0x3124   : > { %7020 = vadd.xlane.f32.xlu1 %v7019_v26 }
0x31b1   : > { %v7021_v0 = vpop.xlane.xlu1 %7020 }
0x31b2   : > { %v7022_v49 = vmul.f32 0.0078125, %v7021_v0 }
0x31b4   : > { %v7023_v50 = vadd.f32 1e-05, %v7022_v49  ;;  %v8117_v49 = vld [vmem:[#allocation10 + $0x3a] ss:$0 sm:$0xff] }
0x31b6   : > { %9639 = vrsqrt.f32 %v7023_v50 }
0x31c0   : > { %v9640_v51 = vpop.eup %9639 }
0x31c1   : > { %v7025_v54 = vmul.f32 %v9640_v51, %v7018_v25  ;;  %v8118_v51 = vld [vmem:[#allocation10 + $0x3b] ss:$0 sm:$0xff] }
0x31c3   : > { %v7032_v56 = vmul.f32 %v8080_v52, %v7025_v54 }
0x31c5   : > { %v7039_v10 = vadd.f32 %v8081_v55, %v7032_v56  ;;  %v8119_v56 = vld [vmem:[#allocation10 + $0x3c] ss:$0 sm:$0xff] }
0x31c7   : > { %v7056_v14 = vpack.c.bf16 %v7039_v10, %v7039_v10 }
0x31c9   : > { %7182 = vmatmul.mubr.bf16.vlgmr.msra.gmra.mrb[160].mxu1 %v7056_v14 }
0x31ca   : > { %9018 = vmatprep.mubr.msk.bf16.mxu1 %vm9855_vm0, %v9854_v1  ;;  %9003 = vmatpush3.bf16.msra.mxu1 %v9517_v31 }
0x31cb   : > { %9004 = vmatprep.subr.bf16.mxu1 %v9854_v1 }
0x31ce   : > { %9005 = vmatpush3.bf16.msra.mxu1 %v9518_v40 }
0x31cf   : > { %9006 = vmatprep.subr.bf16.mxu1 %v9854_v1 }
0x31d2   : > { %9007 = vmatpush3.bf16.msra.mxu1 %v9519_v21 }
0x31d3   : > { %9008 = vmatprep.subr.bf16.mxu1 %v9854_v1 }
0x31d6   : > { %9009 = vmatpush3.bf16.msra.mxu1 %v9520_v43 }
0x31d7   : > { %9010 = vmatprep.subr.bf16.mxu1 %v9854_v1 }
0x31da   : > { %9011 = vmatpush3.bf16.msra.mxu1 %v9521_v37 }
0x31db   : > { %9012 = vmatprep.subr.bf16.mxu1 %v9854_v1 }
0x31de   : > { %9013 = vmatpush3.bf16.msra.mxu1 %v9522_v38 }
0x31df   : > { %9014 = vmatprep.subr.bf16.mxu1 %v9854_v1 }
0x31e2   : > { %9015 = vmatpush3.bf16.msra.mxu1 %v9523_v39 }
0x31e3   : > { %9016 = vmatprep.subr.bf16.mxu1 %v9854_v1 }
0x31e6   : > { %9017 = vmatpush3.bf16.msra.mxu1 %v9524_v41 }
0x329c   : > { %v7183_v45 = vpop.f32.mrb[160].mxu1 }
0x329d   : > { %v7184_v2 = vadd.f32 %v7183_v45, %v7062_v5  ;;  %v7185_v3 = vpop.f32.mrb[161].mxu1 }
0x329e   : > { %v7186_v19 = vadd.f32 %v7185_v3, %v7066_v63  ;;  %v7187_v4 = vpop.f32.mrb[162].mxu1 }
0x329f   : > { %v7190_v6 = vmax.f32 %v7184_v2, 0.0  ;;  %v7188_v7 = vpop.f32.mrb[163].mxu1 }
0x32a0   : > { %v7191_v8 = vmax.f32 %v7186_v19, 0.0 }
0x32a1   : > { %v7224_v32 = vpack.c.bf16 %v7190_v6, %v7190_v6 }
0x32a2   : > { %v7225_v9 = vpack.c.bf16 %v7191_v8, %v7191_v8 }
0x32a4   : > { %7361 = vmatprep.mubr.bf16.mxu0 %v7225_v9 }
0x32a5   : > { %7362 = vmatmul.mubr.bf16.vlgmr.msra.gmra.mrb[136].mxu0 %v7224_v32 }
0x3378   : > { %v8429_v29 = vpop.f32.mrb[136].mxu0 }
0x3379   : > { %v8430_v12 = vpop.f32.mrb[137].mxu0 }
0x337a   : > { %v8431_v13 = vadd.f32 %v8430_v12, %v8429_v29  ;;  %v8432_v16 = vpop.f32.mrb[138].mxu0 }
0x337b   : > { %v8433_v46 = vpop.f32.mrb[139].mxu0 }
0x337c   : > { %v7364_v17 = vadd.f32 %v8431_v13, %v8098_v11 }
0x337e   : > { %v7369_v47 = vadd.f32 %v7364_v17, %v7039_v10 }
0x3380   : > { %7372 = vadd.xlane.f32.xlu0 %v7369_v47 }
0x340d   : > { %v7373_v53 = vpop.xlane.xlu0 %7372 }
0x340e   : > { %v7374_v23 = vmul.f32 0.0078125, %v7373_v53 }
0x3410   : > { %v7375_v15 = vsub.f32 %v7369_v47, %v7374_v23 }
0x3412   : > { %v7376_v20 = vmul.f32 %v7375_v15, %v7375_v15 }
0x3414   : > { %7377 = vadd.xlane.f32.xlu0 %v7376_v20 }
0x34a1   : > { %v7378_v25 = vpop.xlane.xlu0 %7377 }
0x34a2   : > { %v7379_v26 = vmul.f32 0.0078125, %v7378_v25 }
0x34a4   : > { %v7380_v61 = vadd.f32 1e-05, %v7379_v26 }
0x34a6   : > { %9641 = vrsqrt.f32 %v7380_v61 }
0x34b0   : > { %v9642_v27 = vpop.eup %9641 }
0x34b1   : > { %v7382_v35 = vmul.f32 %v9642_v27, %v7375_v15 }
0x34b3   : > { %v7389_v28 = vmul.f32 %v8115_v22, %v7382_v35 }
0x34b5   : > { %v7396_v30 = vadd.f32 %v8116_v24, %v7389_v28 }
0x34b7   : > { %7399 = vadd.xlane.f32.xlu1 %v7396_v30 }
0x3544   : > { %v7400_v33 = vpop.xlane.xlu1 %7399 }
0x3545   : > { %v7401_v18 = vmul.f32 0.0078125, %v7400_v33 }
0x3547   : > { %v7402_v34 = vsub.f32 %v7396_v30, %v7401_v18 }
0x3549   : > { %v7403_v36 = vmul.f32 %v7402_v34, %v7402_v34 }
0x354b   : > { %7404 = vadd.xlane.f32.xlu0 %v7403_v36 }
0x35d8   : > { %v7405_v42 = vpop.xlane.xlu0 %7404 }
0x35d9   : > { %v7406_v44 = vmul.f32 0.0078125, %v7405_v42 }
0x35db   : > { %v7407_v48 = vadd.f32 1e-05, %v7406_v44 }
0x35dd   : > { %9643 = vrsqrt.f32 %v7407_v48 }
0x35e7   : > { %v9644_v0 = vpop.eup %9643 }
0x35e8   : > { %v7409_v50 = vmul.f32 %v9644_v0, %v7402_v34 }
0x35ea   : > { %v7416_v52 = vmul.f32 %v8117_v49, %v7409_v50 }
0x35ec   : > { %v7423_v54 = vadd.f32 %v8118_v51, %v7416_v52 }
0x35ee   : > { %v7440_v55 = vpack.c.bf16 %v7423_v54, %v7423_v54 }
0x35f0   : > { %9019 = vmatmul.mubr.bf16.vlgmr.msra.gmra.mrb[164].mxu1 %v7440_v55 }
0x36c3   : > { %v7530_v10 = vpop.f32.mrb[164].mxu1 }
0x36c4   : > { %v7531_v1 = vadd.f32 %v8119_v56, %v7530_v10  ;;  %v9020_v14 = vpop.f32.mrb[165].mxu1 }
0x36c5   : > { %v7533_v57 = vpop.f32.mrb[166].mxu1 }
0x36c6   : > { %7536 = vst [vmem:[%s485_s22] sm:$0xff] %v7531_v1  ;;  %v9021_v58 = vpop.f32.mrb[167].mxu1 }
0x36c7 PF: > { %s24_s13 = sadd.s32 1, %s9837_s13  }
0x36c8   : > { %p21_p6 = scmp.ge.s32.totalorder %s24_s13, 4  }
0x36ca   :  { %23 = sbr.rel (!%p21_p6) target bundleno = 4 (0x4), region = 124 }
0x36d1   :  { %7556 = vsyncpa [#allocation3], 1 }
0x36d2   :  { %7558 = vsyncpa [#allocation3 + $0x1], 1 }
0x36d3   :  { %7559 = vsyncpa [#allocation5], 1 }
0x36d4   :  { %7560 = vsyncpa [#allocation8], 1 }
0x36d5   :  { %7561 = vsyncpa [#allocation11], 1 }

</bundles_post_ra>
